<compile_context>
chip_gen: v6e
topology: v6e:2x2x1
jax: 0.10.0
libtpu: 0.0.40
codegen_flags: <defaults>
</compile_context>

<pallas_src>
import numpy as np

import jax
import jax.numpy as jnp
from jax.experimental import pallas as pl
from jax.experimental.pallas import tpu as pltpu


# Flip to jnp.bfloat16 on v6e/v7x for ~2x MXU rate and half the weight-table traffic
# (accumulation, selectors and the bias/ReLU/max epilogue stay float32).
MXU_DTYPE = jnp.float32
BATCH_BLOCK = 8                       # images per grid step
_VMEM_LIMIT = 32 * 1024 * 1024
LANE = 128                            # lane-padded width of every activation/parity half


# ------------------------------ fused Pallas kernel ------------------------------

def _cnn_fused_kernel(x_ref, t1_ref, s1_ref, b1_ref,
                      t2_ref, s2_ref, b2_ref,
                      w3_ref, b3_ref, w4_ref, b4_ref, w5_ref, b5_ref,
                      o_ref):
    """Whole CNNModel forward for one batch block of BB images.

    x_ref : (BB*32, 96)        input slab, row = b*32 + h, col = c*32 + w
    t*_ref: (5, K, 2*128)      parity-packed Toeplitz conv+W-pool weights (per kernel row)
    s*_ref: (2, OUT_ROWS, R)   0/1 selectors doing the H-pool (+ per-image row selection)
    b*_ref: (1, 128)           lane-padded bias rows
    w3_ref: (5, 128, 128)      conv3 weights per pooled-H index; w4/w5: padded FC weights
    o_ref : (BB, 128)          lane-dense logits block (cols 0..5 valid)
    """
    half = t1_ref.shape[-1] // 2          # 128: one W-pool parity per lane half

    def conv_relu_pool(src, t_ref, s_ref, b_ref):
        kh = t_ref.shape[0]
        rows = s_ref.shape[-1]             # "tall" conv output rows (BB*H_in - 4)
        # 5x5 conv (+ fold of the W-direction 2x2 pooling) as KH shifted-row matmuls.
        u = jnp.dot(src[0:rows, :].astype(t_ref.dtype), t_ref[0],
                    preferred_element_type=jnp.float32)
        for k in range(1, kh):
            u = u + jnp.dot(src[k:k + rows, :].astype(t_ref.dtype), t_ref[k],
                            preferred_element_type=jnp.float32)
        # pool along W == max over the two packed parity halves (128-aligned lane slices).
        m = jnp.maximum(u[:, :half], u[:, half:])
        # pool along H (and drop cross-image garbage rows) with exact 0/1 selector matmuls.
        p = jnp.maximum(
            jnp.dot(s_ref[0], m, preferred_element_type=jnp.float32),
            jnp.dot(s_ref[1], m, preferred_element_type=jnp.float32))
        return jnp.maximum(p + b_ref[...], 0.0)

    h1 = conv_relu_pool(x_ref, t1_ref, s1_ref, b1_ref)    # (BB*14, 128) row = b*14 + p
    h2 = conv_relu_pool(h1, t2_ref, s2_ref, b2_ref)        # (5*BB, 128)  row = p*BB + b

    # conv3 (5x5 over the 5x5x16 map -> full contraction) as 5 aligned-row-slice matmuls.
    bb = o_ref.shape[0]
    kh3 = w3_ref.shape[0]
    g = jnp.dot(h2[0:bb, :].astype(w3_ref.dtype), w3_ref[0],
                preferred_element_type=jnp.float32)
    for h in range(1, kh3):
        g = g + jnp.dot(h2[h * bb:(h + 1) * bb, :].astype(w3_ref.dtype), w3_ref[h],
                        preferred_element_type=jnp.float32)
    g = jnp.maximum(g + b3_ref[...], 0.0)                   # (BB, 128) conv3+ReLU
    f = jnp.maximum(jnp.dot(g.astype(w4_ref.dtype), w4_ref[...],
                            preferred_element_type=jnp.float32) + b4_ref[...], 0.0)
    o_ref[...] = jnp.dot(f.astype(w5_ref.dtype), w5_ref[...],
                         preferred_element_type=jnp.float32) + b5_ref[...]


# ------------------------------ Pallas wrapper ------------------------------

@jax.jit
def cnn_forward(kp, x_nchw):
    """Fused Pallas forward pass of CNNModel. x_nchw: (B, 3, 32, 32) float32."""
    bb = kp["s1"].shape[1] // 14                     # batch block size baked into selectors
    B = x_nchw.shape[0]
    bpad = ((B + bb - 1) // bb) * bb                 # pad batch to a multiple of bb
    x = x_nchw.astype(jnp.float32)
    if bpad != B:
        x = jnp.pad(x, ((0, bpad - B), (0, 0), (0, 0), (0, 0)))

    # Single small input relayout: NCHW -> batch-folded rows (B*H, C*W), col = c*32 + w.
    # TODO(synk): accept channels-last / (B*H, C*W) input directly to drop this transpose.
    x2d = jnp.transpose(x, (0, 2, 1, 3)).reshape(bpad * 32, 3 * 32)

    r1 = bb * 32 - 4
    r2 = bb * 14 - 4
    n_blocks = bpad // bb                            # >= 2 for B > bb (both TCs on v7x)

    out = pl.pallas_call(
        _cnn_fused_kernel,
        out_shape=jax.ShapeDtypeStruct((bpad, LANE), jnp.float32),
        grid=(n_blocks,),
        in_specs=[
            pl.BlockSpec((bb * 32, 96), lambda i: (i, 0)),         # input slab per block
            pl.BlockSpec((5, 96, 2 * LANE), lambda i: (0, 0, 0)),  # T1 (fetched once)
            pl.BlockSpec((2, bb * 14, r1), lambda i: (0, 0, 0)),   # S1
            pl.BlockSpec((1, LANE), lambda i: (0, 0)),             # b1
            pl.BlockSpec((5, LANE, 2 * LANE), lambda i: (0, 0, 0)),  # T2
            pl.BlockSpec((2, 5 * bb, r2), lambda i: (0, 0, 0)),    # S2
            pl.BlockSpec((1, LANE), lambda i: (0, 0)),             # b2
            pl.BlockSpec((5, LANE, LANE), lambda i: (0, 0, 0)),    # W3 (conv3)
            pl.BlockSpec((1, LANE), lambda i: (0, 0)),             # b3
            pl.BlockSpec((LANE, LANE), lambda i: (0, 0)),          # W4 (fc1)
            pl.BlockSpec((1, LANE), lambda i: (0, 0)),             # b4
            pl.BlockSpec((LANE, LANE), lambda i: (0, 0)),          # W5 (fc2)
            pl.BlockSpec((1, LANE), lambda i: (0, 0)),             # b5
        ],
        out_specs=pl.BlockSpec((bb, LANE), lambda i: (i, 0)),
        compiler_params=pltpu.CompilerParams(
            dimension_semantics=("parallel",),       # shard batch blocks across TCs
            vmem_limit_bytes=_VMEM_LIMIT),
    )(x2d, kp["t1"], kp["s1"], kp["b1"], kp["t2"], kp["s2"], kp["b2"],
      kp["w3"], kp["b3"], kp["w4"], kp["b4"], kp["w5"], kp["b5"])

    return out[:B, :6]


# ----------------------- parameter init & preprocessing ---------------------

def init_torch_params(key):
    """PyTorch-native parameter shapes/init (Conv2d OIHW weights, Linear (out, in))."""
    ks = jax.random.split(key, 10)

    def u(k, shape, fan_in):
        bound = 1.0 / np.sqrt(fan_in)
        return jax.random.uniform(k, shape, jnp.float32, -bound, bound)

    return {
        "conv1_w": u(ks[0], (6, 3, 5, 5), 75),      "conv1_b": u(ks[1], (6,), 75),
        "conv2_w": u(ks[2], (16, 6, 5, 5), 150),    "conv2_b": u(ks[3], (16,), 150),
        "conv3_w": u(ks[4], (120, 16, 5, 5), 400),  "conv3_b": u(ks[5], (120,), 400),
        "fc1_w": u(ks[6], (84, 120), 120),          "fc1_b": u(ks[7], (84,), 120),
        "fc2_w": u(ks[8], (6, 84), 84),             "fc2_b": u(ks[9], (6,), 84),
    }


def _conv_pool_tables(w_oihw, b, h_in, w_in, in_cols, dtype):
    """Parity-packed Toeplitz weights (KH, in_cols, 2*128) folding the W-direction
    2x2 pooling into even/odd output-column lane halves, plus the lane-padded bias row.

    T[k, ci*w_in + iw, s*128 + co*pw + p] = w[co, ci, k, q]  whenever iw == 2*p + s + q
    """
    w = np.asarray(w_oihw, np.float32)
    cout, cin, kh, kw = w.shape
    ow = w_in - kw + 1
    pw = ow // 2
    assert cin * w_in <= in_cols and cout * pw <= LANE

    t = np.zeros((kh, in_cols, 2 * LANE), np.float32)
    co = np.arange(cout)
    for s in range(2):
        for k in range(kh):
            for q in range(kw):
                for ci in range(cin):
                    for p in range(pw):
                        iw = 2 * p + s + q
                        t[k, ci * w_in + iw, s * LANE + co * pw + p] = w[:, ci, k, q]

    brow = np.zeros((1, LANE), np.float32)
    brow[0, :cout * pw] = np.repeat(np.asarray(b, np.float32), pw)
    return jnp.asarray(t, dtype), jnp.asarray(brow)


def _pool_row_selectors(bb, h_in, ph, out_order):
    """0/1 selectors doing the H-direction 2x2 pooling in the batch-folded row layout.
    out_order='bp': output row b*ph + p (layout conv2 consumes);
    out_order='pb': output row p*bb + b (head layout: rows for fixed p are contiguous)."""
    kh = 5
    r = bb * h_in - (kh - 1)
    sel = np.zeros((2, bb * ph, r), np.float32)
    for s in range(2):
        for b in range(bb):
            for p in range(ph):
                row = b * ph + p if out_order == "bp" else p * bb + b
                sel[s, row, b * h_in + 2 * p + s] = 1.0
    return jnp.asarray(sel, jnp.float32)


def _pad_to(a, rows, cols):
    out = np.zeros((rows, cols), np.float32)
    out[:a.shape[0], :a.shape[1]] = a
    return out


def prepare_kernel_params(tp, bb=BATCH_BLOCK, dtype=MXU_DTYPE):
    """One-time, host-side conversion of PyTorch-layout params into the fused-kernel form."""
    t1, b1 = _conv_pool_tables(tp["conv1_w"], tp["conv1_b"], 32, 32, in_cols=96, dtype=dtype)
    t2, b2 = _conv_pool_tables(tp["conv2_w"], tp["conv2_b"], 14, 14, in_cols=LANE, dtype=dtype)
    s1 = _pool_row_selectors(bb, 32, 14, "bp")
    s2 = _pool_row_selectors(bb, 14, 5, "pb")

    # conv3 as a full contraction over the 5x5x16 map, split per pooled-H index:
    # W3[h, c*5 + w, co] = conv3_w[co, c, h, w]; rows 80..127 and cols 120..127 are zero.
    w3 = np.asarray(tp["conv3_w"], np.float32)                     # (120, 16, 5, 5)
    w3h = np.zeros((5, LANE, LANE), np.float32)
    for h in range(5):
        w3h[h, :80, :120] = w3[:, :, h, :].transpose(1, 2, 0).reshape(80, 120)

    return {
        "t1": t1, "s1": s1, "b1": b1,
        "t2": t2, "s2": s2, "b2": b2,
        "w3": jnp.asarray(w3h, dtype),
        "b3": jnp.asarray(_pad_to(np.asarray(tp["conv3_b"], np.float32)[None, :], 1, LANE)),
        "w4": jnp.asarray(_pad_to(np.asarray(tp["fc1_w"], np.float32).T, LANE, LANE), dtype),
        "b4": jnp.asarray(_pad_to(np.asarray(tp["fc1_b"], np.float32)[None, :], 1, LANE)),
        "w5": jnp.asarray(_pad_to(np.asarray(tp["fc2_w"], np.float32).T, LANE, LANE), dtype),
        "b5": jnp.asarray(_pad_to(np.asarray(tp["fc2_b"], np.float32)[None, :], 1, LANE)),
    }


# ------------------------- plain-XLA reference (check) ----------------------

def reference_forward(tp, x):
    dn = ("NCHW", "OIHW", "NCHW")

    def conv(h, w, b):
        y = jax.lax.conv_general_dilated(h, w, (1, 1), "VALID", dimension_numbers=dn)
        return y + b[None, :, None, None]

    def pool(h):
        return jax.lax.reduce_window(h, -jnp.inf, jax.lax.max,
                                     (1, 1, 2, 2), (1, 1, 2, 2), "VALID")

    h = pool(jax.nn.relu(conv(x, tp["conv1_w"], tp["conv1_b"])))
    h = pool(jax.nn.relu(conv(h, tp["conv2_w"], tp["conv2_b"])))
    h = jax.nn.relu(conv(h, tp["conv3_w"], tp["conv3_b"])).reshape(x.shape[0], 120)
    h = jax.nn.relu(h @ tp["fc1_w"].T + tp["fc1_b"])
    return h @ tp["fc2_w"].T + tp["fc2_b"]


if __name__ == "__main__":
    key = jax.random.PRNGKey(0)
    pkey, xkey = jax.random.split(key)
    torch_params = init_torch_params(pkey)
    kparams = prepare_kernel_params(torch_params)

    # Spatial size must be 32x32 so conv3's output is 1x1 (flattened_size == 120).
    # B=16 with an 8-image batch block -> a 2-step grid (both TensorCores busy on v7x).
    x = jax.random.normal(xkey, (16, 3, 32, 32), jnp.float32)

    out = cnn_forward(kparams, x)
    jax.block_until_ready(out)
    assert out.shape == (16, 6) and out.dtype == jnp.float32

    # Numerical self-check against a plain-XLA implementation of the PyTorch module.
    ref = reference_forward(torch_params, x)
    err = float(jnp.max(jnp.abs(out - ref)))
    assert jnp.allclose(out, ref, rtol=2e-2, atol=2e-2), "max abs err %f" % err

    print("KERNEL_OK")
</pallas_src>

<mosaic_0001>
module attributes {stable_mosaic.version = 11 : i64} {
  func.func @_cnn_fused_kernel(%arg0: i32, %arg1: memref<256x96xf32, #tpu.memory_space<vmem>>, %arg2: memref<5x96x256xf32, #tpu.memory_space<vmem>>, %arg3: memref<2x112x252xf32, #tpu.memory_space<vmem>>, %arg4: memref<1x128xf32, #tpu.memory_space<vmem>>, %arg5: memref<5x128x256xf32, #tpu.memory_space<vmem>>, %arg6: memref<2x40x108xf32, #tpu.memory_space<vmem>>, %arg7: memref<1x128xf32, #tpu.memory_space<vmem>>, %arg8: memref<5x128x128xf32, #tpu.memory_space<vmem>>, %arg9: memref<1x128xf32, #tpu.memory_space<vmem>>, %arg10: memref<128x128xf32, #tpu.memory_space<vmem>>, %arg11: memref<1x128xf32, #tpu.memory_space<vmem>>, %arg12: memref<128x128xf32, #tpu.memory_space<vmem>>, %arg13: memref<1x128xf32, #tpu.memory_space<vmem>>, %arg14: memref<8x128xf32, #tpu.memory_space<vmem>>) attributes {dimension_semantics = [#tpu.dimension_semantics<parallel>], iteration_bounds = array<i64: 2>, scalar_prefetch = 0 : i64, scratch_operands = 0 : i64, tpu.core_type = #tpu.core_type<tc>, window_params = [{transform_indices = @transform_0, window_bounds = array<i64: 256, 96>}, {pipeline_mode = #tpu.pipeline_mode<synchronous>, transform_indices = @transform_1, window_bounds = array<i64: 5, 96, 256>}, {pipeline_mode = #tpu.pipeline_mode<synchronous>, transform_indices = @transform_2, window_bounds = array<i64: 2, 112, 252>}, {pipeline_mode = #tpu.pipeline_mode<synchronous>, transform_indices = @transform_3, window_bounds = array<i64: 1, 128>}, {pipeline_mode = #tpu.pipeline_mode<synchronous>, transform_indices = @transform_4, window_bounds = array<i64: 5, 128, 256>}, {pipeline_mode = #tpu.pipeline_mode<synchronous>, transform_indices = @transform_5, window_bounds = array<i64: 2, 40, 108>}, {pipeline_mode = #tpu.pipeline_mode<synchronous>, transform_indices = @transform_6, window_bounds = array<i64: 1, 128>}, {pipeline_mode = #tpu.pipeline_mode<synchronous>, transform_indices = @transform_7, window_bounds = array<i64: 5, 128, 128>}, {pipeline_mode = #tpu.pipeline_mode<synchronous>, transform_indices = @transform_8, window_bounds = array<i64: 1, 128>}, {pipeline_mode = #tpu.pipeline_mode<synchronous>, transform_indices = @transform_9, window_bounds = array<i64: 128, 128>}, {pipeline_mode = #tpu.pipeline_mode<synchronous>, transform_indices = @transform_10, window_bounds = array<i64: 1, 128>}, {pipeline_mode = #tpu.pipeline_mode<synchronous>, transform_indices = @transform_11, window_bounds = array<i64: 128, 128>}, {pipeline_mode = #tpu.pipeline_mode<synchronous>, transform_indices = @transform_12, window_bounds = array<i64: 1, 128>}, {transform_indices = @transform_13, window_bounds = array<i64: 8, 128>}]} {
    %c0 = arith.constant 0 : index
    %c0_0 = arith.constant 0 : index
    %0 = vector.load %arg1[%c0, %c0_0] : memref<256x96xf32, #tpu.memory_space<vmem>>, vector<252x96xf32>
    %c0_1 = arith.constant 0 : index
    %c0_2 = arith.constant 0 : index
    %c0_3 = arith.constant 0 : index
    %1 = vector.load %arg2[%c0_1, %c0_2, %c0_3] : memref<5x96x256xf32, #tpu.memory_space<vmem>>, vector<1x96x256xf32>
    %2 = vector.shape_cast %1 : vector<1x96x256xf32> to vector<96x256xf32>
    %cst = arith.constant dense<0.000000e+00> : vector<252x256xf32>
    %3 = tpu.matmul %0, %2, %cst {dimension_numbers = #tpu.dot_dimension_numbers<[1], [0], [0], [1], [0, 0, 1, 1], [], []>} : vector<252x96xf32>, vector<96x256xf32>, vector<252x256xf32> -> vector<252x256xf32>
    %c1 = arith.constant 1 : index
    %c0_4 = arith.constant 0 : index
    %4 = vector.load %arg1[%c1, %c0_4] : memref<256x96xf32, #tpu.memory_space<vmem>>, vector<252x96xf32>
    %c1_5 = arith.constant 1 : index
    %c0_6 = arith.constant 0 : index
    %c0_7 = arith.constant 0 : index
    %5 = vector.load %arg2[%c1_5, %c0_6, %c0_7] : memref<5x96x256xf32, #tpu.memory_space<vmem>>, vector<1x96x256xf32>
    %6 = vector.shape_cast %5 : vector<1x96x256xf32> to vector<96x256xf32>
    %cst_8 = arith.constant dense<0.000000e+00> : vector<252x256xf32>
    %7 = tpu.matmul %4, %6, %cst_8 {dimension_numbers = #tpu.dot_dimension_numbers<[1], [0], [0], [1], [0, 0, 1, 1], [], []>} : vector<252x96xf32>, vector<96x256xf32>, vector<252x256xf32> -> vector<252x256xf32>
    %8 = arith.addf %3, %7 : vector<252x256xf32>
    %c2 = arith.constant 2 : index
    %c0_9 = arith.constant 0 : index
    %9 = vector.load %arg1[%c2, %c0_9] : memref<256x96xf32, #tpu.memory_space<vmem>>, vector<252x96xf32>
    %c2_10 = arith.constant 2 : index
    %c0_11 = arith.constant 0 : index
    %c0_12 = arith.constant 0 : index
    %10 = vector.load %arg2[%c2_10, %c0_11, %c0_12] : memref<5x96x256xf32, #tpu.memory_space<vmem>>, vector<1x96x256xf32>
    %11 = vector.shape_cast %10 : vector<1x96x256xf32> to vector<96x256xf32>
    %cst_13 = arith.constant dense<0.000000e+00> : vector<252x256xf32>
    %12 = tpu.matmul %9, %11, %cst_13 {dimension_numbers = #tpu.dot_dimension_numbers<[1], [0], [0], [1], [0, 0, 1, 1], [], []>} : vector<252x96xf32>, vector<96x256xf32>, vector<252x256xf32> -> vector<252x256xf32>
    %13 = arith.addf %8, %12 : vector<252x256xf32>
    %c3 = arith.constant 3 : index
    %c0_14 = arith.constant 0 : index
    %14 = vector.load %arg1[%c3, %c0_14] : memref<256x96xf32, #tpu.memory_space<vmem>>, vector<252x96xf32>
    %c3_15 = arith.constant 3 : index
    %c0_16 = arith.constant 0 : index
    %c0_17 = arith.constant 0 : index
    %15 = vector.load %arg2[%c3_15, %c0_16, %c0_17] : memref<5x96x256xf32, #tpu.memory_space<vmem>>, vector<1x96x256xf32>
    %16 = vector.shape_cast %15 : vector<1x96x256xf32> to vector<96x256xf32>
    %cst_18 = arith.constant dense<0.000000e+00> : vector<252x256xf32>
    %17 = tpu.matmul %14, %16, %cst_18 {dimension_numbers = #tpu.dot_dimension_numbers<[1], [0], [0], [1], [0, 0, 1, 1], [], []>} : vector<252x96xf32>, vector<96x256xf32>, vector<252x256xf32> -> vector<252x256xf32>
    %18 = arith.addf %13, %17 : vector<252x256xf32>
    %c4 = arith.constant 4 : index
    %c0_19 = arith.constant 0 : index
    %19 = vector.load %arg1[%c4, %c0_19] : memref<256x96xf32, #tpu.memory_space<vmem>>, vector<252x96xf32>
    %c4_20 = arith.constant 4 : index
    %c0_21 = arith.constant 0 : index
    %c0_22 = arith.constant 0 : index
    %20 = vector.load %arg2[%c4_20, %c0_21, %c0_22] : memref<5x96x256xf32, #tpu.memory_space<vmem>>, vector<1x96x256xf32>
    %21 = vector.shape_cast %20 : vector<1x96x256xf32> to vector<96x256xf32>
    %cst_23 = arith.constant dense<0.000000e+00> : vector<252x256xf32>
    %22 = tpu.matmul %19, %21, %cst_23 {dimension_numbers = #tpu.dot_dimension_numbers<[1], [0], [0], [1], [0, 0, 1, 1], [], []>} : vector<252x96xf32>, vector<96x256xf32>, vector<252x256xf32> -> vector<252x256xf32>
    %23 = arith.addf %18, %22 : vector<252x256xf32>
    %24 = vector.extract_strided_slice %23 {offsets = [0, 0], sizes = [252, 128], strides = [1, 1]} : vector<252x256xf32> to vector<252x128xf32>
    %25 = vector.extract_strided_slice %23 {offsets = [0, 128], sizes = [252, 128], strides = [1, 1]} : vector<252x256xf32> to vector<252x128xf32>
    %26 = arith.maximumf %24, %25 : vector<252x128xf32>
    %c0_24 = arith.constant 0 : index
    %c0_25 = arith.constant 0 : index
    %c0_26 = arith.constant 0 : index
    %27 = vector.load %arg3[%c0_24, %c0_25, %c0_26] : memref<2x112x252xf32, #tpu.memory_space<vmem>>, vector<1x112x252xf32>
    %28 = vector.shape_cast %27 : vector<1x112x252xf32> to vector<112x252xf32>
    %cst_27 = arith.constant dense<0.000000e+00> : vector<112x128xf32>
    %29 = tpu.matmul %28, %26, %cst_27 {dimension_numbers = #tpu.dot_dimension_numbers<[1], [0], [0], [1], [0, 0, 1, 1], [], []>} : vector<112x252xf32>, vector<252x128xf32>, vector<112x128xf32> -> vector<112x128xf32>
    %c1_28 = arith.constant 1 : index
    %c0_29 = arith.constant 0 : index
    %c0_30 = arith.constant 0 : index
    %30 = vector.load %arg3[%c1_28, %c0_29, %c0_30] : memref<2x112x252xf32, #tpu.memory_space<vmem>>, vector<1x112x252xf32>
    %31 = vector.shape_cast %30 : vector<1x112x252xf32> to vector<112x252xf32>
    %cst_31 = arith.constant dense<0.000000e+00> : vector<112x128xf32>
    %32 = tpu.matmul %31, %26, %cst_31 {dimension_numbers = #tpu.dot_dimension_numbers<[1], [0], [0], [1], [0, 0, 1, 1], [], []>} : vector<112x252xf32>, vector<252x128xf32>, vector<112x128xf32> -> vector<112x128xf32>
    %33 = arith.maximumf %29, %32 : vector<112x128xf32>
    %c0_32 = arith.constant 0 : index
    %c0_33 = arith.constant 0 : index
    %34 = vector.load %arg4[%c0_32, %c0_33] : memref<1x128xf32, #tpu.memory_space<vmem>>, vector<1x128xf32>
    %35 = vector.broadcast %34 : vector<1x128xf32> to vector<112x128xf32>
    %36 = arith.addf %33, %35 : vector<112x128xf32>
    %cst_34 = arith.constant 0.000000e+00 : f32
    %37 = vector.broadcast %cst_34 : f32 to vector<112x128xf32>
    %38 = arith.maximumf %36, %37 : vector<112x128xf32>
    %39 = vector.extract_strided_slice %38 {offsets = [0, 0], sizes = [108, 128], strides = [1, 1]} : vector<112x128xf32> to vector<108x128xf32>
    %c0_35 = arith.constant 0 : index
    %c0_36 = arith.constant 0 : index
    %c0_37 = arith.constant 0 : index
    %40 = vector.load %arg5[%c0_35, %c0_36, %c0_37] : memref<5x128x256xf32, #tpu.memory_space<vmem>>, vector<1x128x256xf32>
    %41 = vector.shape_cast %40 : vector<1x128x256xf32> to vector<128x256xf32>
    %cst_38 = arith.constant dense<0.000000e+00> : vector<108x256xf32>
    %42 = tpu.matmul %39, %41, %cst_38 {dimension_numbers = #tpu.dot_dimension_numbers<[1], [0], [0], [1], [0, 0, 1, 1], [], []>} : vector<108x128xf32>, vector<128x256xf32>, vector<108x256xf32> -> vector<108x256xf32>
    %43 = vector.extract_strided_slice %38 {offsets = [1, 0], sizes = [108, 128], strides = [1, 1]} : vector<112x128xf32> to vector<108x128xf32>
    %c1_39 = arith.constant 1 : index
    %c0_40 = arith.constant 0 : index
    %c0_41 = arith.constant 0 : index
    %44 = vector.load %arg5[%c1_39, %c0_40, %c0_41] : memref<5x128x256xf32, #tpu.memory_space<vmem>>, vector<1x128x256xf32>
    %45 = vector.shape_cast %44 : vector<1x128x256xf32> to vector<128x256xf32>
    %cst_42 = arith.constant dense<0.000000e+00> : vector<108x256xf32>
    %46 = tpu.matmul %43, %45, %cst_42 {dimension_numbers = #tpu.dot_dimension_numbers<[1], [0], [0], [1], [0, 0, 1, 1], [], []>} : vector<108x128xf32>, vector<128x256xf32>, vector<108x256xf32> -> vector<108x256xf32>
    %47 = arith.addf %42, %46 : vector<108x256xf32>
    %48 = vector.extract_strided_slice %38 {offsets = [2, 0], sizes = [108, 128], strides = [1, 1]} : vector<112x128xf32> to vector<108x128xf32>
    %c2_43 = arith.constant 2 : index
    %c0_44 = arith.constant 0 : index
    %c0_45 = arith.constant 0 : index
    %49 = vector.load %arg5[%c2_43, %c0_44, %c0_45] : memref<5x128x256xf32, #tpu.memory_space<vmem>>, vector<1x128x256xf32>
    %50 = vector.shape_cast %49 : vector<1x128x256xf32> to vector<128x256xf32>
    %cst_46 = arith.constant dense<0.000000e+00> : vector<108x256xf32>
    %51 = tpu.matmul %48, %50, %cst_46 {dimension_numbers = #tpu.dot_dimension_numbers<[1], [0], [0], [1], [0, 0, 1, 1], [], []>} : vector<108x128xf32>, vector<128x256xf32>, vector<108x256xf32> -> vector<108x256xf32>
    %52 = arith.addf %47, %51 : vector<108x256xf32>
    %53 = vector.extract_strided_slice %38 {offsets = [3, 0], sizes = [108, 128], strides = [1, 1]} : vector<112x128xf32> to vector<108x128xf32>
    %c3_47 = arith.constant 3 : index
    %c0_48 = arith.constant 0 : index
    %c0_49 = arith.constant 0 : index
    %54 = vector.load %arg5[%c3_47, %c0_48, %c0_49] : memref<5x128x256xf32, #tpu.memory_space<vmem>>, vector<1x128x256xf32>
    %55 = vector.shape_cast %54 : vector<1x128x256xf32> to vector<128x256xf32>
    %cst_50 = arith.constant dense<0.000000e+00> : vector<108x256xf32>
    %56 = tpu.matmul %53, %55, %cst_50 {dimension_numbers = #tpu.dot_dimension_numbers<[1], [0], [0], [1], [0, 0, 1, 1], [], []>} : vector<108x128xf32>, vector<128x256xf32>, vector<108x256xf32> -> vector<108x256xf32>
    %57 = arith.addf %52, %56 : vector<108x256xf32>
    %58 = vector.extract_strided_slice %38 {offsets = [4, 0], sizes = [108, 128], strides = [1, 1]} : vector<112x128xf32> to vector<108x128xf32>
    %c4_51 = arith.constant 4 : index
    %c0_52 = arith.constant 0 : index
    %c0_53 = arith.constant 0 : index
    %59 = vector.load %arg5[%c4_51, %c0_52, %c0_53] : memref<5x128x256xf32, #tpu.memory_space<vmem>>, vector<1x128x256xf32>
    %60 = vector.shape_cast %59 : vector<1x128x256xf32> to vector<128x256xf32>
    %cst_54 = arith.constant dense<0.000000e+00> : vector<108x256xf32>
    %61 = tpu.matmul %58, %60, %cst_54 {dimension_numbers = #tpu.dot_dimension_numbers<[1], [0], [0], [1], [0, 0, 1, 1], [], []>} : vector<108x128xf32>, vector<128x256xf32>, vector<108x256xf32> -> vector<108x256xf32>
    %62 = arith.addf %57, %61 : vector<108x256xf32>
    %63 = vector.extract_strided_slice %62 {offsets = [0, 0], sizes = [108, 128], strides = [1, 1]} : vector<108x256xf32> to vector<108x128xf32>
    %64 = vector.extract_strided_slice %62 {offsets = [0, 128], sizes = [108, 128], strides = [1, 1]} : vector<108x256xf32> to vector<108x128xf32>
    %65 = arith.maximumf %63, %64 : vector<108x128xf32>
    %c0_55 = arith.constant 0 : index
    %c0_56 = arith.constant 0 : index
    %c0_57 = arith.constant 0 : index
    %66 = vector.load %arg6[%c0_55, %c0_56, %c0_57] : memref<2x40x108xf32, #tpu.memory_space<vmem>>, vector<1x40x108xf32>
    %67 = vector.shape_cast %66 : vector<1x40x108xf32> to vector<40x108xf32>
    %cst_58 = arith.constant dense<0.000000e+00> : vector<40x128xf32>
    %68 = tpu.matmul %67, %65, %cst_58 {dimension_numbers = #tpu.dot_dimension_numbers<[1], [0], [0], [1], [0, 0, 1, 1], [], []>} : vector<40x108xf32>, vector<108x128xf32>, vector<40x128xf32> -> vector<40x128xf32>
    %c1_59 = arith.constant 1 : index
    %c0_60 = arith.constant 0 : index
    %c0_61 = arith.constant 0 : index
    %69 = vector.load %arg6[%c1_59, %c0_60, %c0_61] : memref<2x40x108xf32, #tpu.memory_space<vmem>>, vector<1x40x108xf32>
    %70 = vector.shape_cast %69 : vector<1x40x108xf32> to vector<40x108xf32>
    %cst_62 = arith.constant dense<0.000000e+00> : vector<40x128xf32>
    %71 = tpu.matmul %70, %65, %cst_62 {dimension_numbers = #tpu.dot_dimension_numbers<[1], [0], [0], [1], [0, 0, 1, 1], [], []>} : vector<40x108xf32>, vector<108x128xf32>, vector<40x128xf32> -> vector<40x128xf32>
    %72 = arith.maximumf %68, %71 : vector<40x128xf32>
    %c0_63 = arith.constant 0 : index
    %c0_64 = arith.constant 0 : index
    %73 = vector.load %arg7[%c0_63, %c0_64] : memref<1x128xf32, #tpu.memory_space<vmem>>, vector<1x128xf32>
    %74 = vector.broadcast %73 : vector<1x128xf32> to vector<40x128xf32>
    %75 = arith.addf %72, %74 : vector<40x128xf32>
    %cst_65 = arith.constant 0.000000e+00 : f32
    %76 = vector.broadcast %cst_65 : f32 to vector<40x128xf32>
    %77 = arith.maximumf %75, %76 : vector<40x128xf32>
    %78 = vector.extract_strided_slice %77 {offsets = [0, 0], sizes = [8, 128], strides = [1, 1]} : vector<40x128xf32> to vector<8x128xf32>
    %c0_66 = arith.constant 0 : index
    %c0_67 = arith.constant 0 : index
    %c0_68 = arith.constant 0 : index
    %79 = vector.load %arg8[%c0_66, %c0_67, %c0_68] : memref<5x128x128xf32, #tpu.memory_space<vmem>>, vector<1x128x128xf32>
    %80 = vector.shape_cast %79 : vector<1x128x128xf32> to vector<128x128xf32>
    %cst_69 = arith.constant dense<0.000000e+00> : vector<8x128xf32>
    %81 = tpu.matmul %78, %80, %cst_69 {dimension_numbers = #tpu.dot_dimension_numbers<[1], [0], [0], [1], [0, 0, 1, 1], [], []>} : vector<8x128xf32>, vector<128x128xf32>, vector<8x128xf32> -> vector<8x128xf32>
    %82 = vector.extract_strided_slice %77 {offsets = [8, 0], sizes = [8, 128], strides = [1, 1]} : vector<40x128xf32> to vector<8x128xf32>
    %c1_70 = arith.constant 1 : index
    %c0_71 = arith.constant 0 : index
    %c0_72 = arith.constant 0 : index
    %83 = vector.load %arg8[%c1_70, %c0_71, %c0_72] : memref<5x128x128xf32, #tpu.memory_space<vmem>>, vector<1x128x128xf32>
    %84 = vector.shape_cast %83 : vector<1x128x128xf32> to vector<128x128xf32>
    %cst_73 = arith.constant dense<0.000000e+00> : vector<8x128xf32>
    %85 = tpu.matmul %82, %84, %cst_73 {dimension_numbers = #tpu.dot_dimension_numbers<[1], [0], [0], [1], [0, 0, 1, 1], [], []>} : vector<8x128xf32>, vector<128x128xf32>, vector<8x128xf32> -> vector<8x128xf32>
    %86 = arith.addf %81, %85 : vector<8x128xf32>
    %87 = vector.extract_strided_slice %77 {offsets = [16, 0], sizes = [8, 128], strides = [1, 1]} : vector<40x128xf32> to vector<8x128xf32>
    %c2_74 = arith.constant 2 : index
    %c0_75 = arith.constant 0 : index
    %c0_76 = arith.constant 0 : index
    %88 = vector.load %arg8[%c2_74, %c0_75, %c0_76] : memref<5x128x128xf32, #tpu.memory_space<vmem>>, vector<1x128x128xf32>
    %89 = vector.shape_cast %88 : vector<1x128x128xf32> to vector<128x128xf32>
    %cst_77 = arith.constant dense<0.000000e+00> : vector<8x128xf32>
    %90 = tpu.matmul %87, %89, %cst_77 {dimension_numbers = #tpu.dot_dimension_numbers<[1], [0], [0], [1], [0, 0, 1, 1], [], []>} : vector<8x128xf32>, vector<128x128xf32>, vector<8x128xf32> -> vector<8x128xf32>
    %91 = arith.addf %86, %90 : vector<8x128xf32>
    %92 = vector.extract_strided_slice %77 {offsets = [24, 0], sizes = [8, 128], strides = [1, 1]} : vector<40x128xf32> to vector<8x128xf32>
    %c3_78 = arith.constant 3 : index
    %c0_79 = arith.constant 0 : index
    %c0_80 = arith.constant 0 : index
    %93 = vector.load %arg8[%c3_78, %c0_79, %c0_80] : memref<5x128x128xf32, #tpu.memory_space<vmem>>, vector<1x128x128xf32>
    %94 = vector.shape_cast %93 : vector<1x128x128xf32> to vector<128x128xf32>
    %cst_81 = arith.constant dense<0.000000e+00> : vector<8x128xf32>
    %95 = tpu.matmul %92, %94, %cst_81 {dimension_numbers = #tpu.dot_dimension_numbers<[1], [0], [0], [1], [0, 0, 1, 1], [], []>} : vector<8x128xf32>, vector<128x128xf32>, vector<8x128xf32> -> vector<8x128xf32>
    %96 = arith.addf %91, %95 : vector<8x128xf32>
    %97 = vector.extract_strided_slice %77 {offsets = [32, 0], sizes = [8, 128], strides = [1, 1]} : vector<40x128xf32> to vector<8x128xf32>
    %c4_82 = arith.constant 4 : index
    %c0_83 = arith.constant 0 : index
    %c0_84 = arith.constant 0 : index
    %98 = vector.load %arg8[%c4_82, %c0_83, %c0_84] : memref<5x128x128xf32, #tpu.memory_space<vmem>>, vector<1x128x128xf32>
    %99 = vector.shape_cast %98 : vector<1x128x128xf32> to vector<128x128xf32>
    %cst_85 = arith.constant dense<0.000000e+00> : vector<8x128xf32>
    %100 = tpu.matmul %97, %99, %cst_85 {dimension_numbers = #tpu.dot_dimension_numbers<[1], [0], [0], [1], [0, 0, 1, 1], [], []>} : vector<8x128xf32>, vector<128x128xf32>, vector<8x128xf32> -> vector<8x128xf32>
    %101 = arith.addf %96, %100 : vector<8x128xf32>
    %c0_86 = arith.constant 0 : index
    %c0_87 = arith.constant 0 : index
    %102 = vector.load %arg9[%c0_86, %c0_87] : memref<1x128xf32, #tpu.memory_space<vmem>>, vector<1x128xf32>
    %103 = vector.broadcast %102 : vector<1x128xf32> to vector<8x128xf32>
    %104 = arith.addf %101, %103 : vector<8x128xf32>
    %cst_88 = arith.constant 0.000000e+00 : f32
    %105 = vector.broadcast %cst_88 : f32 to vector<8x128xf32>
    %106 = arith.maximumf %104, %105 : vector<8x128xf32>
    %c0_89 = arith.constant 0 : index
    %c0_90 = arith.constant 0 : index
    %107 = vector.load %arg10[%c0_89, %c0_90] : memref<128x128xf32, #tpu.memory_space<vmem>>, vector<128x128xf32>
    %cst_91 = arith.constant dense<0.000000e+00> : vector<8x128xf32>
    %108 = tpu.matmul %106, %107, %cst_91 {dimension_numbers = #tpu.dot_dimension_numbers<[1], [0], [0], [1], [0, 0, 1, 1], [], []>} : vector<8x128xf32>, vector<128x128xf32>, vector<8x128xf32> -> vector<8x128xf32>
    %c0_92 = arith.constant 0 : index
    %c0_93 = arith.constant 0 : index
    %109 = vector.load %arg11[%c0_92, %c0_93] : memref<1x128xf32, #tpu.memory_space<vmem>>, vector<1x128xf32>
    %110 = vector.broadcast %109 : vector<1x128xf32> to vector<8x128xf32>
    %111 = arith.addf %108, %110 : vector<8x128xf32>
    %cst_94 = arith.constant 0.000000e+00 : f32
    %112 = vector.broadcast %cst_94 : f32 to vector<8x128xf32>
    %113 = arith.maximumf %111, %112 : vector<8x128xf32>
    %c0_95 = arith.constant 0 : index
    %c0_96 = arith.constant 0 : index
    %114 = vector.load %arg12[%c0_95, %c0_96] : memref<128x128xf32, #tpu.memory_space<vmem>>, vector<128x128xf32>
    %cst_97 = arith.constant dense<0.000000e+00> : vector<8x128xf32>
    %115 = tpu.matmul %113, %114, %cst_97 {dimension_numbers = #tpu.dot_dimension_numbers<[1], [0], [0], [1], [0, 0, 1, 1], [], []>} : vector<8x128xf32>, vector<128x128xf32>, vector<8x128xf32> -> vector<8x128xf32>
    %c0_98 = arith.constant 0 : index
    %c0_99 = arith.constant 0 : index
    %116 = vector.load %arg13[%c0_98, %c0_99] : memref<1x128xf32, #tpu.memory_space<vmem>>, vector<1x128xf32>
    %117 = vector.broadcast %116 : vector<1x128xf32> to vector<8x128xf32>
    %118 = arith.addf %115, %117 : vector<8x128xf32>
    %c0_100 = arith.constant 0 : index
    %c0_101 = arith.constant 0 : index
    %119 = vector.load %arg14[%c0_100, %c0_101] : memref<8x128xf32, #tpu.memory_space<vmem>>, vector<8x128xf32>
    tpu.vector_store %arg14[%c0_100, %c0_101], %118 {strides = array<i32>} : memref<8x128xf32, #tpu.memory_space<vmem>>, vector<8x128xf32>,
    return
  }
  func.func @transform_0(%arg0: i32) -> (i32, i32) {
    %c0_i32 = arith.constant 0 : i32
    %c0_i32_0 = arith.constant 0 : i32
    return %arg0, %c0_i32 : i32, i32
  }
  func.func @transform_1(%arg0: i32) -> (i32, i32, i32) {
    %c0_i32 = arith.constant 0 : i32
    %c0_i32_0 = arith.constant 0 : i32
    %c0_i32_1 = arith.constant 0 : i32
    %c0_i32_2 = arith.constant 0 : i32
    return %c0_i32, %c0_i32_0, %c0_i32_1 : i32, i32, i32
  }
  func.func @transform_2(%arg0: i32) -> (i32, i32, i32) {
    %c0_i32 = arith.constant 0 : i32
    %c0_i32_0 = arith.constant 0 : i32
    %c0_i32_1 = arith.constant 0 : i32
    %c0_i32_2 = arith.constant 0 : i32
    return %c0_i32, %c0_i32_0, %c0_i32_1 : i32, i32, i32
  }
  func.func @transform_3(%arg0: i32) -> (i32, i32) {
    %c0_i32 = arith.constant 0 : i32
    %c0_i32_0 = arith.constant 0 : i32
    %c0_i32_1 = arith.constant 0 : i32
    return %c0_i32, %c0_i32_0 : i32, i32
  }
  func.func @transform_4(%arg0: i32) -> (i32, i32, i32) {
    %c0_i32 = arith.constant 0 : i32
    %c0_i32_0 = arith.constant 0 : i32
    %c0_i32_1 = arith.constant 0 : i32
    %c0_i32_2 = arith.constant 0 : i32
    return %c0_i32, %c0_i32_0, %c0_i32_1 : i32, i32, i32
  }
  func.func @transform_5(%arg0: i32) -> (i32, i32, i32) {
    %c0_i32 = arith.constant 0 : i32
    %c0_i32_0 = arith.constant 0 : i32
    %c0_i32_1 = arith.constant 0 : i32
    %c0_i32_2 = arith.constant 0 : i32
    return %c0_i32, %c0_i32_0, %c0_i32_1 : i32, i32, i32
  }
  func.func @transform_6(%arg0: i32) -> (i32, i32) {
    %c0_i32 = arith.constant 0 : i32
    %c0_i32_0 = arith.constant 0 : i32
    %c0_i32_1 = arith.constant 0 : i32
    return %c0_i32, %c0_i32_0 : i32, i32
  }
  func.func @transform_7(%arg0: i32) -> (i32, i32, i32) {
    %c0_i32 = arith.constant 0 : i32
    %c0_i32_0 = arith.constant 0 : i32
    %c0_i32_1 = arith.constant 0 : i32
    %c0_i32_2 = arith.constant 0 : i32
    return %c0_i32, %c0_i32_0, %c0_i32_1 : i32, i32, i32
  }
  func.func @transform_8(%arg0: i32) -> (i32, i32) {
    %c0_i32 = arith.constant 0 : i32
    %c0_i32_0 = arith.constant 0 : i32
    %c0_i32_1 = arith.constant 0 : i32
    return %c0_i32, %c0_i32_0 : i32, i32
  }
  func.func @transform_9(%arg0: i32) -> (i32, i32) {
    %c0_i32 = arith.constant 0 : i32
    %c0_i32_0 = arith.constant 0 : i32
    %c0_i32_1 = arith.constant 0 : i32
    return %c0_i32, %c0_i32_0 : i32, i32
  }
  func.func @transform_10(%arg0: i32) -> (i32, i32) {
    %c0_i32 = arith.constant 0 : i32
    %c0_i32_0 = arith.constant 0 : i32
    %c0_i32_1 = arith.constant 0 : i32
    return %c0_i32, %c0_i32_0 : i32, i32
  }
  func.func @transform_11(%arg0: i32) -> (i32, i32) {
    %c0_i32 = arith.constant 0 : i32
    %c0_i32_0 = arith.constant 0 : i32
    %c0_i32_1 = arith.constant 0 : i32
    return %c0_i32, %c0_i32_0 : i32, i32
  }
  func.func @transform_12(%arg0: i32) -> (i32, i32) {
    %c0_i32 = arith.constant 0 : i32
    %c0_i32_0 = arith.constant 0 : i32
    %c0_i32_1 = arith.constant 0 : i32
    return %c0_i32, %c0_i32_0 : i32, i32
  }
  func.func @transform_13(%arg0: i32) -> (i32, i32) {
    %c0_i32 = arith.constant 0 : i32
    %c0_i32_0 = arith.constant 0 : i32
    return %arg0, %c0_i32 : i32, i32
  }
}

</mosaic_0001>

<bundles_post_ra>
// kernel: cnn_forward.1
= control target key start
LH: loop header
LB: loop body
LE: loop exit
PB: predicated region body
PF: predicated region fallthrough
CT: control target
= control target key end

     0   :  { %s6566_s25 = smov 0   ;;  %s9941_s0 = inlined_call_operand.vmem [shape: f32[512,96], index: 0, kind: input, shape index: {}]   ;;  %s9942_s1 = inlined_call_operand.vmem [shape: f32[5,96,256], index: 1, kind: input, shape index: {}]   ;;  %s9943_s2 = inlined_call_operand.vmem [shape: f32[2,112,252], index: 2, kind: input, shape index: {}]   ;;  %s9944_s3 = inlined_call_operand.vmem [shape: f32[1,128], index: 3, kind: input, shape index: {}]   ;;  %s9945_s4 = inlined_call_operand.vmem [shape: f32[5,128,256], index: 4, kind: input, shape index: {}]   ;;  %s9946_s5 = inlined_call_operand.vmem [shape: f32[2,40,108], index: 5, kind: input, shape index: {}]   ;;  %s9947_s6 = inlined_call_operand.vmem [shape: f32[1,128], index: 6, kind: input, shape index: {}]   ;;  %s9948_s7 = inlined_call_operand.vmem [shape: f32[5,128,128], index: 7, kind: input, shape index: {}]   ;;  %s9949_s8 = inlined_call_operand.vmem [shape: f32[1,128], index: 8, kind: input, shape index: {}]   ;;  %s9950_s9 = inlined_call_operand.vmem [shape: f32[128,128], index: 9, kind: input, shape index: {}]   ;;  %s9951_s10 = inlined_call_operand.vmem [shape: f32[1,128], index: 10, kind: input, shape index: {}]   ;;  %s9952_s11 = inlined_call_operand.vmem [shape: f32[128,128], index: 11, kind: input, shape index: {}]   ;;  %s9953_s12 = inlined_call_operand.vmem [shape: f32[1,128], index: 12, kind: input, shape index: {}]   ;;  %s9954_s13 = inlined_call_operand.vmem [shape: f32[16,128], index: 13, kind: output, shape index: {}]  }
   0x1 LB: > { %s6572_s26 = sadd.s32 4294967295, %s6492_s25   ;;  %p5306_p0 = scmp.ge.s32.totalorder %s6492_s25, 1  ;;  %s6492_s25 = sphi %s6566_s25, %s23_s25  }
   0x2   : > { %p388_p1 = scmp.lt.s32.totalorder %s6492_s25, 3 }
   0x4   : > { %p389_p2 = pnand %p5306_p0, %p388_p1 }
   0x6   : > { %392 = sbr.rel (%p389_p2) target bundleno = 2191 (0x88f), region = 72 }
   0xb   : > { %v5333_v0 = vld [vmem:[%s9942_s1 + $0x178] sm:$0xff]  ;;  %v5332_v2 = vld [vmem:[%s9942_s1 + $0x170] sm:$0xff]  ;;  %v5331_v4 = vld [vmem:[%s9942_s1 + $0x168] sm:$0xff]  ;;  %s5307_s16 = sshll.u32 %s6572_s26, 5  ;;  %vm554_vm0 = vcmask 785408   ;;  %v9955_v50 = vmov 0.0  }
   0xc   : > { %v496_v1 = vld [vmem:[%s9942_s1 + $0xb8] sm:$0xff]  ;;  %659 = vmatprep.subr.mxu0 %v5333_v0  ;;  %v495_v3 = vld [vmem:[%s9942_s1 + $0xb0] sm:$0xff]  ;;  %v494_v5 = vld [vmem:[%s9942_s1 + $0xa8] sm:$0xff]  ;;  %p6651_p3 = scmp.lt.s32.totalorder %s5307_s16, 63  ;;  %715 = vmatprep.mubr.f32.mxu0 %v9955_v50  ;;  %vm2743_vm1 = vcmask 1014784   ;;  %vm2786_vm2 = vcmask 1043456  }
   0xd   : > { %1012 = vmatprep.subr.mxu1 %v496_v1  ;;  %660 = vmatpush1.msra.mxu0 %v5332_v2  ;;  %v5330_v6 = vld [vmem:[%s9942_s1 + $0x160] sm:$0xff]  ;;  %v5329_v8 = vld [vmem:[%s9942_s1 + $0x158] sm:$0xff]  ;;  %v5328_v10 = vld [vmem:[%s9942_s1 + $0x150] sm:$0xff]  ;;  %vm3259_vm3 = vcmask 1046528   ;;  %vm3884_vm4 = vcmask 1044480   ;;  %vm3632_vm5 = vcmask 1045504  }
   0xe   : > { %1013 = vmatpush1.msra.mxu1 %v495_v3  ;;  %v493_v7 = vld [vmem:[%s9942_s1 + $0xa0] sm:$0xff]  ;;  %661 = vmatprep.subr.mxu0 %v5331_v4  ;;  %v492_v9 = vld [vmem:[%s9942_s1 + $0x98] sm:$0xff]  ;;  %v491_v11 = vld [vmem:[%s9942_s1 + $0x90] sm:$0xff]  ;;  %s10124_s16 = smov (!%p6651_p3, %s5307_s16), 63  ;;  %vm6495_vm6 = vmmov 0   ;;  %vm4373_vm7 = vcmask 883712  }
   0xf   : > { %1014 = vmatprep.subr.mxu1 %v494_v5  ;;  %662 = vmatpush1.msra.mxu0 %v5330_v6  ;;  %v5327_v12 = vld [vmem:[%s9942_s1 + $0x148] sm:$0xff]  ;;  %v5326_v14 = vld [vmem:[%s9942_s1 + $0x140] sm:$0xff]  ;;  %v5325_v16 = vld [vmem:[%s9942_s1 + $0x138] sm:$0xff]  ;;  %s5308_s21 = sshll.u32 %s10124_s16, 3  ;;  %p437_p4 = scmp.lt.s32.totalorder %s6572_s26, 1 }
  0x10   : > { %1015 = vmatpush1.msra.mxu1 %v493_v7  ;;  %v490_v13 = vld [vmem:[%s9942_s1 + $0x88] sm:$0xff]  ;;  %663 = vmatprep.subr.mxu0 %v5329_v8  ;;  %v489_v15 = vld [vmem:[%s9942_s1 + $0x80] sm:$0xff]  ;;  %v488_v17 = vld [vmem:[%s9942_s1 + $0x78] sm:$0xff]  ;;  %s6731_s22 = scalar_lea.vmem %s9941_s0, %s5308_s21 }
  0x11   : > { %1016 = vmatprep.subr.mxu1 %v492_v9  ;;  %664 = vmatpush1.msra.mxu0 %v5328_v10  ;;  %v5324_v18 = vld [vmem:[%s9942_s1 + $0x130] sm:$0xff]  ;;  %v5323_v20 = vld [vmem:[%s9942_s1 + $0x128] sm:$0xff]  ;;  %v5322_v22 = vld [vmem:[%s9942_s1 + $0x120] sm:$0xff]  ;;  %s10126_s26 = smov (!%p437_p4, %s6572_s26), 1 }
  0x12   : > { %1017 = vmatpush1.msra.mxu1 %v491_v11  ;;  %665 = vmatprep.subr.mxu0 %v5327_v12  ;;  %v487_v19 = vld [vmem:[%s9942_s1 + $0x70] sm:$0xff]  ;;  %v486_v21 = vld [vmem:[%s9942_s1 + $0x68] sm:$0xff]  ;;  %v485_v23 = vld [vmem:[%s9942_s1 + $0x60] sm:$0xff]  ;;  %s5309_s14 = sshll.u32 %s10126_s26, 3 }
  0x13   : > { %1018 = vmatprep.subr.mxu1 %v490_v13  ;;  %666 = vmatpush1.msra.mxu0 %v5326_v14  ;;  %v5321_v24 = vld [vmem:[%s9942_s1 + $0x118] sm:$0xff]  ;;  %v5320_v26 = vld [vmem:[%s9942_s1 + $0x110] sm:$0xff]  ;;  %v5319_v28 = vld [vmem:[%s9942_s1 + $0x108] sm:$0xff]  ;;  %s440_s30 = scalar_lea.vmem %s9954_s13, %s5309_s14 }
  0x14   : > { %1019 = vmatpush1.msra.mxu1 %v489_v15  ;;  %667 = vmatprep.subr.mxu0 %v5325_v16  ;;  %v484_v25 = vld [vmem:[%s9942_s1 + $0x58] sm:$0xff]  ;;  %v483_v27 = vld [vmem:[%s9942_s1 + $0x50] sm:$0xff]  ;;  %v482_v29 = vld [vmem:[%s9942_s1 + $0x48] sm:$0xff] }
  0x15   : > { %1020 = vmatprep.subr.mxu1 %v488_v17  ;;  %668 = vmatpush1.msra.mxu0 %v5324_v18  ;;  %v5318_v30 = vld [vmem:[%s9942_s1 + $0x100] sm:$0xff]  ;;  %v5317_v32 = vld [vmem:[%s9942_s1 + $0xf8] sm:$0xff]  ;;  %v5316_v34 = vld [vmem:[%s9942_s1 + $0xf0] sm:$0xff] }
  0x16   : > { %1021 = vmatpush1.msra.mxu1 %v487_v19  ;;  %669 = vmatprep.subr.mxu0 %v5323_v20  ;;  %v481_v31 = vld [vmem:[%s9942_s1 + $0x40] sm:$0xff]  ;;  %v480_v33 = vld [vmem:[%s9942_s1 + $0x38] sm:$0xff]  ;;  %v479_v35 = vld [vmem:[%s9942_s1 + $0x30] sm:$0xff] }
  0x17   : > { %1022 = vmatprep.subr.mxu1 %v486_v21  ;;  %670 = vmatpush1.msra.mxu0 %v5322_v22  ;;  %v5315_v36 = vld [vmem:[%s9942_s1 + $0xe8] sm:$0xff]  ;;  %v5314_v38 = vld [vmem:[%s9942_s1 + $0xe0] sm:$0xff]  ;;  %v5313_v40 = vld [vmem:[%s9942_s1 + $0xd8] sm:$0xff] }
  0x18   : > { %1023 = vmatpush1.msra.mxu1 %v485_v23  ;;  %671 = vmatprep.subr.mxu0 %v5321_v24  ;;  %v478_v37 = vld [vmem:[%s9942_s1 + $0x28] sm:$0xff]  ;;  %v477_v39 = vld [vmem:[%s9942_s1 + $0x20] sm:$0xff]  ;;  %v476_v41 = vld [vmem:[%s9942_s1 + $0x18] sm:$0xff] }
  0x19   : > { %1024 = vmatprep.subr.mxu1 %v484_v25  ;;  %672 = vmatpush1.msra.mxu0 %v5320_v26  ;;  %v5312_v42 = vld [vmem:[%s9942_s1 + $0xd0] sm:$0xff]  ;;  %v5311_v44 = vld [vmem:[%s9942_s1 + $0xc8] sm:$0xff]  ;;  %v5310_v46 = vld [vmem:[%s9942_s1 + $0xc0] sm:$0xff] }
  0x1a   : > { %1025 = vmatpush1.msra.mxu1 %v483_v27  ;;  %673 = vmatprep.subr.mxu0 %v5319_v28  ;;  %v475_v43 = vld [vmem:[%s9942_s1 + $0x10] sm:$0xff]  ;;  %v474_v45 = vld [vmem:[%s9942_s1 + $0x8] sm:$0xff]  ;;  %v473_v47 = vld [vmem:[%s9942_s1] sm:$0xff] }
  0x1b   : > { %1026 = vmatprep.subr.mxu1 %v482_v29  ;;  %674 = vmatpush1.msra.mxu0 %v5318_v30  ;;  %v497_v48 = vld [vmem:[%s6731_s22 + $0x1] sm:$0xff]  ;;  %v498_v51 = vld [vmem:[%s6731_s22 + $0x9] sm:$0xff]  ;;  %v499_v53 = vld [vmem:[%s6731_s22 + $0x11] sm:$0xff] }
  0x1c   : > { %1027 = vmatpush1.msra.mxu1 %v481_v31  ;;  %675 = vmatprep.subr.mxu0 %v5317_v32  ;;  %v441_v49 = vld [vmem:[%s6731_s22] sm:$0xff]  ;;  %v442_v52 = vld [vmem:[%s6731_s22 + $0x8] sm:$0xff]  ;;  %v443_v54 = vld [vmem:[%s6731_s22 + $0x10] sm:$0xff] }
  0x1d   : > { %1028 = vmatprep.subr.mxu1 %v480_v33  ;;  %676 = vmatpush1.msra.mxu0 %v5316_v34  ;;  %v5421_v55 = vld [vmem:[%s9942_s1 + $0x238] sm:$0xff]  ;;  %v5420_v56 = vld [vmem:[%s9942_s1 + $0x230] sm:$0xff]  ;;  %v5419_v58 = vld [vmem:[%s9942_s1 + $0x228] sm:$0xff] }
  0x1e   : > { %1029 = vmatpush1.msra.mxu1 %v479_v35  ;;  %677 = vmatprep.subr.mxu0 %v5315_v36  ;;  %v500_v57 = vld [vmem:[%s6731_s22 + $0x19] sm:$0xff]  ;;  %v5476_v61 = vld [vmem:[%s9942_s1 + $0x2f0] sm:$0xff]  ;;  %v5475_v63 = vld [vmem:[%s9942_s1 + $0x2e8] sm:$0xff] }
  0x1f   : > { %1030 = vmatprep.subr.mxu1 %v478_v37  ;;  %678 = vmatpush1.msra.mxu0 %v5314_v38  ;;  %v444_v59 = vld [vmem:[%s6731_s22 + $0x18] sm:$0xff]  ;;  %v5418_v62 = vld [vmem:[%s9942_s1 + $0x220] sm:$0xff]  ;;  %v5416_v4 = vld [vmem:[%s9942_s1 + $0x210] sm:$0xff] }
  0x20   : > { %1031 = vmatpush1.msra.mxu1 %v477_v39  ;;  %679 = vmatprep.subr.mxu0 %v5313_v40  ;;  %v5477_v60 = vld [vmem:[%s9942_s1 + $0x2f8] sm:$0xff]  ;;  %v5474_v1 = vld [vmem:[%s9942_s1 + $0x2e0] sm:$0xff]  ;;  %v5415_v6 = vld [vmem:[%s9942_s1 + $0x208] sm:$0xff] }
  0x21   : > { %1032 = vmatprep.subr.mxu1 %v476_v41  ;;  %680 = vmatpush1.msra.mxu0 %v5312_v42  ;;  %v5417_v0 = vld [vmem:[%s9942_s1 + $0x218] sm:$0xff]  ;;  %v501_v2 = vld [vmem:[%s6731_s22 + $0x21] sm:$0xff]  ;;  %v5472_v7 = vld [vmem:[%s9942_s1 + $0x2d0] sm:$0xff] }
  0x22   : > { %1033 = vmatpush1.msra.mxu1 %v475_v43  ;;  %681 = vmatprep.subr.mxu0 %v5311_v44  ;;  %v445_v3 = vld [vmem:[%s6731_s22 + $0x20] sm:$0xff]  ;;  %v5473_v5 = vld [vmem:[%s9942_s1 + $0x2d8] sm:$0xff]  ;;  %v502_v8 = vld [vmem:[%s6731_s22 + $0x29] sm:$0xff] }
  0x23   : > { %1034 = vmatprep.subr.mxu1 %v474_v45  ;;  %682 = vmatpush1.msra.mxu0 %v5310_v46  ;;  %v446_v9 = vld [vmem:[%s6731_s22 + $0x28] sm:$0xff]  ;;  %v5414_v10 = vld [vmem:[%s9942_s1 + $0x200] sm:$0xff]  ;;  %v5413_v12 = vld [vmem:[%s9942_s1 + $0x1f8] sm:$0xff] }
  0x24   : > { %1035 = vmatpush1.msra.mxu1 %v473_v47  ;;  %1068 = vmatprep.mubr.f32.mxu1 %v9955_v50  ;;  %v5471_v11 = vld [vmem:[%s9942_s1 + $0x2c8] sm:$0xff]  ;;  %v5470_v13 = vld [vmem:[%s9942_s1 + $0x2c0] sm:$0xff]  ;;  %v503_v14 = vld [vmem:[%s6731_s22 + $0x31] sm:$0xff] }
  0x25   : > { %5334 = vmatmul.mubr.msk.f32.vlgmr.msra.gmra.mxu0 %vm554_vm0, %v497_v48  ;;  %5366 = vmatmul.mubr.msk.f32.vlgmr.msra.gmra.mxu1 %vm554_vm0, %v441_v49  ;;  %v447_v15 = vld [vmem:[%s6731_s22 + $0x30] sm:$0xff]  ;;  %v5469_v17 = vld [vmem:[%s9942_s1 + $0x2b8] sm:$0xff]  ;;  %v5411_v18 = vld [vmem:[%s9942_s1 + $0x1e8] sm:$0xff] }
  0x26   : > { %721 = vmatprep.mubr.f32.mxu0 %v9955_v50  ;;  %1074 = vmatprep.mubr.f32.mxu1 %v9955_v50  ;;  %v5412_v16 = vld [vmem:[%s9942_s1 + $0x1f0] sm:$0xff]  ;;  %v504_v20 = vld [vmem:[%s6731_s22 + $0x39] sm:$0xff]  ;;  %v5467_v23 = vld [vmem:[%s9942_s1 + $0x2a8] sm:$0xff] }
  0x27   : > { %1422 = vmatprep.subr.mxu0 %v5421_v55  ;;  %1896 = vmatprep.subr.mxu1 %v5477_v60  ;;  %v5468_v19 = vld [vmem:[%s9942_s1 + $0x2b0] sm:$0xff]  ;;  %v448_v21 = vld [vmem:[%s6731_s22 + $0x38] sm:$0xff]  ;;  %v5410_v22 = vld [vmem:[%s9942_s1 + $0x1e0] sm:$0xff] }
  0x28   : > { %1423 = vmatpush1.msra.mxu0 %v5420_v56  ;;  %1897 = vmatpush1.msra.mxu1 %v5476_v61  ;;  %v5409_v24 = vld [vmem:[%s9942_s1 + $0x1d8] sm:$0xff]  ;;  %v5466_v25 = vld [vmem:[%s9942_s1 + $0x2a0] sm:$0xff]  ;;  %v5408_v28 = vld [vmem:[%s9942_s1 + $0x1d0] sm:$0xff] }
  0x29   : > { %5335 = vmatmul.mubr.msk.f32.gmra.mxu0 %vm554_vm0, %v498_v51  ;;  %5367 = vmatmul.mubr.msk.f32.gmra.mxu1 %vm554_vm0, %v442_v52  ;;  %v505_v26 = vld [vmem:[%s6731_s22 + $0x41] sm:$0xff]  ;;  %v5465_v29 = vld [vmem:[%s9942_s1 + $0x298] sm:$0xff]  ;;  %v5464_v31 = vld [vmem:[%s9942_s1 + $0x290] sm:$0xff] }
  0x2a   : > { %727 = vmatprep.mubr.f32.mxu0 %v9955_v50  ;;  %1080 = vmatprep.mubr.f32.mxu1 %v9955_v50  ;;  %v449_v27 = vld [vmem:[%s6731_s22 + $0x40] sm:$0xff]  ;;  %v5407_v30 = vld [vmem:[%s9942_s1 + $0x1c8] sm:$0xff]  ;;  %v5405_v36 = vld [vmem:[%s9942_s1 + $0x1b8] sm:$0xff] }
  0x2b   : > { %1424 = vmatprep.subr.mxu0 %v5419_v58  ;;  %1898 = vmatprep.subr.mxu1 %v5475_v63  ;;  %v506_v32 = vld [vmem:[%s6731_s22 + $0x49] sm:$0xff]  ;;  %v5406_v34 = vld [vmem:[%s9942_s1 + $0x1c0] sm:$0xff]  ;;  %v507_v38 = vld [vmem:[%s6731_s22 + $0x51] sm:$0xff] }
  0x2c   : > { %1425 = vmatpush1.msra.mxu0 %v5418_v62  ;;  %1899 = vmatpush1.msra.mxu1 %v5474_v1  ;;  %v450_v33 = vld [vmem:[%s6731_s22 + $0x48] sm:$0xff]  ;;  %v5462_v37 = vld [vmem:[%s9942_s1 + $0x280] sm:$0xff]  ;;  %v451_v39 = vld [vmem:[%s6731_s22 + $0x50] sm:$0xff] }
  0x2d   : > { %5336 = vmatmul.mubr.msk.f32.gmra.mxu0 %vm554_vm0, %v499_v53  ;;  %5368 = vmatmul.mubr.msk.f32.gmra.mxu1 %vm554_vm0, %v443_v54  ;;  %v5463_v35 = vld [vmem:[%s9942_s1 + $0x288] sm:$0xff]  ;;  %v5404_v40 = vld [vmem:[%s9942_s1 + $0x1b0] sm:$0xff]  ;;  %v5461_v41 = vld [vmem:[%s9942_s1 + $0x278] sm:$0xff] }
  0x2e   : > { %733 = vmatprep.mubr.f32.mxu0 %v9955_v50  ;;  %1086 = vmatprep.mubr.f32.mxu1 %v9955_v50  ;;  %v5403_v42 = vld [vmem:[%s9942_s1 + $0x1a8] sm:$0xff]  ;;  %v5460_v43 = vld [vmem:[%s9942_s1 + $0x270] sm:$0xff]  ;;  %v508_v44 = vld [vmem:[%s6731_s22 + $0x59] sm:$0xff] }
  0x2f   : > { %1426 = vmatprep.subr.mxu0 %v5417_v0  ;;  %1900 = vmatprep.subr.mxu1 %v5473_v5  ;;  %v452_v45 = vld [vmem:[%s6731_s22 + $0x58] sm:$0xff]  ;;  %v5402_v46 = vld [vmem:[%s9942_s1 + $0x1a0] sm:$0xff]  ;;  %v5459_v47 = vld [vmem:[%s9942_s1 + $0x268] sm:$0xff] }
  0x30   : > { %1427 = vmatpush1.msra.mxu0 %v5416_v4  ;;  %1901 = vmatpush1.msra.mxu1 %v5472_v7  ;;  %v5401_v48 = vld [vmem:[%s9942_s1 + $0x198] sm:$0xff]  ;;  %v5458_v49 = vld [vmem:[%s9942_s1 + $0x260] sm:$0xff]  ;;  %v5400_v53 = vld [vmem:[%s9942_s1 + $0x190] sm:$0xff] }
  0x31   : > { %5337 = vmatmul.mubr.msk.f32.gmra.mxu0 %vm554_vm0, %v500_v57  ;;  %5369 = vmatmul.mubr.msk.f32.gmra.mxu1 %vm554_vm0, %v444_v59  ;;  %v509_v51 = vld [vmem:[%s6731_s22 + $0x61] sm:$0xff]  ;;  %v5457_v54 = vld [vmem:[%s9942_s1 + $0x258] sm:$0xff]  ;;  %v5456_v56 = vld [vmem:[%s9942_s1 + $0x250] sm:$0xff] }
  0x32   : > { %739 = vmatprep.mubr.f32.mxu0 %v9955_v50  ;;  %1092 = vmatprep.mubr.f32.mxu1 %v9955_v50  ;;  %v453_v52 = vld [vmem:[%s6731_s22 + $0x60] sm:$0xff]  ;;  %v5399_v55 = vld [vmem:[%s9942_s1 + $0x188] sm:$0xff]  ;;  %v511_v62 = vld [vmem:[%s6731_s22 + $0x71] sm:$0xff] }
  0x33   : > { %1428 = vmatprep.subr.mxu0 %v5415_v6  ;;  %1902 = vmatprep.subr.mxu1 %v5471_v11  ;;  %v510_v57 = vld [vmem:[%s6731_s22 + $0x69] sm:$0xff]  ;;  %v5398_v59 = vld [vmem:[%s9942_s1 + $0x180] sm:$0xff]  ;;  %v456_v1 = vld [vmem:[%s6731_s22 + $0x78] sm:$0xff] }
  0x34   : > { %1429 = vmatpush1.msra.mxu0 %v5414_v10  ;;  %1903 = vmatpush1.msra.mxu1 %v5470_v13  ;;  %v454_v58 = vld [vmem:[%s6731_s22 + $0x68] sm:$0xff]  ;;  %v5454_v61 = vld [vmem:[%s9942_s1 + $0x240] sm:$0xff]  ;;  %v455_v63 = vld [vmem:[%s6731_s22 + $0x70] sm:$0xff] }
  0x35   : > { %5338 = vmatmul.mubr.msk.f32.gmra.mxu0 %vm554_vm0, %v501_v2  ;;  %5370 = vmatmul.mubr.msk.f32.gmra.mxu1 %vm554_vm0, %v445_v3  ;;  %v5455_v60 = vld [vmem:[%s9942_s1 + $0x248] sm:$0xff]  ;;  %v512_v0 = vld [vmem:[%s6731_s22 + $0x79] sm:$0xff]  ;;  %v515_v6 = vld [vmem:[%s6731_s22 + $0x91] sm:$0xff] }
  0x36   : > { %745 = vmatprep.mubr.f32.mxu0 %v9955_v50  ;;  %1098 = vmatprep.mubr.f32.mxu1 %v9955_v50  ;;  %v513_v2 = vld [vmem:[%s6731_s22 + $0x81] sm:$0xff]  ;;  %v514_v4 = vld [vmem:[%s6731_s22 + $0x89] sm:$0xff] }
  0x37   : > { %1430 = vmatprep.subr.mxu0 %v5413_v12  ;;  %1904 = vmatprep.subr.mxu1 %v5469_v17  ;;  %v457_v3 = vld [vmem:[%s6731_s22 + $0x80] sm:$0xff]  ;;  %v458_v5 = vld [vmem:[%s6731_s22 + $0x88] sm:$0xff]  ;;  %v459_v7 = vld [vmem:[%s6731_s22 + $0x90] sm:$0xff] }
  0x38   : > { %1431 = vmatpush1.msra.mxu0 %v5412_v16  ;;  %1905 = vmatpush1.msra.mxu1 %v5468_v19  ;;  %v517_v10 = vld [vmem:[%s6731_s22 + $0xa1] sm:$0xff]  ;;  %v518_v12 = vld [vmem:[%s6731_s22 + $0xa9] sm:$0xff]  ;;  %v520_v16 = vld [vmem:[%s6731_s22 + $0xb9] sm:$0xff] }
  0x39   : > { %5339 = vmatmul.mubr.msk.f32.gmra.mxu0 %vm554_vm0, %v502_v8  ;;  %5371 = vmatmul.mubr.msk.f32.gmra.mxu1 %vm554_vm0, %v446_v9  ;;  %v516_v8 = vld [vmem:[%s6731_s22 + $0x99] sm:$0xff]  ;;  %v462_v13 = vld [vmem:[%s6731_s22 + $0xa8] sm:$0xff] }
  0x3a   : > { %751 = vmatprep.mubr.f32.mxu0 %v9955_v50  ;;  %1104 = vmatprep.mubr.f32.mxu1 %v9955_v50  ;;  %v460_v9 = vld [vmem:[%s6731_s22 + $0x98] sm:$0xff]  ;;  %v461_v11 = vld [vmem:[%s6731_s22 + $0xa0] sm:$0xff] }
  0x3b   : > { %1432 = vmatprep.subr.mxu0 %v5411_v18  ;;  %1906 = vmatprep.subr.mxu1 %v5467_v23  ;;  %v464_v17 = vld [vmem:[%s6731_s22 + $0xb8] sm:$0xff]  ;;  %v521_v18 = vld [vmem:[%s6731_s22 + $0xc1] sm:$0xff] }
  0x3c   : > { %1433 = vmatpush1.msra.mxu0 %v5410_v22  ;;  %1907 = vmatpush1.msra.mxu1 %v5466_v25  ;;  %v465_v19 = vld [vmem:[%s6731_s22 + $0xc0] sm:$0xff]  ;;  %v5533_v22 = vld [vmem:[%s9942_s1 + $0x3b8] sm:$0xff] }
  0x3d   : > { %5340 = vmatmul.mubr.msk.f32.gmra.mxu0 %vm554_vm0, %v503_v14  ;;  %5372 = vmatmul.mubr.msk.f32.gmra.mxu1 %vm554_vm0, %v447_v15  ;;  %v519_v14 = vld [vmem:[%s6731_s22 + $0xb1] sm:$0xff]  ;;  %v524_v25 = vld [vmem:[%s6731_s22 + $0xd9] sm:$0xff] }
  0x3e   : > { %757 = vmatprep.mubr.f32.mxu0 %v9955_v50  ;;  %1110 = vmatprep.mubr.f32.mxu1 %v9955_v50  ;;  %v463_v15 = vld [vmem:[%s6731_s22 + $0xb0] sm:$0xff] }
  0x3f   : > { %1434 = vmatprep.subr.mxu0 %v5409_v24  ;;  %1908 = vmatprep.subr.mxu1 %v5465_v29  ;;  %v523_v23 = vld [vmem:[%s6731_s22 + $0xd1] sm:$0xff]  ;;  %v526_v29 = vld [vmem:[%s6731_s22 + $0xe9] sm:$0xff] }
  0x40   : > { %1435 = vmatpush1.msra.mxu0 %v5408_v28  ;;  %1909 = vmatpush1.msra.mxu1 %v5464_v31  ;;  %v467_v24 = vld [vmem:[%s6731_s22 + $0xd0] sm:$0xff]  ;;  %v469_v28 = vld [vmem:[%s6731_s22 + $0xe0] sm:$0xff] }
  0x41   : > { %5341 = vmatmul.mubr.msk.f32.gmra.mxu0 %vm554_vm0, %v504_v20  ;;  %5373 = vmatmul.mubr.msk.f32.gmra.mxu1 %vm554_vm0, %v448_v21  ;;  %v522_v20 = vld [vmem:[%s6731_s22 + $0xc9] sm:$0xff]  ;;  %v527_v31 = vld [vmem:[%s6731_s22 + $0xf1] sm:$0xff] }
  0x42   : > { %763 = vmatprep.mubr.f32.mxu0 %v9955_v50  ;;  %1116 = vmatprep.mubr.f32.mxu1 %v9955_v50  ;;  %v466_v21 = vld [vmem:[%s6731_s22 + $0xc8] sm:$0xff] }
  0x43   : > { %1436 = vmatprep.subr.mxu0 %v5407_v30  ;;  %1910 = vmatprep.subr.mxu1 %v5463_v35  ;;  %v470_v30 = vld [vmem:[%s6731_s22 + $0xe8] sm:$0xff] }
  0x44   : > { %1437 = vmatpush1.msra.mxu0 %v5406_v34  ;;  %1911 = vmatpush1.msra.mxu1 %v5462_v37  ;;  %v472_v34 = vld [vmem:[%s6731_s22 + $0xf8] sm:$0xf]  ;;  %v1261_v35 = vld [vmem:[%s6731_s22 + $0x2] sm:$0xff]  ;;  %v5532_v37 = vld [vmem:[%s9942_s1 + $0x3b0] sm:$0xff] }
  0x45   : > { %5342 = vmatmul.mubr.msk.f32.gmra.mxu0 %vm554_vm0, %v505_v26  ;;  %5374 = vmatmul.mubr.msk.f32.gmra.mxu1 %vm554_vm0, %v449_v27  ;;  %v468_v26 = vld [vmem:[%s6731_s22 + $0xd8] sm:$0xff]  ;;  %v525_v27 = vld [vmem:[%s6731_s22 + $0xe1] sm:$0xff] }
  0x46   : > { %769 = vmatprep.mubr.f32.mxu0 %v9955_v50  ;;  %1122 = vmatprep.mubr.f32.mxu1 %v9955_v50 }
  0x47   : > { %1438 = vmatprep.subr.mxu0 %v5405_v36  ;;  %1912 = vmatprep.subr.mxu1 %v5461_v41  ;;  %v1735_v36 = vld [vmem:[%s6731_s22 + $0x3] sm:$0xff] }
  0x48   : > { %1439 = vmatpush1.msra.mxu0 %v5404_v40  ;;  %1913 = vmatpush1.msra.mxu1 %v5460_v43  ;;  %v1736_v40 = vld [vmem:[%s6731_s22 + $0xb] sm:$0xff]  ;;  %v5530_v41 = vld [vmem:[%s9942_s1 + $0x3a0] sm:$0xff] }
  0x49   : > { %5343 = vmatmul.mubr.msk.f32.gmra.mxu0 %vm554_vm0, %v506_v32  ;;  %5375 = vmatmul.mubr.msk.f32.gmra.mxu1 %vm554_vm0, %v450_v33  ;;  %v471_v32 = vld [vmem:[%s6731_s22 + $0xf0] sm:$0xff]  ;;  %v528_v33 = vld [vmem:[%s6731_s22 + $0xf9] sm:$0xf] }
  0x4a   : > { %775 = vmatprep.mubr.f32.mxu0 %v9955_v50  ;;  %1128 = vmatprep.mubr.f32.mxu1 %v9955_v50  ;;  %v1263_v43 = vld [vmem:[%s6731_s22 + $0x12] sm:$0xff] }
  0x4b   : > { %1440 = vmatprep.subr.mxu0 %v5403_v42  ;;  %1914 = vmatprep.subr.mxu1 %v5459_v47  ;;  %v5529_v42 = vld [vmem:[%s9942_s1 + $0x398] sm:$0xff] }
  0x4c   : > { %1441 = vmatpush1.msra.mxu0 %v5402_v46  ;;  %1915 = vmatpush1.msra.mxu1 %v5458_v49  ;;  %v5527_v46 = vld [vmem:[%s9942_s1 + $0x388] sm:$0xff]  ;;  %v1264_v47 = vld [vmem:[%s6731_s22 + $0x1a] sm:$0xff] }
  0x4d   : > { %5344 = vmatmul.mubr.msk.f32.gmra.mxu0 %vm554_vm0, %v507_v38  ;;  %5376 = vmatmul.mubr.msk.f32.gmra.mxu1 %vm554_vm0, %v451_v39  ;;  %v5531_v38 = vld [vmem:[%s9942_s1 + $0x3a8] sm:$0xff]  ;;  %v5526_v49 = vld [vmem:[%s9942_s1 + $0x380] sm:$0xff] }
  0x4e   : > { %781 = vmatprep.mubr.f32.mxu0 %v9955_v50  ;;  %1134 = vmatprep.mubr.f32.mxu1 %v9955_v50  ;;  %v1262_v39 = vld [vmem:[%s6731_s22 + $0xa] sm:$0xff] }
  0x4f   : > { %1442 = vmatprep.subr.mxu0 %v5401_v48  ;;  %1916 = vmatprep.subr.mxu1 %v5457_v54  ;;  %v1738_v48 = vld [vmem:[%s6731_s22 + $0x1b] sm:$0xff]  ;;  %v5524_v54 = vld [vmem:[%s9942_s1 + $0x370] sm:$0xff] }
  0x50   : > { %1443 = vmatpush1.msra.mxu0 %v5400_v53  ;;  %1917 = vmatpush1.msra.mxu1 %v5456_v56  ;;  %v1739_v53 = vld [vmem:[%s6731_s22 + $0x23] sm:$0xff] }
  0x51   : > { %5345 = vmatmul.mubr.msk.f32.gmra.mxu0 %vm554_vm0, %v508_v44  ;;  %5377 = vmatmul.mubr.msk.f32.gmra.mxu1 %vm554_vm0, %v452_v45  ;;  %v1737_v44 = vld [vmem:[%s6731_s22 + $0x13] sm:$0xff]  ;;  %v1266_v56 = vld [vmem:[%s6731_s22 + $0x2a] sm:$0xff] }
  0x52   : > { %787 = vmatprep.mubr.f32.mxu0 %v9955_v50  ;;  %1140 = vmatprep.mubr.f32.mxu1 %v9955_v50  ;;  %v5528_v45 = vld [vmem:[%s9942_s1 + $0x390] sm:$0xff] }
  0x53   : > { %1444 = vmatprep.subr.mxu0 %v5399_v55  ;;  %1918 = vmatprep.subr.mxu1 %v5455_v60  ;;  %v5523_v55 = vld [vmem:[%s9942_s1 + $0x368] sm:$0xff]  ;;  %v1267_v60 = vld [vmem:[%s6731_s22 + $0x32] sm:$0xff] }
  0x54   : > { %1445 = vmatpush1.msra.mxu0 %v5398_v59  ;;  %1919 = vmatpush1.msra.mxu1 %v5454_v61  ;;  %v5521_v59 = vld [vmem:[%s9942_s1 + $0x358] sm:$0xff] }
  0x55   : > { %5346 = vmatmul.mubr.msk.f32.gmra.mxu0 %vm554_vm0, %v509_v51  ;;  %5378 = vmatmul.mubr.msk.f32.gmra.mxu1 %vm554_vm0, %v453_v52  ;;  %v5525_v51 = vld [vmem:[%s9942_s1 + $0x378] sm:$0xff]  ;;  %v1265_v52 = vld [vmem:[%s6731_s22 + $0x22] sm:$0xff] }
  0x56   : > { %793 = vmatprep.mubr.f32.mxu0 %v9955_v50  ;;  %1146 = vmatprep.mubr.f32.mxu1 %v9955_v50  ;;  %v1741_v61 = vld [vmem:[%s6731_s22 + $0x33] sm:$0xff] }
  0x57   : > { %2370 = vmatprep.subr.mxu0 %v5533_v22  ;;  %v1748_v22 = vld [vmem:[%s6731_s22 + $0x6b] sm:$0xff] }
  0x59   : > { %5347 = vmatmul.mubr.msk.f32.gmra.mxu0 %vm554_vm0, %v510_v57  ;;  %5379 = vmatmul.mubr.msk.f32.gmra.mxu1 %vm554_vm0, %v454_v58  ;;  %v1740_v57 = vld [vmem:[%s6731_s22 + $0x2b] sm:$0xff]  ;;  %v5522_v58 = vld [vmem:[%s9942_s1 + $0x360] sm:$0xff] }
  0x5a   : > { %799 = vmatprep.mubr.f32.mxu0 %v9955_v50  ;;  %1152 = vmatprep.mubr.f32.mxu1 %v9955_v50 }
  0x5d   : > { %5348 = vmatmul.mubr.msk.f32.gmra.mxu0 %vm554_vm0, %v511_v62  ;;  %5380 = vmatmul.mubr.msk.f32.gmra.mxu1 %vm554_vm0, %v455_v63  ;;  %v5520_v62 = vld [vmem:[%s9942_s1 + $0x350] sm:$0xff]  ;;  %v5519_v63 = vld [vmem:[%s9942_s1 + $0x348] sm:$0xff] }
  0x5e   : > { %805 = vmatprep.mubr.f32.mxu0 %v9955_v50  ;;  %1158 = vmatprep.mubr.f32.mxu1 %v9955_v50 }
  0x61   : > { %5349 = vmatmul.mubr.msk.f32.gmra.mxu0 %vm554_vm0, %v512_v0  ;;  %5381 = vmatmul.mubr.msk.f32.gmra.mxu1 %vm554_vm0, %v456_v1  ;;  %v1268_v0 = vld [vmem:[%s6731_s22 + $0x3a] sm:$0xff] }
  0x62   : > { %811 = vmatprep.mubr.f32.mxu0 %v9955_v50  ;;  %1164 = vmatprep.mubr.f32.mxu1 %v9955_v50  ;;  %v1742_v1 = vld [vmem:[%s6731_s22 + $0x3b] sm:$0xff] }
  0x65   : > { %5350 = vmatmul.mubr.msk.f32.gmra.mxu0 %vm554_vm0, %v513_v2  ;;  %5382 = vmatmul.mubr.msk.f32.gmra.mxu1 %vm554_vm0, %v457_v3  ;;  %v5518_v2 = vld [vmem:[%s9942_s1 + $0x340] sm:$0xff]  ;;  %v5517_v3 = vld [vmem:[%s9942_s1 + $0x338] sm:$0xff] }
  0x66   : > { %817 = vmatprep.mubr.f32.mxu0 %v9955_v50  ;;  %1170 = vmatprep.mubr.f32.mxu1 %v9955_v50 }
  0x69   : > { %5351 = vmatmul.mubr.msk.f32.gmra.mxu0 %vm554_vm0, %v514_v4  ;;  %5383 = vmatmul.mubr.msk.f32.gmra.mxu1 %vm554_vm0, %v458_v5  ;;  %v1269_v4 = vld [vmem:[%s6731_s22 + $0x42] sm:$0xff] }
  0x6a   : > { %823 = vmatprep.mubr.f32.mxu0 %v9955_v50  ;;  %1176 = vmatprep.mubr.f32.mxu1 %v9955_v50  ;;  %v1743_v5 = vld [vmem:[%s6731_s22 + $0x43] sm:$0xff] }
  0x6d   : > { %5352 = vmatmul.mubr.msk.f32.gmra.mxu0 %vm554_vm0, %v515_v6  ;;  %5384 = vmatmul.mubr.msk.f32.gmra.mxu1 %vm554_vm0, %v459_v7  ;;  %v5516_v6 = vld [vmem:[%s9942_s1 + $0x330] sm:$0xff]  ;;  %v5515_v7 = vld [vmem:[%s9942_s1 + $0x328] sm:$0xff] }
  0x6e   : > { %829 = vmatprep.mubr.f32.mxu0 %v9955_v50  ;;  %1182 = vmatprep.mubr.f32.mxu1 %v9955_v50 }
  0x71   : > { %5353 = vmatmul.mubr.msk.f32.gmra.mxu0 %vm554_vm0, %v516_v8  ;;  %5385 = vmatmul.mubr.msk.f32.gmra.mxu1 %vm554_vm0, %v460_v9  ;;  %v1270_v8 = vld [vmem:[%s6731_s22 + $0x4a] sm:$0xff] }
  0x72   : > { %835 = vmatprep.mubr.f32.mxu0 %v9955_v50  ;;  %1188 = vmatprep.mubr.f32.mxu1 %v9955_v50  ;;  %v1744_v9 = vld [vmem:[%s6731_s22 + $0x4b] sm:$0xff] }
  0x75   : > { %5354 = vmatmul.mubr.msk.f32.gmra.mxu0 %vm554_vm0, %v517_v10  ;;  %5386 = vmatmul.mubr.msk.f32.gmra.mxu1 %vm554_vm0, %v461_v11  ;;  %v5514_v10 = vld [vmem:[%s9942_s1 + $0x320] sm:$0xff]  ;;  %v5513_v11 = vld [vmem:[%s9942_s1 + $0x318] sm:$0xff] }
  0x76   : > { %841 = vmatprep.mubr.f32.mxu0 %v9955_v50  ;;  %1194 = vmatprep.mubr.f32.mxu1 %v9955_v50 }
  0x79   : > { %5355 = vmatmul.mubr.msk.f32.gmra.mxu0 %vm554_vm0, %v518_v12  ;;  %5387 = vmatmul.mubr.msk.f32.gmra.mxu1 %vm554_vm0, %v462_v13  ;;  %v1271_v12 = vld [vmem:[%s6731_s22 + $0x52] sm:$0xff] }
  0x7a   : > { %847 = vmatprep.mubr.f32.mxu0 %v9955_v50  ;;  %1200 = vmatprep.mubr.f32.mxu1 %v9955_v50  ;;  %v1745_v13 = vld [vmem:[%s6731_s22 + $0x53] sm:$0xff] }
  0x7d   : > { %5356 = vmatmul.mubr.msk.f32.gmra.mxu0 %vm554_vm0, %v519_v14  ;;  %5388 = vmatmul.mubr.msk.f32.gmra.mxu1 %vm554_vm0, %v463_v15  ;;  %v5512_v14 = vld [vmem:[%s9942_s1 + $0x310] sm:$0xff]  ;;  %v5511_v15 = vld [vmem:[%s9942_s1 + $0x308] sm:$0xff] }
  0x7e   : > { %853 = vmatprep.mubr.f32.mxu0 %v9955_v50  ;;  %1206 = vmatprep.mubr.f32.mxu1 %v9955_v50 }
  0x81   : > { %5357 = vmatmul.mubr.msk.f32.gmra.mxu0 %vm554_vm0, %v520_v16  ;;  %5389 = vmatmul.mubr.msk.f32.gmra.mxu1 %vm554_vm0, %v464_v17  ;;  %v1272_v16 = vld [vmem:[%s6731_s22 + $0x5a] sm:$0xff] }
  0x82   : > { %859 = vmatprep.mubr.f32.mxu0 %v9955_v50  ;;  %1212 = vmatprep.mubr.f32.mxu1 %v9955_v50  ;;  %v1746_v17 = vld [vmem:[%s6731_s22 + $0x5b] sm:$0xff] }
  0x85   : > { %5358 = vmatmul.mubr.msk.f32.gmra.mxu0 %vm554_vm0, %v521_v18  ;;  %5390 = vmatmul.mubr.msk.f32.gmra.mxu1 %vm554_vm0, %v465_v19  ;;  %v5510_v18 = vld [vmem:[%s9942_s1 + $0x300] sm:$0xff] }
  0x86   : > { %865 = vmatprep.mubr.f32.mxu0 %v9955_v50  ;;  %1218 = vmatprep.mubr.f32.mxu1 %v9955_v50  ;;  %v1273_v19 = vld [vmem:[%s6731_s22 + $0x62] sm:$0xff] }
  0x89   : > { %5359 = vmatmul.mubr.msk.f32.gmra.mxu0 %vm554_vm0, %v522_v20  ;;  %5391 = vmatmul.mubr.msk.f32.gmra.mxu1 %vm554_vm0, %v466_v21  ;;  %v1747_v20 = vld [vmem:[%s6731_s22 + $0x63] sm:$0xff] }
  0x8a   : > { %871 = vmatprep.mubr.f32.mxu0 %v9955_v50  ;;  %1224 = vmatprep.mubr.f32.mxu1 %v9955_v50  ;;  %v1274_v21 = vld [vmem:[%s6731_s22 + $0x6a] sm:$0xff] }
  0x8d   : > { %5360 = vmatmul.mubr.msk.f32.gmra.mxu0 %vm554_vm0, %v523_v23  ;;  %5392 = vmatmul.mubr.msk.f32.gmra.mxu1 %vm554_vm0, %v467_v24  ;;  %v1275_v23 = vld [vmem:[%s6731_s22 + $0x72] sm:$0xff] }
  0x8e   : > { %877 = vmatprep.mubr.f32.mxu0 %v9955_v50  ;;  %1230 = vmatprep.mubr.f32.mxu1 %v9955_v50  ;;  %v1749_v24 = vld [vmem:[%s6731_s22 + $0x73] sm:$0xff] }
  0x91   : > { %5361 = vmatmul.mubr.msk.f32.gmra.mxu0 %vm554_vm0, %v524_v25  ;;  %5393 = vmatmul.mubr.msk.f32.gmra.mxu1 %vm554_vm0, %v468_v26  ;;  %v1276_v25 = vld [vmem:[%s6731_s22 + $0x7a] sm:$0xff] }
  0x92   : > { %883 = vmatprep.mubr.f32.mxu0 %v9955_v50  ;;  %1236 = vmatprep.mubr.f32.mxu1 %v9955_v50  ;;  %v1750_v26 = vld [vmem:[%s6731_s22 + $0x7b] sm:$0xff] }
  0x95   : > { %5362 = vmatmul.mubr.msk.f32.gmra.mxu0 %vm554_vm0, %v525_v27  ;;  %5394 = vmatmul.mubr.msk.f32.gmra.mxu1 %vm554_vm0, %v469_v28  ;;  %v1277_v27 = vld [vmem:[%s6731_s22 + $0x82] sm:$0xff] }
  0x96   : > { %889 = vmatprep.mubr.f32.mxu0 %v9955_v50  ;;  %1242 = vmatprep.mubr.f32.mxu1 %v9955_v50  ;;  %v1751_v28 = vld [vmem:[%s6731_s22 + $0x83] sm:$0xff] }
  0x99   : > { %5363 = vmatmul.mubr.msk.f32.gmra.mxu0 %vm554_vm0, %v526_v29  ;;  %5395 = vmatmul.mubr.msk.f32.gmra.mxu1 %vm554_vm0, %v470_v30 }
  0x9a   : > { %895 = vmatprep.mubr.f32.mxu0 %v9955_v50  ;;  %1248 = vmatprep.mubr.f32.mxu1 %v9955_v50 }
  0x9d   : > { %5364 = vmatmul.mubr.msk.f32.gmra.mxu0 %vm554_vm0, %v527_v31  ;;  %5396 = vmatmul.mubr.msk.f32.gmra.mxu1 %vm554_vm0, %v471_v32  ;;  %v1278_v32 = vld [vmem:[%s6731_s22 + $0x8a] sm:$0xff] }
  0x9e   : > { %901 = vmatprep.mubr.f32.mxu0 %v9955_v50  ;;  %1254 = vmatprep.mubr.f32.mxu1 %v9955_v50 }
  0xa1   : > { %5365 = vmatmul.mubr.msk.f32.gmra.mxu0 %vm554_vm0, %v528_v33  ;;  %5397 = vmatmul.mubr.msk.f32.gmra.mxu1 %vm554_vm0, %v472_v34  ;;  %v1752_v33 = vld [vmem:[%s6731_s22 + $0x8b] sm:$0xff] }
  0xa2   : > { %1478 = vmatprep.mubr.f32.mxu0 %v9955_v50  ;;  %1952 = vmatprep.mubr.f32.mxu1 %v9955_v50 }
  0xa5   : > { %5422 = vmatmul.mubr.msk.f32.vlgmr.msra.gmra.mxu0 %vm554_vm0, %v1261_v35  ;;  %5478 = vmatmul.mubr.msk.f32.vlgmr.msra.gmra.mxu1 %vm554_vm0, %v1735_v36 }
  0xa6   : > { %1484 = vmatprep.mubr.f32.mxu0 %v9955_v50  ;;  %1958 = vmatprep.mubr.f32.mxu1 %v9955_v50 }
  0xa7   : > { %2371 = vmatpush1.msra.mxu0 %v5532_v37 }
  0xa8   : > { %2372 = vmatprep.subr.mxu0 %v5531_v38 }
  0xa9   : > { %5423 = vmatmul.mubr.msk.f32.gmra.mxu0 %vm554_vm0, %v1262_v39  ;;  %5479 = vmatmul.mubr.msk.f32.gmra.mxu1 %vm554_vm0, %v1736_v40  ;;  %v1279_v40 = vld [vmem:[%s6731_s22 + $0x92] sm:$0xff] }
  0xaa   : > { %1490 = vmatprep.mubr.f32.mxu0 %v9955_v50  ;;  %1964 = vmatprep.mubr.f32.mxu1 %v9955_v50 }
  0xab   : > { %2373 = vmatpush1.msra.mxu0 %v5530_v41  ;;  %v1753_v41 = vld [vmem:[%s6731_s22 + $0x93] sm:$0xff] }
  0xac   : > { %2374 = vmatprep.subr.mxu0 %v5529_v42 }
  0xad   : > { %5424 = vmatmul.mubr.msk.f32.gmra.mxu0 %vm554_vm0, %v1263_v43  ;;  %5480 = vmatmul.mubr.msk.f32.gmra.mxu1 %vm554_vm0, %v1737_v44 }
  0xae   : > { %1496 = vmatprep.mubr.f32.mxu0 %v9955_v50  ;;  %1970 = vmatprep.mubr.f32.mxu1 %v9955_v50 }
  0xaf   : > { %2375 = vmatpush1.msra.mxu0 %v5528_v45 }
  0xb0   : > { %2376 = vmatprep.subr.mxu0 %v5527_v46 }
  0xb1   : > { %5425 = vmatmul.mubr.msk.f32.gmra.mxu0 %vm554_vm0, %v1264_v47  ;;  %5481 = vmatmul.mubr.msk.f32.gmra.mxu1 %vm554_vm0, %v1738_v48  ;;  %v1280_v48 = vld [vmem:[%s6731_s22 + $0x9a] sm:$0xff] }
  0xb2   : > { %1502 = vmatprep.mubr.f32.mxu0 %v9955_v50  ;;  %1976 = vmatprep.mubr.f32.mxu1 %v9955_v50 }
  0xb3   : > { %2377 = vmatpush1.msra.mxu0 %v5526_v49  ;;  %v1754_v49 = vld [vmem:[%s6731_s22 + $0x9b] sm:$0xff] }
  0xb4   : > { %2378 = vmatprep.subr.mxu0 %v5525_v51 }
  0xb5   : > { %5426 = vmatmul.mubr.msk.f32.gmra.mxu0 %vm554_vm0, %v1265_v52  ;;  %5482 = vmatmul.mubr.msk.f32.gmra.mxu1 %vm554_vm0, %v1739_v53 }
  0xb6   : > { %1508 = vmatprep.mubr.f32.mxu0 %v9955_v50  ;;  %1982 = vmatprep.mubr.f32.mxu1 %v9955_v50 }
  0xb7   : > { %2379 = vmatpush1.msra.mxu0 %v5524_v54 }
  0xb8   : > { %2380 = vmatprep.subr.mxu0 %v5523_v55 }
  0xb9   : > { %5427 = vmatmul.mubr.msk.f32.gmra.mxu0 %vm554_vm0, %v1266_v56  ;;  %5483 = vmatmul.mubr.msk.f32.gmra.mxu1 %vm554_vm0, %v1740_v57  ;;  %v1281_v57 = vld [vmem:[%s6731_s22 + $0xa2] sm:$0xff] }
  0xba   : > { %1514 = vmatprep.mubr.f32.mxu0 %v9955_v50  ;;  %1988 = vmatprep.mubr.f32.mxu1 %v9955_v50 }
  0xbb   : > { %2381 = vmatpush1.msra.mxu0 %v5522_v58  ;;  %v1755_v58 = vld [vmem:[%s6731_s22 + $0xa3] sm:$0xff] }
  0xbc   : > { %2382 = vmatprep.subr.mxu0 %v5521_v59 }
  0xbd   : > { %5428 = vmatmul.mubr.msk.f32.gmra.mxu0 %vm554_vm0, %v1267_v60  ;;  %5484 = vmatmul.mubr.msk.f32.gmra.mxu1 %vm554_vm0, %v1741_v61 }
  0xbe   : > { %1520 = vmatprep.mubr.f32.mxu0 %v9955_v50  ;;  %1994 = vmatprep.mubr.f32.mxu1 %v9955_v50 }
  0xbf   : > { %2383 = vmatpush1.msra.mxu0 %v5520_v62 }
  0xc0   : > { %2384 = vmatprep.subr.mxu0 %v5519_v63 }
  0xc1   : > { %5429 = vmatmul.mubr.msk.f32.gmra.mxu0 %vm554_vm0, %v1268_v0  ;;  %5485 = vmatmul.mubr.msk.f32.gmra.mxu1 %vm554_vm0, %v1742_v1  ;;  %v1282_v1 = vld [vmem:[%s6731_s22 + $0xaa] sm:$0xff] }
  0xc2   : > { %1526 = vmatprep.mubr.f32.mxu0 %v9955_v50  ;;  %2000 = vmatprep.mubr.f32.mxu1 %v9955_v50 }
  0xc3   : > { %2385 = vmatpush1.msra.mxu0 %v5518_v2  ;;  %v1756_v2 = vld [vmem:[%s6731_s22 + $0xab] sm:$0xff] }
  0xc4   : > { %2386 = vmatprep.subr.mxu0 %v5517_v3 }
  0xc5   : > { %5430 = vmatmul.mubr.msk.f32.gmra.mxu0 %vm554_vm0, %v1269_v4  ;;  %5486 = vmatmul.mubr.msk.f32.gmra.mxu1 %vm554_vm0, %v1743_v5 }
  0xc6   : > { %1532 = vmatprep.mubr.f32.mxu0 %v9955_v50  ;;  %2006 = vmatprep.mubr.f32.mxu1 %v9955_v50 }
  0xc7   : > { %2387 = vmatpush1.msra.mxu0 %v5516_v6 }
  0xc8   : > { %2388 = vmatprep.subr.mxu0 %v5515_v7 }
  0xc9   : > { %5431 = vmatmul.mubr.msk.f32.gmra.mxu0 %vm554_vm0, %v1270_v8  ;;  %5487 = vmatmul.mubr.msk.f32.gmra.mxu1 %vm554_vm0, %v1744_v9  ;;  %v1283_v9 = vld [vmem:[%s6731_s22 + $0xb2] sm:$0xff] }
  0xca   : > { %1538 = vmatprep.mubr.f32.mxu0 %v9955_v50  ;;  %2012 = vmatprep.mubr.f32.mxu1 %v9955_v50 }
  0xcb   : > { %2389 = vmatpush1.msra.mxu0 %v5514_v10  ;;  %v1757_v10 = vld [vmem:[%s6731_s22 + $0xb3] sm:$0xff] }
  0xcc   : > { %2390 = vmatprep.subr.mxu0 %v5513_v11 }
  0xcd   : > { %5432 = vmatmul.mubr.msk.f32.gmra.mxu0 %vm554_vm0, %v1271_v12  ;;  %5488 = vmatmul.mubr.msk.f32.gmra.mxu1 %vm554_vm0, %v1745_v13 }
  0xce   : > { %1544 = vmatprep.mubr.f32.mxu0 %v9955_v50  ;;  %2018 = vmatprep.mubr.f32.mxu1 %v9955_v50 }
  0xcf   : > { %2391 = vmatpush1.msra.mxu0 %v5512_v14 }
  0xd0   : > { %2392 = vmatprep.subr.mxu0 %v5511_v15 }
  0xd1   : > { %5433 = vmatmul.mubr.msk.f32.gmra.mxu0 %vm554_vm0, %v1272_v16  ;;  %5489 = vmatmul.mubr.msk.f32.gmra.mxu1 %vm554_vm0, %v1746_v17  ;;  %v1284_v17 = vld [vmem:[%s6731_s22 + $0xba] sm:$0xff] }
  0xd2   : > { %1550 = vmatprep.mubr.f32.mxu0 %v9955_v50  ;;  %2024 = vmatprep.mubr.f32.mxu1 %v9955_v50 }
  0xd3   : > { %2393 = vmatpush1.msra.mxu0 %v5510_v18  ;;  %v1758_v18 = vld [vmem:[%s6731_s22 + $0xbb] sm:$0xff] }
  0xd5   : > { %5434 = vmatmul.mubr.msk.f32.gmra.mxu0 %vm554_vm0, %v1273_v19  ;;  %5490 = vmatmul.mubr.msk.f32.gmra.mxu1 %vm554_vm0, %v1747_v20 }
  0xd6   : > { %1556 = vmatprep.mubr.f32.mxu0 %v9955_v50  ;;  %2030 = vmatprep.mubr.f32.mxu1 %v9955_v50 }
  0xd9   : > { %5435 = vmatmul.mubr.msk.f32.gmra.mxu0 %vm554_vm0, %v1274_v21  ;;  %5491 = vmatmul.mubr.msk.f32.gmra.mxu1 %vm554_vm0, %v1748_v22 }
  0xda   : > { %1562 = vmatprep.mubr.f32.mxu0 %v9955_v50  ;;  %2036 = vmatprep.mubr.f32.mxu1 %v9955_v50 }
  0xdd   : > { %5436 = vmatmul.mubr.msk.f32.gmra.mxu0 %vm554_vm0, %v1275_v23  ;;  %5492 = vmatmul.mubr.msk.f32.gmra.mxu1 %vm554_vm0, %v1749_v24 }
  0xde   : > { %1568 = vmatprep.mubr.f32.mxu0 %v9955_v50  ;;  %2042 = vmatprep.mubr.f32.mxu1 %v9955_v50 }
  0xe1   : > { %5437 = vmatmul.mubr.msk.f32.gmra.mxu0 %vm554_vm0, %v1276_v25  ;;  %5493 = vmatmul.mubr.msk.f32.gmra.mxu1 %vm554_vm0, %v1750_v26  ;;  %v1285_v25 = vld [vmem:[%s6731_s22 + $0xc2] sm:$0xff] }
  0xe2   : > { %1574 = vmatprep.mubr.f32.mxu0 %v9955_v50  ;;  %2048 = vmatprep.mubr.f32.mxu1 %v9955_v50  ;;  %v1759_v26 = vld [vmem:[%s6731_s22 + $0xc3] sm:$0xff] }
  0xe5   : > { %v717_v29 = vpop.f32.mrf.mxu0  ;;  %v1070_v30 = vpop.f32.mrf.mxu1  ;;  %5438 = vmatmul.mubr.msk.f32.gmra.mxu0 %vm554_vm0, %v1277_v27  ;;  %5494 = vmatmul.mubr.msk.f32.gmra.mxu1 %vm554_vm0, %v1751_v28 }
  0xe6   : > { %v7249_v31 = vadd.f32 %v1070_v30, %v717_v29  ;;  %1580 = vmatprep.mubr.f32.mxu0 %v9955_v50  ;;  %2054 = vmatprep.mubr.f32.mxu1 %v9955_v50 }
  0xe7   : > { %v719_v34 = vpop.f32.mrf.mxu0  ;;  %v1072_v35 = vpop.f32.mrf.mxu1 }
  0xe8   : > { %v7255_v36 = vadd.f32 %v1072_v35, %v719_v34  ;;  %v1286_v34 = vld [vmem:[%s6731_s22 + $0xca] sm:$0xff] }
  0xe9   : > { %v723_v37 = vpop.f32.mrf.mxu0  ;;  %v1076_v38 = vpop.f32.mrf.mxu1  ;;  %5439 = vmatmul.mubr.msk.f32.gmra.mxu0 %vm554_vm0, %v1278_v32  ;;  %5495 = vmatmul.mubr.msk.f32.gmra.mxu1 %vm554_vm0, %v1752_v33  ;;  %v1760_v35 = vld [vmem:[%s6731_s22 + $0xcb] sm:$0xff] }
  0xea   : > { %v7259_v39 = vadd.f32 %v1076_v38, %v723_v37  ;;  %1586 = vmatprep.mubr.f32.mxu0 %v9955_v50  ;;  %2060 = vmatprep.mubr.f32.mxu1 %v9955_v50 }
  0xeb   : > { %v725_v42 = vpop.f32.mrf.mxu0  ;;  %v1078_v43 = vpop.f32.mrf.mxu1 }
  0xec   : > { %v7265_v44 = vadd.f32 %v1078_v43, %v725_v42  ;;  %v1287_v43 = vld [vmem:[%s6731_s22 + $0xd2] sm:$0xff] }
  0xed   : > { %v729_v45 = vpop.f32.mrf.mxu0  ;;  %v1082_v46 = vpop.f32.mrf.mxu1  ;;  %5440 = vmatmul.mubr.msk.f32.gmra.mxu0 %vm554_vm0, %v1279_v40  ;;  %5496 = vmatmul.mubr.msk.f32.gmra.mxu1 %vm554_vm0, %v1753_v41 }
  0xee   : > { %v7269_v47 = vadd.f32 %v1082_v46, %v729_v45  ;;  %1592 = vmatprep.mubr.f32.mxu0 %v9955_v50  ;;  %2066 = vmatprep.mubr.f32.mxu1 %v9955_v50  ;;  %v1761_v45 = vld [vmem:[%s6731_s22 + $0xd3] sm:$0xff] }
  0xef   : > { %v731_v51 = vpop.f32.mrf.mxu0  ;;  %v1084_v52 = vpop.f32.mrf.mxu1 }
  0xf0   : > { %v7275_v53 = vadd.f32 %v1084_v52, %v731_v51 }
  0xf1   : > { %v735_v54 = vpop.f32.mrf.mxu0  ;;  %v1088_v55 = vpop.f32.mrf.mxu1  ;;  %5441 = vmatmul.mubr.msk.f32.gmra.mxu0 %vm554_vm0, %v1280_v48  ;;  %5497 = vmatmul.mubr.msk.f32.gmra.mxu1 %vm554_vm0, %v1754_v49 }
  0xf2   : > { %v7279_v56 = vadd.f32 %v1088_v55, %v735_v54  ;;  %1598 = vmatprep.mubr.f32.mxu0 %v9955_v50  ;;  %2072 = vmatprep.mubr.f32.mxu1 %v9955_v50  ;;  %v1288_v54 = vld [vmem:[%s6731_s22 + $0xda] sm:$0xff] }
  0xf3   : > { %v737_v59 = vpop.f32.mrf.mxu0  ;;  %v1090_v60 = vpop.f32.mrf.mxu1  ;;  %v1762_v55 = vld [vmem:[%s6731_s22 + $0xdb] sm:$0xff] }
  0xf4   : > { %v7285_v61 = vadd.f32 %v1090_v60, %v737_v59 }
  0xf5   : > { %v741_v62 = vpop.f32.mrf.mxu0  ;;  %v1094_v63 = vpop.f32.mrf.mxu1  ;;  %5442 = vmatmul.mubr.msk.f32.gmra.mxu0 %vm554_vm0, %v1281_v57  ;;  %5498 = vmatmul.mubr.msk.f32.gmra.mxu1 %vm554_vm0, %v1755_v58 }
  0xf6   : > { %v7289_v0 = vadd.f32 %v1094_v63, %v741_v62  ;;  %1604 = vmatprep.mubr.f32.mxu0 %v9955_v50  ;;  %2078 = vmatprep.mubr.f32.mxu1 %v9955_v50  ;;  %v1289_v63 = vld [vmem:[%s6731_s22 + $0xe2] sm:$0xff] }
  0xf7   : > { %v743_v3 = vpop.f32.mrf.mxu0  ;;  %v1096_v4 = vpop.f32.mrf.mxu1 }
  0xf8   : > { %v7295_v5 = vadd.f32 %v1096_v4, %v743_v3 }
  0xf9   : > { %v747_v6 = vpop.f32.mrf.mxu0  ;;  %v1100_v7 = vpop.f32.mrf.mxu1  ;;  %5443 = vmatmul.mubr.msk.f32.gmra.mxu0 %vm554_vm0, %v1282_v1  ;;  %5499 = vmatmul.mubr.msk.f32.gmra.mxu1 %vm554_vm0, %v1756_v2  ;;  %v1763_v1 = vld [vmem:[%s6731_s22 + $0xe3] sm:$0xff] }
  0xfa   : > { %v7299_v8 = vadd.f32 %v1100_v7, %v747_v6  ;;  %1610 = vmatprep.mubr.f32.mxu0 %v9955_v50  ;;  %2084 = vmatprep.mubr.f32.mxu1 %v9955_v50 }
  0xfb   : > { %v749_v11 = vpop.f32.mrf.mxu0  ;;  %v1102_v12 = vpop.f32.mrf.mxu1 }
  0xfc   : > { %v7305_v13 = vadd.f32 %v1102_v12, %v749_v11 }
  0xfd   : > { %v753_v14 = vpop.f32.mrf.mxu0  ;;  %v1106_v15 = vpop.f32.mrf.mxu1  ;;  %5444 = vmatmul.mubr.msk.f32.gmra.mxu0 %vm554_vm0, %v1283_v9  ;;  %5500 = vmatmul.mubr.msk.f32.gmra.mxu1 %vm554_vm0, %v1757_v10  ;;  %v1290_v9 = vld [vmem:[%s6731_s22 + $0xea] sm:$0xff] }
  0xfe   : > { %v7309_v16 = vadd.f32 %v1106_v15, %v753_v14  ;;  %1616 = vmatprep.mubr.f32.mxu0 %v9955_v50  ;;  %2090 = vmatprep.mubr.f32.mxu1 %v9955_v50  ;;  %v1764_v10 = vld [vmem:[%s6731_s22 + $0xeb] sm:$0xff] }
  0xff   : > { %v755_v19 = vpop.f32.mrf.mxu0  ;;  %v1108_v20 = vpop.f32.mrf.mxu1 }
 0x100   : > { %v7315_v21 = vadd.f32 %v1108_v20, %v755_v19  ;;  %v1765_v19 = vld [vmem:[%s6731_s22 + $0xf3] sm:$0xff] }
 0x101   : > { %v759_v22 = vpop.f32.mrf.mxu0  ;;  %v1112_v23 = vpop.f32.mrf.mxu1  ;;  %5445 = vmatmul.mubr.msk.f32.gmra.mxu0 %vm554_vm0, %v1284_v17  ;;  %5501 = vmatmul.mubr.msk.f32.gmra.mxu1 %vm554_vm0, %v1758_v18  ;;  %v1291_v18 = vld [vmem:[%s6731_s22 + $0xf2] sm:$0xff] }
 0x102   : > { %v7319_v24 = vadd.f32 %v1112_v23, %v759_v22  ;;  %1622 = vmatprep.mubr.f32.mxu0 %v9955_v50  ;;  %2096 = vmatprep.mubr.f32.mxu1 %v9955_v50 }
 0x103   : > { %v761_v27 = vpop.f32.mrf.mxu0  ;;  %v1114_v28 = vpop.f32.mrf.mxu1 }
 0x104   : > { %v7325_v29 = vadd.f32 %v1114_v28, %v761_v27  ;;  %v1292_v27 = vld [vmem:[%s6731_s22 + $0xfa] sm:$0xf] }
 0x105   : > { %v765_v30 = vpop.f32.mrf.mxu0  ;;  %v1118_v32 = vpop.f32.mrf.mxu1  ;;  %5446 = vmatmul.mubr.msk.f32.gmra.mxu0 %vm554_vm0, %v1285_v25  ;;  %5502 = vmatmul.mubr.msk.f32.gmra.mxu1 %vm554_vm0, %v1759_v26  ;;  %v1766_v28 = vld [vmem:[%s6731_s22 + $0xfb] sm:$0xf] }
 0x106   : > { %v7329_v33 = vadd.f32 %v1118_v32, %v765_v30  ;;  %1628 = vmatprep.mubr.f32.mxu0 %v9955_v50  ;;  %2102 = vmatprep.mubr.f32.mxu1 %v9955_v50 }
 0x107   : > { %v7335_v37 = vpop.f32.mrf.mxu0  ;;  %v7337_v38 = vpop.f32.mrf.mxu1 }
 0x109   : > { %v771_v40 = vpop.f32.mrf.mxu0  ;;  %v1124_v41 = vpop.f32.mrf.mxu1  ;;  %5447 = vmatmul.mubr.msk.f32.gmra.mxu0 %vm554_vm0, %v1286_v34  ;;  %5503 = vmatmul.mubr.msk.f32.gmra.mxu1 %vm554_vm0, %v1760_v35 }
 0x10a   : > { %v7341_v42 = vadd.f32 %v1124_v41, %v771_v40  ;;  %1634 = vmatprep.mubr.f32.mxu0 %v9955_v50  ;;  %2108 = vmatprep.mubr.f32.mxu1 %v9955_v50  ;;  %v2209_v41 = vld [vmem:[%s6731_s22 + $0x4] sm:$0xff] }
 0x10b   : > { %v7347_v46 = vpop.f32.mrf.mxu0  ;;  %v7349_v48 = vpop.f32.mrf.mxu1 }
 0x10c   : > { %9958 = vst [vmem:[#allocation2_spill] sm:$0xff] %v7349_v48 }
 0x10d   : > { %v777_v49 = vpop.f32.mrf.mxu0  ;;  %v1130_v51 = vpop.f32.mrf.mxu1  ;;  %5448 = vmatmul.mubr.msk.f32.gmra.mxu0 %vm554_vm0, %v1287_v43  ;;  %5504 = vmatmul.mubr.msk.f32.gmra.mxu1 %vm554_vm0, %v1761_v45 }
 0x10e   : > { %v7353_v52 = vadd.f32 %v1130_v51, %v777_v49  ;;  %1640 = vmatprep.mubr.f32.mxu0 %v9955_v50  ;;  %2114 = vmatprep.mubr.f32.mxu1 %v9955_v50 }
 0x10f   : > { %v7359_v57 = vpop.f32.mrf.mxu0  ;;  %v7361_v58 = vpop.f32.mrf.mxu1 }
 0x110   : > { %9959 = vst [vmem:[#allocation3_spill] sm:$0xff] %v7359_v57  ;;  %9960 = vst [vmem:[#allocation4_spill] sm:$0xff] %v7361_v58 }
 0x111   : > { %v783_v59 = vpop.f32.mrf.mxu0  ;;  %v1136_v60 = vpop.f32.mrf.mxu1  ;;  %5449 = vmatmul.mubr.msk.f32.gmra.mxu0 %vm554_vm0, %v1288_v54  ;;  %5505 = vmatmul.mubr.msk.f32.gmra.mxu1 %vm554_vm0, %v1762_v55  ;;  %v2210_v55 = vld [vmem:[%s6731_s22 + $0xc] sm:$0xff] }
 0x112   : > { %v7365_v62 = vadd.f32 %v1136_v60, %v783_v59  ;;  %1646 = vmatprep.mubr.f32.mxu0 %v9955_v50  ;;  %2120 = vmatprep.mubr.f32.mxu1 %v9955_v50 }
 0x113   : > { %v7371_v2 = vpop.f32.mrf.mxu0  ;;  %v7373_v3 = vpop.f32.mrf.mxu1 }
 0x114   : > { %9961 = vst [vmem:[#allocation5_spill] sm:$0xff] %v7371_v2  ;;  %9962 = vst [vmem:[#allocation6_spill] sm:$0xff] %v7373_v3 }
 0x115   : > { %v789_v4 = vpop.f32.mrf.mxu0  ;;  %v1142_v6 = vpop.f32.mrf.mxu1  ;;  %5450 = vmatmul.mubr.msk.f32.gmra.mxu0 %vm554_vm0, %v1289_v63  ;;  %5506 = vmatmul.mubr.msk.f32.gmra.mxu1 %vm554_vm0, %v1763_v1 }
 0x116   : > { %v7377_v7 = vadd.f32 %v1142_v6, %v789_v4  ;;  %1652 = vmatprep.mubr.f32.mxu0 %v9955_v50  ;;  %2126 = vmatprep.mubr.f32.mxu1 %v9955_v50  ;;  %v2211_v6 = vld [vmem:[%s6731_s22 + $0x14] sm:$0xff] }
 0x117   : > { %v7383_v11 = vpop.f32.mrf.mxu0  ;;  %v7385_v12 = vpop.f32.mrf.mxu1 }
 0x118   : > { %9963 = vst [vmem:[#allocation7_spill] sm:$0xff] %v7383_v11  ;;  %9964 = vst [vmem:[#allocation8_spill] sm:$0xff] %v7385_v12 }
 0x119   : > { %v795_v14 = vpop.f32.mrf.mxu0  ;;  %v1148_v15 = vpop.f32.mrf.mxu1  ;;  %5451 = vmatmul.mubr.msk.f32.gmra.mxu0 %vm554_vm0, %v1290_v9  ;;  %5507 = vmatmul.mubr.msk.f32.gmra.mxu1 %vm554_vm0, %v1764_v10 }
 0x11a   : > { %v7389_v17 = vadd.f32 %v1148_v15, %v795_v14  ;;  %1658 = vmatprep.mubr.f32.mxu0 %v9955_v50  ;;  %2132 = vmatprep.mubr.f32.mxu1 %v9955_v50 }
 0x11b   : > { %v7395_v20 = vpop.f32.mrf.mxu0  ;;  %v7397_v22 = vpop.f32.mrf.mxu1 }
 0x11c   : > { %9965 = vst [vmem:[#allocation9_spill] sm:$0xff] %v7395_v20  ;;  %9966 = vst [vmem:[#allocation10_spill] sm:$0xff] %v7397_v22 }
 0x11d   : > { %v801_v23 = vpop.f32.mrf.mxu0  ;;  %v1154_v25 = vpop.f32.mrf.mxu1  ;;  %5452 = vmatmul.mubr.msk.f32.gmra.mxu0 %vm554_vm0, %v1291_v18  ;;  %5508 = vmatmul.mubr.msk.f32.gmra.mxu1 %vm554_vm0, %v1765_v19  ;;  %v2212_v19 = vld [vmem:[%s6731_s22 + $0x1c] sm:$0xff] }
 0x11e   : > { %v7401_v26 = vadd.f32 %v1154_v25, %v801_v23  ;;  %1664 = vmatprep.mubr.f32.mxu0 %v9955_v50  ;;  %2138 = vmatprep.mubr.f32.mxu1 %v9955_v50 }
 0x11f   : > { %v7407_v30 = vpop.f32.mrf.mxu0  ;;  %v7409_v32 = vpop.f32.mrf.mxu1 }
 0x120   : > { %9967 = vst [vmem:[#allocation11_spill] sm:$0xff] %v7407_v30  ;;  %9968 = vst [vmem:[#allocation12_spill] sm:$0xff] %v7409_v32  ;;  %v2226_v32 = vld [vmem:[%s6731_s22 + $0x8c] sm:$0xff] }
 0x121   : > { %v807_v34 = vpop.f32.mrf.mxu0  ;;  %v1160_v35 = vpop.f32.mrf.mxu1  ;;  %5453 = vmatmul.mubr.msk.f32.gmra.mxu0 %vm554_vm0, %v1292_v27  ;;  %5509 = vmatmul.mubr.msk.f32.gmra.mxu1 %vm554_vm0, %v1766_v28 }
 0x122   : > { %v7413_v40 = vadd.f32 %v1160_v35, %v807_v34  ;;  %2426 = vmatprep.mubr.f32.mxu0 %v9955_v50  ;;  %v2213_v35 = vld [vmem:[%s6731_s22 + $0x24] sm:$0xff] }
 0x123   : > { %v7417_v43 = vpop.f32.mrf.mxu0  ;;  %v7419_v45 = vpop.f32.mrf.mxu1 }
 0x124   : > { %9969 = vst [vmem:[#allocation13_spill] sm:$0xff] %v7417_v43  ;;  %9970 = vst [vmem:[#allocation14_spill] sm:$0xff] %v7419_v45 }
 0x125   : > { %v813_v49 = vpop.f32.mrf.mxu0  ;;  %v1166_v51 = vpop.f32.mrf.mxu1  ;;  %5534 = vmatmul.mubr.msk.f32.vlgmr.msra.gmra.mxu0 %vm554_vm0, %v2209_v41 }
 0x126   : > { %v7422_v54 = vadd.f32 %v1166_v51, %v813_v49  ;;  %2432 = vmatprep.mubr.f32.mxu0 %v9955_v50 }
 0x127   : > { %v7426_v59 = vpop.f32.mrf.mxu0  ;;  %v7428_v60 = vpop.f32.mrf.mxu1 }
 0x128   : > { %9971 = vst [vmem:[#allocation15_spill] sm:$0xff] %v7426_v59  ;;  %9972 = vst [vmem:[#allocation16_spill] sm:$0xff] %v7428_v60 }
 0x129   : > { %v819_v63 = vpop.f32.mrf.mxu0  ;;  %v1172_v1 = vpop.f32.mrf.mxu1  ;;  %5535 = vmatmul.mubr.msk.f32.gmra.mxu0 %vm554_vm0, %v2210_v55 }
 0x12a   : > { %v7431_v4 = vadd.f32 %v1172_v1, %v819_v63  ;;  %2438 = vmatprep.mubr.f32.mxu0 %v9955_v50  ;;  %v2214_v1 = vld [vmem:[%s6731_s22 + $0x2c] sm:$0xff] }
 0x12b   : > { %v7435_v9 = vpop.f32.mrf.mxu0  ;;  %v7437_v10 = vpop.f32.mrf.mxu1 }
 0x12c   : > { %9973 = vst [vmem:[#allocation17_spill] sm:$0xff] %v7435_v9  ;;  %9974 = vst [vmem:[#allocation18_spill] sm:$0xff] %v7437_v10 }
 0x12d   : > { %v825_v14 = vpop.f32.mrf.mxu0  ;;  %v1178_v15 = vpop.f32.mrf.mxu1  ;;  %5536 = vmatmul.mubr.msk.f32.gmra.mxu0 %vm554_vm0, %v2211_v6 }
 0x12e   : > { %v7440_v18 = vadd.f32 %v1178_v15, %v825_v14  ;;  %2444 = vmatprep.mubr.f32.mxu0 %v9955_v50 }
 0x12f   : > { %v7444_v23 = vpop.f32.mrf.mxu0  ;;  %v7446_v25 = vpop.f32.mrf.mxu1 }
 0x130   : > { %9975 = vst [vmem:[#allocation19_spill] sm:$0xff] %v7444_v23  ;;  %9976 = vst [vmem:[#allocation20_spill] sm:$0xff] %v7446_v25 }
 0x131   : > { %v831_v27 = vpop.f32.mrf.mxu0  ;;  %v1184_v28 = vpop.f32.mrf.mxu1  ;;  %5537 = vmatmul.mubr.msk.f32.gmra.mxu0 %vm554_vm0, %v2212_v19 }
 0x132   : > { %v7449_v34 = vadd.f32 %v1184_v28, %v831_v27  ;;  %2450 = vmatprep.mubr.f32.mxu0 %v9955_v50  ;;  %v2215_v28 = vld [vmem:[%s6731_s22 + $0x34] sm:$0xff] }
 0x133   : > { %v7453_v41 = vpop.f32.mrf.mxu0  ;;  %v7455_v49 = vpop.f32.mrf.mxu1 }
 0x134   : > { %9977 = vst [vmem:[#allocation21_spill] sm:$0xff] %v7453_v41  ;;  %9978 = vst [vmem:[#allocation22_spill] sm:$0xff] %v7455_v49 }
 0x135   : > { %v837_v51 = vpop.f32.mrf.mxu0  ;;  %v1190_v55 = vpop.f32.mrf.mxu1  ;;  %5538 = vmatmul.mubr.msk.f32.gmra.mxu0 %vm554_vm0, %v2213_v35 }
 0x136   : > { %v7458_v63 = vadd.f32 %v1190_v55, %v837_v51  ;;  %2456 = vmatprep.mubr.f32.mxu0 %v9955_v50 }
 0x137   : > { %v7462_v6 = vpop.f32.mrf.mxu0  ;;  %v7464_v14 = vpop.f32.mrf.mxu1 }
 0x138   : > { %9979 = vst [vmem:[#allocation23_spill] sm:$0xff] %v7462_v6  ;;  %9980 = vst [vmem:[#allocation24_spill] sm:$0xff] %v7464_v14  ;;  %v2216_v14 = vld [vmem:[%s6731_s22 + $0x3c] sm:$0xff] }
 0x139   : > { %v843_v15 = vpop.f32.mrf.mxu0  ;;  %v1196_v19 = vpop.f32.mrf.mxu1  ;;  %5539 = vmatmul.mubr.msk.f32.gmra.mxu0 %vm554_vm0, %v2214_v1 }
 0x13a   : > { %v7467_v27 = vadd.f32 %v1196_v19, %v843_v15  ;;  %2462 = vmatprep.mubr.f32.mxu0 %v9955_v50 }
 0x13b   : > { %v7471_v35 = vpop.f32.mrf.mxu0  ;;  %v7473_v51 = vpop.f32.mrf.mxu1 }
 0x13c   : > { %9981 = vst [vmem:[#allocation25_spill] sm:$0xff] %v7471_v35  ;;  %9982 = vst [vmem:[#allocation26_spill] sm:$0xff] %v7473_v51  ;;  %v2217_v51 = vld [vmem:[%s6731_s22 + $0x44] sm:$0xff] }
 0x13d   : > { %v849_v55 = vpop.f32.mrf.mxu0  ;;  %v1202_v49 = vpop.f32.mrf.mxu1  ;;  %5540 = vmatmul.mubr.msk.f32.gmra.mxu0 %vm554_vm0, %v2215_v28 }
 0x13e   : > { %v7476_v6 = vadd.f32 %v1202_v49, %v849_v55  ;;  %2468 = vmatprep.mubr.f32.mxu0 %v9955_v50 }
 0x13f   : > { %v7480_v1 = vpop.f32.mrf.mxu0  ;;  %v7482_v15 = vpop.f32.mrf.mxu1 }
 0x140   : > { %9983 = vst [vmem:[#allocation27_spill] sm:$0xff] %v7480_v1  ;;  %9984 = vst [vmem:[#allocation28_spill] sm:$0xff] %v7482_v15  ;;  %v2218_v15 = vld [vmem:[%s6731_s22 + $0x4c] sm:$0xff] }
 0x141   : > { %v855_v19 = vpop.f32.mrf.mxu0  ;;  %v1208_v41 = vpop.f32.mrf.mxu1  ;;  %5541 = vmatmul.mubr.msk.f32.gmra.mxu0 %vm554_vm0, %v2216_v14 }
 0x142   : > { %v7485_v35 = vadd.f32 %v1208_v41, %v855_v19  ;;  %2474 = vmatprep.mubr.f32.mxu0 %v9955_v50 }
 0x143   : > { %v7489_v49 = vpop.f32.mrf.mxu0  ;;  %v7491_v28 = vpop.f32.mrf.mxu1 }
 0x144   : > { %9985 = vst [vmem:[#allocation29_spill] sm:$0xff] %v7489_v49  ;;  %9986 = vst [vmem:[#allocation30_spill] sm:$0xff] %v7491_v28  ;;  %v2219_v28 = vld [vmem:[%s6731_s22 + $0x54] sm:$0xff] }
 0x145   : > { %v861_v55 = vpop.f32.mrf.mxu0  ;;  %v1214_v25 = vpop.f32.mrf.mxu1  ;;  %5542 = vmatmul.mubr.msk.f32.gmra.mxu0 %vm554_vm0, %v2217_v51 }
 0x146   : > { %v7494_v1 = vadd.f32 %v1214_v25, %v861_v55  ;;  %2480 = vmatprep.mubr.f32.mxu0 %v9955_v50 }
 0x147   : > { %v7498_v41 = vpop.f32.mrf.mxu0  ;;  %v7500_v14 = vpop.f32.mrf.mxu1 }
 0x148   : > { %9987 = vst [vmem:[#allocation31_spill] sm:$0xff] %v7498_v41  ;;  %9988 = vst [vmem:[#allocation32_spill] sm:$0xff] %v7500_v14  ;;  %v2220_v14 = vld [vmem:[%s6731_s22 + $0x5c] sm:$0xff] }
 0x149   : > { %v867_v19 = vpop.f32.mrf.mxu0  ;;  %v1220_v23 = vpop.f32.mrf.mxu1  ;;  %5543 = vmatmul.mubr.msk.f32.gmra.mxu0 %vm554_vm0, %v2218_v15 }
 0x14a   : > { %v7503_v49 = vadd.f32 %v1220_v23, %v867_v19  ;;  %2486 = vmatprep.mubr.f32.mxu0 %v9955_v50 }
 0x14b   : > { %v7507_v25 = vpop.f32.mrf.mxu0  ;;  %v7509_v51 = vpop.f32.mrf.mxu1 }
 0x14c   : > { %9989 = vst [vmem:[#allocation33_spill] sm:$0xff] %v7507_v25  ;;  %9990 = vst [vmem:[#allocation34_spill] sm:$0xff] %v7509_v51  ;;  %v2221_v51 = vld [vmem:[%s6731_s22 + $0x64] sm:$0xff] }
 0x14d   : > { %v873_v55 = vpop.f32.mrf.mxu0  ;;  %v1226_v10 = vpop.f32.mrf.mxu1  ;;  %5544 = vmatmul.mubr.msk.f32.gmra.mxu0 %vm554_vm0, %v2219_v28 }
 0x14e   : > { %v7512_v41 = vadd.f32 %v1226_v10, %v873_v55  ;;  %2492 = vmatprep.mubr.f32.mxu0 %v9955_v50 }
 0x14f   : > { %v7516_v23 = vpop.f32.mrf.mxu0  ;;  %v7518_v15 = vpop.f32.mrf.mxu1 }
 0x150   : > { %9991 = vst [vmem:[#allocation35_spill] sm:$0xff] %v7516_v23  ;;  %9992 = vst [vmem:[#allocation36_spill] sm:$0xff] %v7518_v15  ;;  %v2222_v15 = vld [vmem:[%s6731_s22 + $0x6c] sm:$0xff] }
 0x151   : > { %v879_v19 = vpop.f32.mrf.mxu0  ;;  %v1232_v9 = vpop.f32.mrf.mxu1  ;;  %5545 = vmatmul.mubr.msk.f32.gmra.mxu0 %vm554_vm0, %v2220_v14 }
 0x152   : > { %v7521_v25 = vadd.f32 %v1232_v9, %v879_v19  ;;  %2498 = vmatprep.mubr.f32.mxu0 %v9955_v50 }
 0x153   : > { %v7525_v10 = vpop.f32.mrf.mxu0  ;;  %v7527_v28 = vpop.f32.mrf.mxu1 }
 0x154   : > { %9993 = vst [vmem:[#allocation37_spill] sm:$0xff] %v7525_v10  ;;  %9994 = vst [vmem:[#allocation38_spill] sm:$0xff] %v7527_v28  ;;  %v2223_v28 = vld [vmem:[%s6731_s22 + $0x74] sm:$0xff] }
 0x155   : > { %v885_v55 = vpop.f32.mrf.mxu0  ;;  %v1238_v60 = vpop.f32.mrf.mxu1  ;;  %5546 = vmatmul.mubr.msk.f32.gmra.mxu0 %vm554_vm0, %v2221_v51 }
 0x156   : > { %v7530_v23 = vadd.f32 %v1238_v60, %v885_v55  ;;  %2504 = vmatprep.mubr.f32.mxu0 %v9955_v50 }
 0x157   : > { %v7534_v9 = vpop.f32.mrf.mxu0  ;;  %v7536_v14 = vpop.f32.mrf.mxu1 }
 0x158   : > { %9995 = vst [vmem:[#allocation39_spill] sm:$0xff] %v7534_v9  ;;  %9996 = vst [vmem:[#allocation40_spill] sm:$0xff] %v7536_v14  ;;  %v2224_v14 = vld [vmem:[%s6731_s22 + $0x7c] sm:$0xff] }
 0x159   : > { %v891_v19 = vpop.f32.mrf.mxu0  ;;  %v1244_v59 = vpop.f32.mrf.mxu1  ;;  %5547 = vmatmul.mubr.msk.f32.gmra.mxu0 %vm554_vm0, %v2222_v15 }
 0x15a   : > { %v7539_v10 = vadd.f32 %v1244_v59, %v891_v19  ;;  %2510 = vmatprep.mubr.f32.mxu0 %v9955_v50 }
 0x15b   : > { %v7543_v60 = vpop.f32.mrf.mxu0  ;;  %v7545_v51 = vpop.f32.mrf.mxu1 }
 0x15c   : > { %9997 = vst [vmem:[#allocation41_spill] sm:$0xff] %v7543_v60  ;;  %9998 = vst [vmem:[#allocation42_spill] sm:$0xff] %v7545_v51  ;;  %v2225_v51 = vld [vmem:[%s6731_s22 + $0x84] sm:$0xff] }
 0x15d   : > { %v897_v55 = vpop.f32.mrf.mxu0  ;;  %v1250_v45 = vpop.f32.mrf.mxu1  ;;  %5548 = vmatmul.mubr.msk.f32.gmra.mxu0 %vm554_vm0, %v2223_v28 }
 0x15e   : > { %v7548_v9 = vadd.f32 %v1250_v45, %v897_v55  ;;  %2516 = vmatprep.mubr.f32.mxu0 %v9955_v50 }
 0x15f   : > { %v7552_v59 = vpop.f32.mrf.mxu0  ;;  %v7554_v15 = vpop.f32.mrf.mxu1 }
 0x160   : > { %9999 = vst [vmem:[#allocation43_spill] sm:$0xff] %v7552_v59  ;;  %10000 = vst [vmem:[#allocation44_spill] sm:$0xff] %v7554_v15 }
 0x161   : > { %v903_v19 = vpop.f32.mrf.mxu0  ;;  %v1256_v43 = vpop.f32.mrf.mxu1  ;;  %5549 = vmatmul.mubr.msk.f32.gmra.mxu0 %vm554_vm0, %v2224_v14 }
 0x162   : > { %v7557_v60 = vadd.f32 %v1256_v43, %v903_v19  ;;  %2522 = vmatprep.mubr.f32.mxu0 %v9955_v50 }
 0x163   : > { %v7561_v28 = vpop.f32.mrf.mxu0  ;;  %v7563_v45 = vpop.f32.mrf.mxu1 }
 0x164   : > { %10001 = vst [vmem:[#allocation45_spill] sm:$0xff] %v7561_v28  ;;  %10002 = vst [vmem:[#allocation46_spill] sm:$0xff] %v7563_v45 }
 0x165   : > { %v1480_v55 = vpop.f32.mrf.mxu0  ;;  %5550 = vmatmul.mubr.msk.f32.gmra.mxu0 %vm554_vm0, %v2225_v51  ;;  %v1954_v59 = vpop.f32.mrf.mxu1 }
 0x166   : > { %v1671_v15 = vadd.f32 %v1480_v55, %v7249_v31  ;;  %2528 = vmatprep.mubr.f32.mxu0 %v9955_v50  ;;  %v2227_v31 = vld [vmem:[%s6731_s22 + $0x94] sm:$0xff] }
 0x167   : > { %v1482_v14 = vpop.f32.mrf.mxu0  ;;  %v7569_v43 = vpop.f32.mrf.mxu1 }
 0x168   : > { %v7572_v19 = vadd.f32 %v1482_v14, %v7255_v36  ;;  %v7574_v30 = vadd.f32 %v1954_v59, %v1671_v15 }
 0x169   : > { %v1486_v45 = vpop.f32.mrf.mxu0  ;;  %5551 = vmatmul.mubr.msk.f32.gmra.mxu0 %vm554_vm0, %v2226_v32  ;;  %v1960_v28 = vpop.f32.mrf.mxu1 }
 0x16a   : > { %v1673_v51 = vadd.f32 %v1486_v45, %v7259_v39  ;;  %2534 = vmatprep.mubr.f32.mxu0 %v9955_v50  ;;  %v2228_v39 = vld [vmem:[%s6731_s22 + $0x9c] sm:$0xff] }
 0x16b   : > { %v1488_v55 = vpop.f32.mrf.mxu0  ;;  %v7580_v22 = vpop.f32.mrf.mxu1 }
 0x16c   : > { %v7583_v20 = vadd.f32 %v1488_v55, %v7265_v44  ;;  %v7585_v36 = vadd.f32 %v1960_v28, %v1673_v51 }
 0x16d   : > { %v1492_v59 = vpop.f32.mrf.mxu0  ;;  %5552 = vmatmul.mubr.msk.f32.gmra.mxu0 %vm554_vm0, %v2227_v31  ;;  %v1966_v15 = vpop.f32.mrf.mxu1 }
 0x16e   : > { %v1675_v32 = vadd.f32 %v1492_v59, %v7269_v47  ;;  %2540 = vmatprep.mubr.f32.mxu0 %v9955_v50  ;;  %v2229_v47 = vld [vmem:[%s6731_s22 + $0xa4] sm:$0xff] }
 0x16f   : > { %v1494_v45 = vpop.f32.mrf.mxu0  ;;  %v7591_v14 = vpop.f32.mrf.mxu1 }
 0x170   : > { %v7594_v12 = vadd.f32 %v1494_v45, %v7275_v53  ;;  %v7596_v44 = vadd.f32 %v1966_v15, %v1675_v32 }
 0x171   : > { %v1498_v28 = vpop.f32.mrf.mxu0  ;;  %5553 = vmatmul.mubr.msk.f32.gmra.mxu0 %vm554_vm0, %v2228_v39  ;;  %v1972_v51 = vpop.f32.mrf.mxu1 }
 0x172   : > { %v1677_v31 = vadd.f32 %v1498_v28, %v7279_v56  ;;  %2546 = vmatprep.mubr.f32.mxu0 %v9955_v50  ;;  %v2230_v56 = vld [vmem:[%s6731_s22 + $0xac] sm:$0xff] }
 0x173   : > { %v1500_v55 = vpop.f32.mrf.mxu0  ;;  %v7602_v59 = vpop.f32.mrf.mxu1 }
 0x174   : > { %v7605_v11 = vadd.f32 %v1500_v55, %v7285_v61  ;;  %v7607_v53 = vadd.f32 %v1972_v51, %v1677_v31 }
 0x175   : > { %v1504_v15 = vpop.f32.mrf.mxu0  ;;  %5554 = vmatmul.mubr.msk.f32.gmra.mxu0 %vm554_vm0, %v2229_v47  ;;  %v1978_v32 = vpop.f32.mrf.mxu1 }
 0x176   : > { %v1679_v39 = vadd.f32 %v1504_v15, %v7289_v0  ;;  %2552 = vmatprep.mubr.f32.mxu0 %v9955_v50  ;;  %v2231_v0 = vld [vmem:[%s6731_s22 + $0xb4] sm:$0xff] }
 0x177   : > { %v1506_v45 = vpop.f32.mrf.mxu0  ;;  %v7613_v28 = vpop.f32.mrf.mxu1 }
 0x178   : > { %v7616_v3 = vadd.f32 %v1506_v45, %v7295_v5  ;;  %v7618_v61 = vadd.f32 %v1978_v32, %v1679_v39 }
 0x179   : > { %v1510_v51 = vpop.f32.mrf.mxu0  ;;  %5555 = vmatmul.mubr.msk.f32.gmra.mxu0 %vm554_vm0, %v2230_v56  ;;  %v1984_v31 = vpop.f32.mrf.mxu1 }
 0x17a   : > { %v1681_v47 = vadd.f32 %v1510_v51, %v7299_v8  ;;  %2558 = vmatprep.mubr.f32.mxu0 %v9955_v50  ;;  %v2232_v8 = vld [vmem:[%s6731_s22 + $0xbc] sm:$0xff] }
 0x17b   : > { %v1512_v55 = vpop.f32.mrf.mxu0  ;;  %v7624_v15 = vpop.f32.mrf.mxu1 }
 0x17c   : > { %v7627_v2 = vadd.f32 %v1512_v55, %v7305_v13  ;;  %v7629_v5 = vadd.f32 %v1984_v31, %v1681_v47 }
 0x17d   : > { %v1516_v32 = vpop.f32.mrf.mxu0  ;;  %5556 = vmatmul.mubr.msk.f32.gmra.mxu0 %vm554_vm0, %v2231_v0  ;;  %v1990_v39 = vpop.f32.mrf.mxu1 }
 0x17e   : > { %v1683_v56 = vadd.f32 %v1516_v32, %v7309_v16  ;;  %2564 = vmatprep.mubr.f32.mxu0 %v9955_v50  ;;  %v2233_v16 = vld [vmem:[%s6731_s22 + $0xc4] sm:$0xff] }
 0x17f   : > { %v1518_v45 = vpop.f32.mrf.mxu0  ;;  %v7635_v51 = vpop.f32.mrf.mxu1 }
 0x180   : > { %v7638_v58 = vadd.f32 %v1518_v45, %v7315_v21  ;;  %v7640_v13 = vadd.f32 %v1990_v39, %v1683_v56 }
 0x181   : > { %v1522_v31 = vpop.f32.mrf.mxu0  ;;  %5557 = vmatmul.mubr.msk.f32.gmra.mxu0 %vm554_vm0, %v2232_v8  ;;  %v1996_v47 = vpop.f32.mrf.mxu1 }
 0x182   : > { %v1685_v0 = vadd.f32 %v1522_v31, %v7319_v24  ;;  %2570 = vmatprep.mubr.f32.mxu0 %v9955_v50  ;;  %v2234_v24 = vld [vmem:[%s6731_s22 + $0xcc] sm:$0xff] }
 0x183   : > { %v1524_v55 = vpop.f32.mrf.mxu0  ;;  %v7646_v32 = vpop.f32.mrf.mxu1 }
 0x184   : > { %v7649_v57 = vadd.f32 %v1524_v55, %v7325_v29  ;;  %v7651_v21 = vadd.f32 %v1996_v47, %v1685_v0 }
 0x185   : > { %v1528_v39 = vpop.f32.mrf.mxu0  ;;  %5558 = vmatmul.mubr.msk.f32.gmra.mxu0 %vm554_vm0, %v2233_v16  ;;  %v2002_v56 = vpop.f32.mrf.mxu1  ;;  %v2235_v16 = vld [vmem:[%s6731_s22 + $0xd4] sm:$0xff] }
 0x186   : > { %v1687_v8 = vadd.f32 %v1528_v39, %v7329_v33  ;;  %2576 = vmatprep.mubr.f32.mxu0 %v9955_v50 }
 0x187   : > { %v7657_v45 = vpop.f32.mrf.mxu0  ;;  %v7659_v31 = vpop.f32.mrf.mxu1 }
 0x188   : > { %10003 = vst [vmem:[#allocation47_spill] sm:$0xff] %v7659_v31  ;;  %v7661_v48 = vadd.f32 %v2002_v56, %v1687_v8 }
 0x189   : > { %v1534_v29 = vpop.f32.mrf.mxu0  ;;  %5559 = vmatmul.mubr.msk.f32.gmra.mxu0 %vm554_vm0, %v2234_v24  ;;  %v2008_v47 = vpop.f32.mrf.mxu1  ;;  %v2236_v24 = vld [vmem:[%s6731_s22 + $0xdc] sm:$0xff] }
 0x18a   : > { %10004 = vst [vmem:[#allocation48_spill] sm:$0xff] %v7661_v48  ;;  %v1689_v0 = vadd.f32 %v1534_v29, %v7341_v42  ;;  %2582 = vmatprep.mubr.f32.mxu0 %v9955_v50 }
 0x18b   : > { %v7667_v33 = vpop.f32.mrf.mxu0  ;;  %v7669_v55 = vpop.f32.mrf.mxu1 }
 0x18c   : > { %10005 = vst [vmem:[#allocation49_spill] sm:$0xff] %v7669_v55  ;;  %v7671_v39 = vadd.f32 %v2008_v47, %v1689_v0 }
 0x18d   : > { %v1540_v31 = vpop.f32.mrf.mxu0  ;;  %5560 = vmatmul.mubr.msk.f32.gmra.mxu0 %vm554_vm0, %v2235_v16  ;;  %v2014_v56 = vpop.f32.mrf.mxu1  ;;  %v2237_v16 = vld [vmem:[%s6731_s22 + $0xe4] sm:$0xff] }
 0x18e   : > { %10006 = vst [vmem:[#allocation50_spill] sm:$0xff] %v7671_v39  ;;  %v1691_v8 = vadd.f32 %v1540_v31, %v7353_v52  ;;  %2588 = vmatprep.mubr.f32.mxu0 %v9955_v50 }
 0x18f   : > { %v7677_v42 = vpop.f32.mrf.mxu0  ;;  %v7679_v29 = vpop.f32.mrf.mxu1 }
 0x190   : > { %10007 = vst [vmem:[#allocation51_spill] sm:$0xff] %v7679_v29  ;;  %v7681_v48 = vadd.f32 %v2014_v56, %v1691_v8 }
 0x191   : > { %v1546_v55 = vpop.f32.mrf.mxu0  ;;  %5561 = vmatmul.mubr.msk.f32.gmra.mxu0 %vm554_vm0, %v2236_v24  ;;  %v2020_v47 = vpop.f32.mrf.mxu1  ;;  %v2238_v24 = vld [vmem:[%s6731_s22 + $0xec] sm:$0xff] }
 0x192   : > { %10008 = vst [vmem:[#allocation52_spill] sm:$0xff] %v7681_v48  ;;  %v1693_v0 = vadd.f32 %v1546_v55, %v7365_v62  ;;  %2594 = vmatprep.mubr.f32.mxu0 %v9955_v50 }
 0x193   : > { %v7687_v52 = vpop.f32.mrf.mxu0  ;;  %v7689_v31 = vpop.f32.mrf.mxu1 }
 0x194   : > { %10009 = vst [vmem:[#allocation53_spill] sm:$0xff] %v7689_v31  ;;  %v7691_v39 = vadd.f32 %v2020_v47, %v1693_v0 }
 0x195   : > { %v1552_v29 = vpop.f32.mrf.mxu0  ;;  %5562 = vmatmul.mubr.msk.f32.gmra.mxu0 %vm554_vm0, %v2237_v16  ;;  %v2026_v56 = vpop.f32.mrf.mxu1  ;;  %v2239_v16 = vld [vmem:[%s6731_s22 + $0xf4] sm:$0xff] }
 0x196   : > { %10010 = vst [vmem:[#allocation54_spill] sm:$0xff] %v7691_v39  ;;  %v1695_v8 = vadd.f32 %v1552_v29, %v7377_v7  ;;  %2600 = vmatprep.mubr.f32.mxu0 %v9955_v50 }
 0x197   : > { %v7697_v62 = vpop.f32.mrf.mxu0  ;;  %v7699_v55 = vpop.f32.mrf.mxu1 }
 0x198   : > { %10011 = vst [vmem:[#allocation55_spill] sm:$0xff] %v7697_v62  ;;  %v7701_v48 = vadd.f32 %v2026_v56, %v1695_v8 }
 0x199   : > { %v1558_v31 = vpop.f32.mrf.mxu0  ;;  %5563 = vmatmul.mubr.msk.f32.gmra.mxu0 %vm554_vm0, %v2238_v24  ;;  %v2032_v47 = vpop.f32.mrf.mxu1  ;;  %v2240_v24 = vld [vmem:[%s6731_s22 + $0xfc] sm:$0xf] }
 0x19a   : > { %10012 = vst [vmem:[#allocation56_spill] sm:$0xff] %v7701_v48  ;;  %v1697_v0 = vadd.f32 %v1558_v31, %v7389_v17  ;;  %2606 = vmatprep.mubr.f32.mxu0 %v9955_v50 }
 0x19b   : > { %v7707_v7 = vpop.f32.mrf.mxu0  ;;  %v7709_v29 = vpop.f32.mrf.mxu1 }
 0x19c   : > { %10013 = vst [vmem:[#allocation57_spill] sm:$0xff] %v7707_v7  ;;  %v7711_v39 = vadd.f32 %v2032_v47, %v1697_v0 }
 0x19d   : > { %v1564_v62 = vpop.f32.mrf.mxu0  ;;  %5564 = vmatmul.mubr.msk.f32.gmra.mxu0 %vm554_vm0, %v2239_v16  ;;  %v2038_v56 = vpop.f32.mrf.mxu1 }
 0x19e   : > { %10014 = vst [vmem:[#allocation58_spill] sm:$0xff] %v7711_v39  ;;  %v1699_v8 = vadd.f32 %v1564_v62, %v7401_v26  ;;  %2612 = vmatprep.mubr.f32.mxu0 %v9955_v50 }
 0x19f   : > { %v7717_v48 = vpop.f32.mrf.mxu0  ;;  %v7719_v17 = vpop.f32.mrf.mxu1 }
 0x1a0   : > { %10015 = vst [vmem:[#allocation59_spill] sm:$0xff] %v7717_v48  ;;  %10016 = vst [vmem:[#allocation60_spill] sm:$0xff] %v7719_v17  ;;  %v7721_v31 = vadd.f32 %v2038_v56, %v1699_v8 }
 0x1a1   : > { %v1570_v7 = vpop.f32.mrf.mxu0  ;;  %5565 = vmatmul.mubr.msk.f32.gmra.mxu0 %vm554_vm0, %v2240_v24  ;;  %v2044_v47 = vpop.f32.mrf.mxu1 }
 0x1a2   : > { %10017 = vst [vmem:[#allocation61_spill] sm:$0xff] %v7721_v31  ;;  %v1701_v0 = vadd.f32 %v1570_v7, %v7413_v40  ;;  %3514 = vmatprep.mubr.f32.mxu0 %v9955_v50 }
 0x1a3   : > { %v7726_v16 = vpop.f32.mrf.mxu0  ;;  %v7728_v26 = vpop.f32.mrf.mxu1 }
 0x1a4   : > { %10018 = vst [vmem:[#allocation62_spill] sm:$0xff] %v7726_v16  ;;  %v7730_v62 = vadd.f32 %v2044_v47, %v1701_v0 }
 0x1a5   : > { %v1576_v39 = vpop.f32.mrf.mxu0  ;;  %v2050_v48 = vpop.f32.mrf.mxu1 }
 0x1a6   : > { %10019 = vst [vmem:[#allocation63_spill] sm:$0xff] %v7730_v62  ;;  %v1703_v17 = vadd.f32 %v1576_v39, %v7422_v54 }
 0x1a7   : > { %v7733_v56 = vpop.f32.mrf.mxu0  ;;  %v7735_v8 = vpop.f32.mrf.mxu1 }
 0x1a8   : > { %10020 = vst [vmem:[#allocation64_spill] sm:$0xff] %v7733_v56  ;;  %v7737_v24 = vadd.f32 %v2050_v48, %v1703_v17 }
 0x1a9   : > { %v1582_v31 = vpop.f32.mrf.mxu0  ;;  %v2056_v40 = vpop.f32.mrf.mxu1 }
 0x1aa   : > { %10021 = vst [vmem:[#allocation65_spill] sm:$0xff] %v7737_v24  ;;  %v1705_v7 = vadd.f32 %v1582_v31, %v7431_v4 }
 0x1ab   : > { %v7740_v50 = vpop.f32.mrf.mxu0  ;;  %v7742_v16 = vpop.f32.mrf.mxu1 }
 0x1ac   : > { %10022 = vst [vmem:[#allocation66_spill] sm:$0xff] %v7740_v50  ;;  %v7744_v47 = vadd.f32 %v2056_v40, %v1705_v7 }
 0x1ad   : > { %v1588_v0 = vpop.f32.mrf.mxu0  ;;  %v2062_v62 = vpop.f32.mrf.mxu1 }
 0x1ae   : > { %10023 = vst [vmem:[#allocation67_spill] sm:$0xff] %v7744_v47  ;;  %v1707_v54 = vadd.f32 %v1588_v0, %v7440_v18 }
 0x1af   : > { %v7747_v39 = vpop.f32.mrf.mxu0  ;;  %v7749_v56 = vpop.f32.mrf.mxu1 }
 0x1b0   : > { %10024 = vst [vmem:[#allocation68_spill] sm:$0xff] %v7747_v39  ;;  %v7751_v48 = vadd.f32 %v2062_v62, %v1707_v54 }
 0x1b1   : > { %v1594_v17 = vpop.f32.mrf.mxu0  ;;  %v2068_v24 = vpop.f32.mrf.mxu1 }
 0x1b2   : > { %10025 = vst [vmem:[#allocation69_spill] sm:$0xff] %v7751_v48  ;;  %v1709_v4 = vadd.f32 %v1594_v17, %v7449_v34 }
 0x1b3   : > { %v7754_v31 = vpop.f32.mrf.mxu0  ;;  %v7756_v50 = vpop.f32.mrf.mxu1 }
 0x1b4   : > { %v7758_v40 = vadd.f32 %v2068_v24, %v1709_v4 }
 0x1b5   : > { %v1600_v7 = vpop.f32.mrf.mxu0  ;;  %v2074_v47 = vpop.f32.mrf.mxu1 }
 0x1b6   : > { %10026 = vst [vmem:[#allocation70_spill] sm:$0xff] %v7758_v40  ;;  %v1711_v18 = vadd.f32 %v1600_v7, %v7458_v63 }
 0x1b7   : > { %v7761_v0 = vpop.f32.mrf.mxu0 }
 0x1b8   : > { %v7763_v39 = vadd.f32 %v2074_v47, %v1711_v18 }
 0x1b9   : > { %v1606_v62 = vpop.f32.mrf.mxu0 }
 0x1ba   : > { %v7766_v54 = vadd.f32 %v1606_v62, %v7467_v27 }
 0x1bb   : > { %v7768_v48 = vpop.f32.mrf.mxu0 }
 0x1bd   : > { %v1612_v34 = vpop.f32.mrf.mxu0 }
 0x1be   : > { %v7771_v17 = vadd.f32 %v1612_v34, %v7476_v6 }
 0x1bf   : > { %v7773_v24 = vpop.f32.mrf.mxu0 }
 0x1c0   : > { %10027 = vst [vmem:[#allocation71_spill] sm:$0xff] %v7771_v17 }
 0x1c1   : > { %v1618_v4 = vpop.f32.mrf.mxu0 }
 0x1c2   : > { %v7776_v40 = vadd.f32 %v1618_v4, %v7485_v35 }
 0x1c3   : > { %v7778_v63 = vpop.f32.mrf.mxu0 }
 0x1c4   : > { %10028 = vst [vmem:[#allocation72_spill] sm:$0xff] %v7776_v40 }
 0x1c5   : > { %v1624_v47 = vpop.f32.mrf.mxu0 }
 0x1c6   : > { %v7781_v7 = vadd.f32 %v1624_v47, %v7494_v1 }
 0x1c7   : > { %v7783_v27 = vpop.f32.mrf.mxu0 }
 0x1c8   : > { %10029 = vst [vmem:[#allocation73_spill] sm:$0xff] %v7781_v7 }
 0x1c9   : > { %v1630_v18 = vpop.f32.mrf.mxu0 }
 0x1ca   : > { %v7786_v62 = vadd.f32 %v1630_v18, %v7503_v49 }
 0x1cb   : > { %v7788_v6 = vpop.f32.mrf.mxu0 }
 0x1cc   : > { %10030 = vst [vmem:[#allocation74_spill] sm:$0xff] %v7786_v62 }
 0x1cd   : > { %v1636_v34 = vpop.f32.mrf.mxu0 }
 0x1ce   : > { %v7791_v17 = vadd.f32 %v1636_v34, %v7512_v41 }
 0x1cf   : > { %v7793_v35 = vpop.f32.mrf.mxu0 }
 0x1d0   : > { %10031 = vst [vmem:[#allocation75_spill] sm:$0xff] %v7791_v17 }
 0x1d1   : > { %v1642_v4 = vpop.f32.mrf.mxu0 }
 0x1d2   : > { %v7796_v40 = vadd.f32 %v1642_v4, %v7521_v25 }
 0x1d3   : > { %v7798_v1 = vpop.f32.mrf.mxu0 }
 0x1d4   : > { %10032 = vst [vmem:[#allocation76_spill] sm:$0xff] %v7796_v40 }
 0x1d5   : > { %v1648_v47 = vpop.f32.mrf.mxu0 }
 0x1d6   : > { %v7801_v7 = vadd.f32 %v1648_v47, %v7530_v23 }
 0x1d7   : > { %v7803_v49 = vpop.f32.mrf.mxu0 }
 0x1d8   : > { %10033 = vst [vmem:[#allocation77_spill] sm:$0xff] %v7801_v7  ;;  %v2146_v7 = vadd.f32 %v7569_v43, %v7572_v19 }
 0x1d9   : > { %v1654_v18 = vpop.f32.mrf.mxu0 }
 0x1da   : > { %v7806_v62 = vadd.f32 %v1654_v18, %v7539_v10 }
 0x1db   : > { %v7808_v41 = vpop.f32.mrf.mxu0 }
 0x1dc   : > { %10034 = vst [vmem:[#allocation78_spill] sm:$0xff] %v7806_v62  ;;  %10035 = vst [vmem:[#allocation79_spill] sm:$0xff] %v7808_v41 }
 0x1dd   : > { %v1660_v34 = vpop.f32.mrf.mxu0 }
 0x1de   : > { %v7811_v17 = vadd.f32 %v1660_v34, %v7548_v9  ;;  %v2148_v9 = vadd.f32 %v7580_v22, %v7583_v20  ;;  %v2152_v20 = vadd.f32 %v7602_v59, %v7605_v11  ;;  %v2156_v11 = vadd.f32 %v7624_v15, %v7627_v2 }
 0x1df   : > { %v7813_v25 = vpop.f32.mrf.mxu0 }
 0x1e0   : > { %10036 = vst [vmem:[#allocation80_spill] sm:$0xff] %v7811_v17  ;;  %10037 = vst [vmem:[#allocation81_spill] sm:$0xff] %v7813_v25 }
 0x1e1   : > { %v1666_v4 = vpop.f32.mrf.mxu0 }
 0x1e2   : > { %v7816_v40 = vadd.f32 %v1666_v4, %v7557_v60 }
 0x1e3   : > { %v7818_v23 = vpop.f32.mrf.mxu0 }
 0x1e4   : > { %10038 = vst [vmem:[#allocation82_spill] sm:$0xff] %v7816_v40  ;;  %10039 = vst [vmem:[#allocation83_spill] sm:$0xff] %v7818_v23  ;;  %v2150_v23 = vadd.f32 %v7591_v14, %v7594_v12  ;;  %v2154_v12 = vadd.f32 %v7613_v28, %v7616_v3  ;;  %v2158_v3 = vadd.f32 %v7635_v51, %v7638_v58  ;;  %v10040_v51 = vld [vmem:[#allocation2_spill] sm:$0xff] }
 0x1e5   : > { %v2428_v47 = vpop.f32.mrf.mxu0 }
 0x1e6   : > { %v2619_v10 = vadd.f32 %v2428_v47, %v7574_v30 }
 0x1e7   : > { %v2430_v18 = vpop.f32.mrf.mxu0 }
 0x1e8   : > { %v2620_v62 = vadd.f32 %v2430_v18, %v2146_v7 }
 0x1e9   : > { %v2434_v41 = vpop.f32.mrf.mxu0 }
 0x1ea   : > { %v7825_v34 = vmax.f32 %v2619_v10, %v2620_v62  ;;  %v2621_v17 = vadd.f32 %v2434_v41, %v7585_v36 }
 0x1eb   : > { %v2436_v60 = vpop.f32.mrf.mxu0 }
 0x1ec   : > { %v2622_v4 = vadd.f32 %v2436_v60, %v2148_v9  ;;  %v1121_v60 = vadd.f32 %v7337_v38, %v7335_v37 }
 0x1ed   : > { %v2440_v40 = vpop.f32.mrf.mxu0 }
 0x1ee   : > { %v7830_v25 = vmax.f32 %v2621_v17, %v2622_v4  ;;  %v2623_v30 = vadd.f32 %v2440_v40, %v7596_v44  ;;  %v1688_v2 = vadd.f32 %v7657_v45, %v1121_v60  ;;  %v10042_v45 = vld [vmem:[#allocation48_spill] sm:$0xff] }
 0x1ef   : > { %v2442_v43 = vpop.f32.mrf.mxu0 }
 0x1f0   : > { %v2624_v19 = vadd.f32 %v2442_v43, %v2150_v23 }
 0x1f1   : > { %v2446_v7 = vpop.f32.mrf.mxu0 }
 0x1f2   : > { %v7835_v22 = vmax.f32 %v2623_v30, %v2624_v19  ;;  %v2625_v36 = vadd.f32 %v2446_v7, %v7607_v53  ;;  %v1127_v7 = vadd.f32 %v10040_v51, %v7347_v46  ;;  %v10043_v46 = vld [vmem:[#allocation3_spill] sm:$0xff] }
 0x1f3   : > { %v2448_v62 = vpop.f32.mrf.mxu0 }
 0x1f4   : > { %v2626_v41 = vadd.f32 %v2448_v62, %v2152_v20  ;;  %v10041_v20 = vld [vmem:[#allocation47_spill] sm:$0xff]  ;;  %v1690_v38 = vadd.f32 %v7667_v33, %v1127_v7  ;;  %v10045_v33 = vld [vmem:[#allocation49_spill] sm:$0xff] }
 0x1f5   : > { %v2452_v47 = vpop.f32.mrf.mxu0 }
 0x1f6   : > { %v7840_v14 = vmax.f32 %v2625_v36, %v2626_v41  ;;  %v2627_v44 = vadd.f32 %v2452_v47, %v7618_v61  ;;  %v2162_v36 = vadd.f32 %v10041_v20, %v1688_v2  ;;  %v10044_v47 = vld [vmem:[#allocation4_spill] sm:$0xff]  ;;  %v10049_v2 = vld [vmem:[#allocation51_spill] sm:$0xff] }
 0x1f7   : > { %v2454_v40 = vpop.f32.mrf.mxu0  ;;  %v10052_v20 = vld [vmem:[#allocation8_spill] sm:$0xff] }
 0x1f8   : > { %v2628_v17 = vadd.f32 %v2454_v40, %v2154_v12  ;;  %v1133_v12 = vadd.f32 %v10044_v47, %v10043_v46  ;;  %v10055_v47 = vld [vmem:[#allocation54_spill] sm:$0xff] }
 0x1f9   : > { %v2458_v23 = vpop.f32.mrf.mxu0 }
 0x1fa   : > { %v7845_v59 = vmax.f32 %v2627_v44, %v2628_v17  ;;  %v2629_v53 = vadd.f32 %v2458_v23, %v7629_v5  ;;  %v2160_v5 = vadd.f32 %v7646_v32, %v7649_v57  ;;  %v2716_v57 = vld [vmem:[%s9943_s2 + $0x8] sm:$0xff]  ;;  %v7871_v32 = vpop.f32.mrf.mxu1  ;;  %v2164_v17 = vadd.f32 %v10045_v33, %v1690_v38  ;;  %v10057_v33 = vld [vmem:[#allocation10_spill] sm:$0xff] }
 0x1fb   : > { %v2460_v10 = vpop.f32.mrf.mxu0  ;;  %5567 = vmatprep.mubr.msk.f32.mxu1 %vm2743_vm1, %v2716_v57  ;;  %v1692_v23 = vadd.f32 %v7677_v42, %v1133_v12  ;;  %v10054_v57 = vld [vmem:[#allocation55_spill] sm:$0xff] }
 0x1fc   : > { %v2630_v18 = vadd.f32 %v2460_v10, %v2156_v11 }
 0x1fd   : > { %v2464_v9 = vpop.f32.mrf.mxu0 }
 0x1fe   : > { %v7850_v28 = vmax.f32 %v2629_v53, %v2630_v18  ;;  %v2631_v61 = vadd.f32 %v2464_v9, %v7640_v13  ;;  %v10046_v53 = vld [vmem:[#allocation50_spill] sm:$0xff]  ;;  %v7881_v18 = vpop.f32.mrf.mxu1 }
 0x1ff   : > { %v2466_v4 = vpop.f32.mrf.mxu0 }
 0x200   : > { %v2632_v30 = vadd.f32 %v2466_v4, %v2158_v3  ;;  %v10047_v3 = vld [vmem:[#allocation5_spill] sm:$0xff]  ;;  %v7890_v51 = vpop.f32.mrf.mxu1 }
 0x201   : > { %v2470_v15 = vpop.f32.mrf.mxu0 }
 0x202   : > { %v7858_v43 = vmax.f32 %v2631_v61, %v2632_v30  ;;  %v2633_v19 = vadd.f32 %v2470_v15, %v7651_v21  ;;  %v10048_v61 = vld [vmem:[#allocation6_spill] sm:$0xff]  ;;  %v2166_v15 = vadd.f32 %v10049_v2, %v1692_v23  ;;  %v7899_v12 = vpop.f32.mrf.mxu1 }
 0x203   : > { %v2472_v58 = vpop.f32.mrf.mxu0  ;;  %v1139_v60 = vadd.f32 %v10048_v61, %v10047_v3 }
 0x204   : > { %v2634_v13 = vadd.f32 %v2472_v58, %v2160_v5  ;;  %v10050_v58 = vld [vmem:[#allocation52_spill] sm:$0xff] }
 0x205   : > { %v2476_v37 = vpop.f32.mrf.mxu0  ;;  %v1694_v5 = vadd.f32 %v7687_v52, %v1139_v60  ;;  %v10059_v60 = vld [vmem:[#allocation56_spill] sm:$0xff] }
 0x206   : > { %v7865_v62 = vmax.f32 %v2633_v19, %v2634_v13  ;;  %v2635_v41 = vadd.f32 %v2476_v37, %v10042_v45  ;;  %v10051_v13 = vld [vmem:[#allocation7_spill] sm:$0xff]  ;;  %v10053_v45 = vld [vmem:[#allocation53_spill] sm:$0xff] }
 0x207   : > { %v2478_v21 = vpop.f32.mrf.mxu0 }
 0x208   : > { %v2636_v44 = vadd.f32 %v2478_v21, %v2162_v36  ;;  %v1145_v36 = vadd.f32 %v10052_v20, %v10051_v13  ;;  %v10062_v20 = vld [vmem:[#allocation59_spill] sm:$0xff] }
 0x209   : > { %v2482_v40 = vpop.f32.mrf.mxu0 }
 0x20a   : > { %v7878_v11 = vmax.f32 %v2635_v41, %v2636_v44  ;;  %v2637_v10 = vadd.f32 %v2482_v40, %v10046_v53  ;;  %v2168_v41 = vadd.f32 %v10053_v45, %v1694_v5  ;;  %v1696_v21 = vadd.f32 %v10054_v57, %v1145_v36  ;;  %v10056_v40 = vld [vmem:[#allocation9_spill] sm:$0xff]  ;;  %v10061_v5 = vld [vmem:[#allocation12_spill] sm:$0xff] }
 0x20b   : > { %v2484_v9 = vpop.f32.mrf.mxu0  ;;  %v10064_v57 = vld [vmem:[#allocation13_spill] sm:$0xff] }
 0x20c   : > { %v2638_v4 = vadd.f32 %v2484_v9, %v2164_v17  ;;  %v1151_v17 = vadd.f32 %v10057_v33, %v10056_v40  ;;  %v10058_v9 = vld [vmem:[#allocation57_spill] sm:$0xff]  ;;  %v10066_v40 = vld [vmem:[#allocation60_spill] sm:$0xff] }
 0x20d   : > { %v2488_v30 = vpop.f32.mrf.mxu0 }
 0x20e   : > { %v7887_v19 = vmax.f32 %v2637_v10, %v2638_v4  ;;  %v2639_v42 = vadd.f32 %v2488_v30, %v10050_v58  ;;  %v2170_v10 = vadd.f32 %v7699_v55, %v1696_v21  ;;  %v1698_v3 = vadd.f32 %v10058_v9, %v1151_v17  ;;  %v7908_v30 = vpop.f32.mrf.mxu1  ;;  %v10063_v55 = vld [vmem:[#allocation58_spill] sm:$0xff] }
 0x20f   : > { %v2490_v7 = vpop.f32.mrf.mxu0  ;;  %v10065_v21 = vld [vmem:[#allocation14_spill] sm:$0xff] }
 0x210   : > { %v2640_v37 = vadd.f32 %v2490_v7, %v2166_v15  ;;  %v10060_v15 = vld [vmem:[#allocation11_spill] sm:$0xff]  ;;  %v2172_v13 = vadd.f32 %v7709_v29, %v1698_v3  ;;  %v7917_v45 = vpop.f32.mrf.mxu1  ;;  %v10067_v17 = vld [vmem:[#allocation62_spill] sm:$0xff]  ;;  %v10068_v29 = vld [vmem:[#allocation61_spill] sm:$0xff] }
 0x211   : > { %v2494_v38 = vpop.f32.mrf.mxu0  ;;  %v1157_v58 = vadd.f32 %v10061_v5, %v10060_v15 }
 0x212   : > { %v7896_v46 = vmax.f32 %v2639_v42, %v2640_v37  ;;  %v2641_v52 = vadd.f32 %v2494_v38, %v10055_v47  ;;  %v1163_v47 = vadd.f32 %v10065_v21, %v10064_v57  ;;  %v7926_v9 = vpop.f32.mrf.mxu1  ;;  %v10074_v57 = vld [vmem:[#allocation18_spill] sm:$0xff] }
 0x213   : > { %v2496_v44 = vpop.f32.mrf.mxu0  ;;  %v1700_v36 = vadd.f32 %v10062_v20, %v1157_v58  ;;  %v10072_v20 = vld [vmem:[#allocation63_spill] sm:$0xff] }
 0x214   : > { %v2642_v23 = vadd.f32 %v2496_v44, %v2168_v41 }
 0x215   : > { %v2500_v53 = vpop.f32.mrf.mxu0  ;;  %v2174_v33 = vadd.f32 %v10066_v40, %v1700_v36  ;;  %v10075_v40 = vld [vmem:[#allocation66_spill] sm:$0xff] }
 0x216   : > { %v7905_v61 = vmax.f32 %v2641_v52, %v2642_v23  ;;  %v2643_v4 = vadd.f32 %v2500_v53, %v10059_v60  ;;  %v1702_v23 = vadd.f32 %v10067_v17, %v1163_v47  ;;  %v10069_v60 = vld [vmem:[#allocation15_spill] sm:$0xff] }
 0x217   : > { %v2502_v2 = vpop.f32.mrf.mxu0 }
 0x218   : > { %v2644_v42 = vadd.f32 %v2502_v2, %v2170_v10  ;;  %v2176_v58 = vadd.f32 %v7728_v26, %v1702_v23  ;;  %v10076_v26 = vld [vmem:[#allocation65_spill] sm:$0xff] }
 0x219   : > { %v2506_v7 = vpop.f32.mrf.mxu0 }
 0x21a   : > { %v7914_v37 = vmax.f32 %v2643_v4, %v2644_v42  ;;  %v2645_v38 = vadd.f32 %v2506_v7, %v10063_v55  ;;  %v10070_v4 = vld [vmem:[#allocation16_spill] sm:$0xff]  ;;  %v7935_v55 = vpop.f32.mrf.mxu1 }
 0x21b   : > { %v2508_v41 = vpop.f32.mrf.mxu0  ;;  %v1169_v2 = vadd.f32 %v10070_v4, %v10069_v60  ;;  %v10071_v42 = vld [vmem:[#allocation64_spill] sm:$0xff] }
 0x21c   : > { %v2646_v52 = vadd.f32 %v2508_v41, %v2172_v13  ;;  %v10073_v41 = vld [vmem:[#allocation17_spill] sm:$0xff]  ;;  %v10078_v60 = vld [vmem:[#allocation20_spill] sm:$0xff] }
 0x21d   : > { %v2512_v44 = vpop.f32.mrf.mxu0  ;;  %v1704_v7 = vadd.f32 %v10071_v42, %v1169_v2  ;;  %v1175_v21 = vadd.f32 %v10074_v57, %v10073_v41  ;;  %v10081_v41 = vld [vmem:[#allocation21_spill] sm:$0xff]  ;;  %v10082_v57 = vld [vmem:[#allocation22_spill] sm:$0xff] }
 0x21e   : > { %v7923_v53 = vmax.f32 %v2645_v38, %v2646_v52  ;;  %v2647_v10 = vadd.f32 %v2512_v44, %v10068_v29  ;;  %v7944_v29 = vpop.f32.mrf.mxu1 }
 0x21f   : > { %v2514_v3 = vpop.f32.mrf.mxu0  ;;  %v2178_v44 = vadd.f32 %v7735_v8, %v1704_v7  ;;  %v10080_v8 = vld [vmem:[#allocation67_spill] sm:$0xff] }
 0x220   : > { %v2648_v15 = vadd.f32 %v2514_v3, %v2174_v33  ;;  %v1706_v33 = vadd.f32 %v10075_v40, %v1175_v21  ;;  %v10077_v3 = vld [vmem:[#allocation19_spill] sm:$0xff]  ;;  %v1187_v21 = vadd.f32 %v10082_v57, %v10081_v41  ;;  %v10088_v41 = vld [vmem:[#allocation26_spill] sm:$0xff] }
 0x221   : > { %v2518_v5 = vpop.f32.mrf.mxu0  ;;  %v1181_v4 = vadd.f32 %v10078_v60, %v10077_v3  ;;  %v10084_v3 = vld [vmem:[#allocation23_spill] sm:$0xff]  ;;  %v10085_v60 = vld [vmem:[#allocation24_spill] sm:$0xff] }
 0x222   : > { %v7932_v13 = vmax.f32 %v2647_v10, %v2648_v15  ;;  %v2649_v36 = vadd.f32 %v2518_v5, %v10072_v20  ;;  %v2180_v5 = vadd.f32 %v7742_v16, %v1706_v33  ;;  %v10083_v16 = vld [vmem:[#allocation69_spill] sm:$0xff] }
 0x223   : > { %v2520_v38 = vpop.f32.mrf.mxu0 }
 0x224   : > { %v2650_v47 = vadd.f32 %v2520_v38, %v2176_v58  ;;  %v10079_v58 = vld [vmem:[#allocation68_spill] sm:$0xff] }
 0x225   : > { %v2524_v52 = vpop.f32.mrf.mxu0  ;;  %v1708_v42 = vadd.f32 %v10079_v58, %v1181_v4  ;;  %v1193_v4 = vadd.f32 %v10085_v60, %v10084_v3 }
 0x226   : > { %v7941_v17 = vmax.f32 %v2649_v36, %v2650_v47  ;;  %v2651_v23 = vadd.f32 %v2524_v52, %v10076_v26  ;;  %v7953_v36 = vpop.f32.mrf.mxu1 }
 0x227   : > { %v2526_v10 = vpop.f32.mrf.mxu0  ;;  %v2182_v40 = vadd.f32 %v7749_v56, %v1708_v42  ;;  %v10086_v56 = vld [vmem:[#allocation70_spill] sm:$0xff] }
 0x228   : > { %v2652_v2 = vadd.f32 %v2526_v10, %v2178_v44  ;;  %v1710_v44 = vadd.f32 %v7754_v31, %v1187_v21 }
 0x229   : > { %v2530_v15 = vpop.f32.mrf.mxu0 }
 0x22a   : > { %v7950_v20 = vmax.f32 %v2651_v23, %v2652_v2  ;;  %v2653_v7 = vadd.f32 %v2530_v15, %v10080_v8  ;;  %v7962_v23 = vpop.f32.mrf.mxu1  ;;  %v2184_v58 = vadd.f32 %v7756_v50, %v1710_v44 }
 0x22b   : > { %v2532_v38 = vpop.f32.mrf.mxu0 }
 0x22c   : > { %v2654_v47 = vadd.f32 %v2532_v38, %v2180_v5  ;;  %v1712_v5 = vadd.f32 %v7761_v0, %v1193_v4  ;;  %v7971_v42 = vpop.f32.mrf.mxu1  ;;  %v10087_v38 = vld [vmem:[#allocation25_spill] sm:$0xff] }
 0x22d   : > { %v2536_v52 = vpop.f32.mrf.mxu0  ;;  %v1199_v57 = vadd.f32 %v10088_v41, %v10087_v38 }
 0x22e   : > { %v7959_v26 = vmax.f32 %v2653_v7, %v2654_v47  ;;  %v2655_v33 = vadd.f32 %v2536_v52, %v10083_v16  ;;  %v2186_v52 = vadd.f32 %v7871_v32, %v1712_v5  ;;  %v2112_v0 = vpop.f32.mrf.mxu1 }
 0x22f   : > { %v2538_v10 = vpop.f32.mrf.mxu0 }
 0x230   : > { %v2656_v2 = vadd.f32 %v2538_v10, %v2182_v40  ;;  %v1714_v40 = vadd.f32 %v7768_v48, %v1199_v57  ;;  %v10090_v10 = vld [vmem:[#allocation28_spill] sm:$0xff]  ;;  %v2116_v48 = vpop.f32.mrf.mxu1  ;;  %v10093_v57 = vld [vmem:[#allocation71_spill] sm:$0xff] }
 0x231   : > { %v2542_v15 = vpop.f32.mrf.mxu0 }
 0x232   : > { %v7968_v8 = vmax.f32 %v2655_v33, %v2656_v2  ;;  %v2657_v31 = vadd.f32 %v2542_v15, %v10086_v56  ;;  %v10089_v33 = vld [vmem:[#allocation27_spill] sm:$0xff]  ;;  %v2187_v2 = vadd.f32 %v7881_v18, %v7766_v54  ;;  %v2188_v15 = vadd.f32 %v7890_v51, %v1714_v40  ;;  %v10091_v56 = vld [vmem:[#allocation29_spill] sm:$0xff]  ;;  %v10095_v40 = vld [vmem:[#allocation32_spill] sm:$0xff] }
 0x233   : > { %v2544_v7 = vpop.f32.mrf.mxu0  ;;  %v1205_v3 = vadd.f32 %v10090_v10, %v10089_v33 }
 0x234   : > { %v2658_v21 = vadd.f32 %v2544_v7, %v2184_v58 }
 0x235   : > { %v2548_v47 = vpop.f32.mrf.mxu0  ;;  %v1716_v32 = vadd.f32 %v7773_v24, %v1205_v3  ;;  %v2118_v24 = vpop.f32.mrf.mxu1  ;;  %v10096_v3 = vld [vmem:[#allocation72_spill] sm:$0xff] }
 0x236   : > { %v7977_v16 = vmax.f32 %v2657_v31, %v2658_v21  ;;  %v2659_v50 = vadd.f32 %v2548_v47, %v7763_v39  ;;  %v10092_v39 = vld [vmem:[#allocation30_spill] sm:$0xff]  ;;  %v2189_v21 = vadd.f32 %v7899_v12, %v10093_v57 }
 0x237   : > { %v2550_v44 = vpop.f32.mrf.mxu0  ;;  %v1211_v31 = vadd.f32 %v10092_v39, %v10091_v56  ;;  %v2190_v47 = vadd.f32 %v7908_v30, %v1716_v32  ;;  %v10098_v32 = vld [vmem:[#allocation34_spill] sm:$0xff] }
 0x238   : > { %v2660_v60 = vadd.f32 %v2550_v44, %v2186_v52  ;;  %v10094_v52 = vld [vmem:[#allocation31_spill] sm:$0xff] }
 0x239   : > { %v2554_v4 = vpop.f32.mrf.mxu0  ;;  %v1718_v54 = vadd.f32 %v7778_v63, %v1211_v31  ;;  %v2122_v63 = vpop.f32.mrf.mxu1 }
 0x23a   : > { %v7986_v58 = vmax.f32 %v2659_v50, %v2660_v60  ;;  %v2661_v7 = vadd.f32 %v2554_v4, %v2187_v2  ;;  %v1217_v50 = vadd.f32 %v10095_v40, %v10094_v52  ;;  %v2191_v60 = vadd.f32 %v7917_v45, %v10096_v3  ;;  %v10103_v3 = vld [vmem:[#allocation37_spill] sm:$0xff] }
 0x23b   : > { %v2556_v5 = vpop.f32.mrf.mxu0  ;;  %v2192_v4 = vadd.f32 %v7926_v9, %v1718_v54 }
 0x23c   : > { %v2662_v38 = vadd.f32 %v2556_v5, %v2188_v15  ;;  %v1720_v12 = vadd.f32 %v7783_v27, %v1217_v50  ;;  %v10097_v15 = vld [vmem:[#allocation33_spill] sm:$0xff]  ;;  %v2124_v27 = vpop.f32.mrf.mxu1  ;;  %v10102_v50 = vld [vmem:[#allocation74_spill] sm:$0xff] }
 0x23d   : > { %v2560_v41 = vpop.f32.mrf.mxu0  ;;  %v1223_v5 = vadd.f32 %v10098_v32, %v10097_v15  ;;  %v10105_v32 = vld [vmem:[#allocation75_spill] sm:$0xff] }
 0x23e   : > { %v7994_v18 = vmax.f32 %v2661_v7, %v2662_v38  ;;  %v2663_v44 = vadd.f32 %v2560_v41, %v2189_v21  ;;  %v10099_v7 = vld [vmem:[#allocation73_spill] sm:$0xff]  ;;  %v2194_v41 = vadd.f32 %v7944_v29, %v1720_v12  ;;  %v10100_v21 = vld [vmem:[#allocation35_spill] sm:$0xff] }
 0x23f   : > { %v2562_v51 = vpop.f32.mrf.mxu0  ;;  %v2193_v38 = vadd.f32 %v7935_v55, %v10099_v7  ;;  %v1722_v45 = vadd.f32 %v7788_v6, %v1223_v5  ;;  %v2128_v6 = vpop.f32.mrf.mxu1  ;;  %v2197_v5 = vadd.f32 %v7971_v42, %v10105_v32  ;;  %v10107_v7 = vld [vmem:[#allocation40_spill] sm:$0xff] }
 0x240   : > { %v2664_v33 = vadd.f32 %v2562_v51, %v2190_v47  ;;  %v10101_v47 = vld [vmem:[#allocation36_spill] sm:$0xff] }
 0x241   : > { %v2566_v10 = vpop.f32.mrf.mxu0  ;;  %v1229_v54 = vadd.f32 %v10101_v47, %v10100_v21  ;;  %v10108_v21 = vld [vmem:[#allocation76_spill] sm:$0xff] }
 0x242   : > { %v8002_v30 = vmax.f32 %v2663_v44, %v2664_v33  ;;  %v2665_v56 = vadd.f32 %v2566_v10, %v2191_v60  ;;  %v2195_v44 = vadd.f32 %v7953_v36, %v10102_v50  ;;  %v2196_v33 = vadd.f32 %v7962_v23, %v1722_v45  ;;  %v10104_v60 = vld [vmem:[#allocation38_spill] sm:$0xff]  ;;  %v2130_v23 = vpop.f32.mrf.mxu1 }
 0x243   : > { %v2568_v2 = vpop.f32.mrf.mxu0  ;;  %v1724_v55 = vadd.f32 %v7793_v35, %v1229_v54  ;;  %v2199_v47 = vadd.f32 %v2116_v48, %v10108_v21  ;;  %v10118_v21 = vld [vmem:[#allocation46_spill] sm:$0xff] }
 0x244   : > { %v2666_v39 = vadd.f32 %v2568_v2, %v2192_v4  ;;  %v1235_v4 = vadd.f32 %v10104_v60, %v10103_v3  ;;  %v2134_v42 = vpop.f32.mrf.mxu1 }
 0x245   : > { %v2572_v31 = vpop.f32.mrf.mxu0 }
 0x246   : > { %v8010_v9 = vmax.f32 %v2665_v56, %v2666_v39  ;;  %v2667_v51 = vadd.f32 %v2572_v31, %v2193_v38  ;;  %v2198_v56 = vadd.f32 %v2112_v0, %v1724_v55  ;;  %v1726_v36 = vadd.f32 %v7798_v1, %v1235_v4  ;;  %v10106_v31 = vld [vmem:[#allocation39_spill] sm:$0xff]  ;;  %v10109_v1 = vld [vmem:[#allocation41_spill] sm:$0xff]  ;;  %v2136_v48 = vpop.f32.mrf.mxu1 }
 0x247   : > { %v2574_v57 = vpop.f32.mrf.mxu0  ;;  %v1241_v38 = vadd.f32 %v10107_v7, %v10106_v31  ;;  %v10112_v4 = vld [vmem:[#allocation79_spill] sm:$0xff] }
 0x248   : > { %v2668_v52 = vadd.f32 %v2574_v57, %v2194_v41  ;;  %v2200_v54 = vadd.f32 %v2118_v24, %v1726_v36 }
 0x249   : > { %v2578_v40 = vpop.f32.mrf.mxu0 }
 0x24a   : > { %v8018_v29 = vmax.f32 %v2667_v51, %v2668_v52  ;;  %v2669_v12 = vadd.f32 %v2578_v40, %v2195_v44  ;;  %v1728_v51 = vadd.f32 %v7803_v49, %v1241_v38  ;;  %v10110_v40 = vld [vmem:[#allocation42_spill] sm:$0xff]  ;;  %v10113_v49 = vld [vmem:[#allocation43_spill] sm:$0xff]  ;;  %v10116_v38 = vld [vmem:[#allocation81_spill] sm:$0xff] }
 0x24b   : > { %v2580_v10 = vpop.f32.mrf.mxu0  ;;  %v1247_v50 = vadd.f32 %v10110_v40, %v10109_v1  ;;  %v10119_v1 = vld [vmem:[#allocation80_spill] sm:$0xff] }
 0x24c   : > { %v2670_v2 = vadd.f32 %v2580_v10, %v2196_v33  ;;  %v10111_v10 = vld [vmem:[#allocation77_spill] sm:$0xff]  ;;  %v2202_v60 = vadd.f32 %v2124_v27, %v1728_v51  ;;  %v2205_v40 = vadd.f32 %v2134_v42, %v10119_v1  ;;  %v2715_v42 = vld [vmem:[%s9943_s2] sm:$0xff] }
 0x24d   : > { %v2584_v15 = vpop.f32.mrf.mxu0  ;;  %v2201_v3 = vadd.f32 %v2122_v63, %v10111_v10  ;;  %v2140_v63 = vpop.f32.mrf.mxu1  ;;  %v5600_v1 = vld [vmem:[%s9943_s2 + $0x178] sm:$0xff] }
 0x24e   : > { %v8025_v39 = vmax.f32 %v2669_v12, %v2670_v2  ;;  %v2671_v41 = vadd.f32 %v2584_v15, %v2197_v5  ;;  %v1730_v12 = vadd.f32 %v10112_v4, %v1247_v50  ;;  %v10114_v15 = vld [vmem:[#allocation44_spill] sm:$0xff]  ;;  %v10121_v4 = vld [vmem:[#allocation82_spill] sm:$0xff] }
 0x24f   : > { %v2586_v35 = vpop.f32.mrf.mxu0  ;;  %v1253_v32 = vadd.f32 %v10114_v15, %v10113_v49 }
 0x250   : > { %v2672_v45 = vadd.f32 %v2586_v35, %v2198_v56  ;;  %v10115_v35 = vld [vmem:[#allocation78_spill] sm:$0xff]  ;;  %v2204_v7 = vadd.f32 %v2130_v23, %v1730_v12  ;;  %v2207_v12 = vadd.f32 %v2140_v63, %v10121_v4  ;;  %v5592_v63 = vld [vmem:[%s9943_s2 + $0x138] sm:$0xff] }
 0x251   : > { %v2590_v57 = vpop.f32.mrf.mxu0  ;;  %v2203_v31 = vadd.f32 %v2128_v6, %v10115_v35  ;;  %v2142_v6 = vpop.f32.mrf.mxu1  ;;  %v2720_v35 = vld [vmem:[%s9943_s2 + $0x28] sm:$0xff]  ;;  %v3208_v4 = vld [vmem:[%s9945_s4 + $0xe0] sm:$0xff] }
 0x252   : > { %v8031_v52 = vmax.f32 %v2671_v41, %v2672_v45  ;;  %v2673_v44 = vadd.f32 %v2590_v57, %v2199_v47  ;;  %v1732_v41 = vadd.f32 %v10116_v38, %v1253_v32  ;;  %v10117_v57 = vld [vmem:[#allocation45_spill] sm:$0xff]  ;;  %v5587_v38 = vld [vmem:[%s9943_s2 + $0x110] sm:$0xff] }
 0x253   : > { %v2592_v0 = vpop.f32.mrf.mxu0  ;;  %v1259_v47 = vadd.f32 %v10118_v21, %v10117_v57  ;;  %v5594_v57 = vld [vmem:[%s9943_s2 + $0x148] sm:$0xff]  ;;  %v5593_v21 = vld [vmem:[%s9943_s2 + $0x140] sm:$0xff] }
 0x254   : > { %v2674_v33 = vadd.f32 %v2592_v0, %v2200_v54  ;;  %v2206_v50 = vadd.f32 %v2136_v48, %v1732_v41  ;;  %v2718_v48 = vld [vmem:[%s9943_s2 + $0x18] sm:$0xff]  ;;  %v5590_v41 = vld [vmem:[%s9943_s2 + $0x128] sm:$0xff] }
 0x255   : > { %v2596_v55 = vpop.f32.mrf.mxu0 }
 0x256   : > { %v8037_v2 = vmax.f32 %v2673_v44, %v2674_v33  ;;  %v2675_v5 = vadd.f32 %v2596_v55, %v2201_v3  ;;  %v10120_v44 = vld [vmem:[#allocation83_spill] sm:$0xff] }
 0x257   : > { %v2598_v24 = vpop.f32.mrf.mxu0  ;;  %v1734_v33 = vadd.f32 %v10120_v44, %v1259_v47  ;;  %v5596_v47 = vld [vmem:[%s9943_s2 + $0x158] sm:$0xff]  ;;  %v5601_v44 = vld [vmem:[%s9943_s2 + $0x180] sm:$0xff] }
 0x258   : > { %v2676_v56 = vadd.f32 %v2598_v24, %v2202_v60 }
 0x259   : > { %v2602_v36 = vpop.f32.mrf.mxu0  ;;  %v2208_v24 = vadd.f32 %v2142_v6, %v1734_v33  ;;  %v5604_v33 = vld [vmem:[%s9943_s2 + $0x198] sm:$0xff]  ;;  %v5606_v6 = vld [vmem:[%s9943_s2 + $0x1a8] sm:$0xff] }
 0x25a   : > { %v8043_v45 = vmax.f32 %v2675_v5, %v2676_v56  ;;  %v2677_v54 = vadd.f32 %v2602_v36, %v2203_v31  ;;  %v2717_v36 = vld [vmem:[%s9943_s2 + $0x10] sm:$0xff]  ;;  %v2722_v31 = vld [vmem:[%s9943_s2 + $0x38] sm:$0xff] }
 0x25b   : > { %v2604_v27 = vpop.f32.mrf.mxu0 }
 0x25c   : > { %v2678_v51 = vadd.f32 %v2604_v27, %v2204_v7  ;;  %v5588_v7 = vld [vmem:[%s9943_s2 + $0x118] sm:$0xff]  ;;  %v5591_v27 = vld [vmem:[%s9943_s2 + $0x130] sm:$0xff] }
 0x25d   : > { %v2608_v0 = vpop.f32.mrf.mxu0 }
 0x25e   : > { %v2712_v55 = vmax.f32 %v2677_v54, %v2678_v51  ;;  %v2679_v10 = vadd.f32 %v2608_v0, %v2205_v40  ;;  %v5595_v54 = vld [vmem:[%s9943_s2 + $0x150] sm:$0xff]  ;;  %v5598_v51 = vld [vmem:[%s9943_s2 + $0x168] sm:$0xff]  ;;  %v5597_v0 = vld [vmem:[%s9943_s2 + $0x160] sm:$0xff] }
 0x25f   : > { %v2610_v23 = vpop.f32.mrf.mxu0  ;;  %v5599_v40 = vld [vmem:[%s9943_s2 + $0x170] sm:$0xff] }
 0x260   : > { %v2680_v3 = vadd.f32 %v2610_v23, %v2206_v50  ;;  %v5602_v50 = vld [vmem:[%s9943_s2 + $0x188] sm:$0xff]  ;;  %v3211_v23 = vld [vmem:[%s9945_s4 + $0xf8] sm:$0xff] }
 0x261   : > { %v2614_v60 = vpop.f32.mrf.mxu0  ;;  %3450 = vmatprep.subr.mxu0 %v3211_v23  ;;  %v5628_v23 = vld [vmem:[%s9945_s4 + $0x118] sm:$0xff] }
 0x262   : > { %v2713_v49 = vmax.f32 %v2679_v10, %v2680_v3  ;;  %v2681_v32 = vadd.f32 %v2614_v60, %v2207_v12  ;;  %v3210_v10 = vld [vmem:[%s9945_s4 + $0xf0] sm:$0xff]  ;;  %v3209_v3 = vld [vmem:[%s9945_s4 + $0xe8] sm:$0xff]  ;;  %v5605_v60 = vld [vmem:[%s9943_s2 + $0x1a0] sm:$0xff] }
 0x263   : > { %v2616_v15 = vpop.f32.mrf.mxu0  ;;  %3451 = vmatpush1.msra.mxu0 %v3210_v10  ;;  %v5608_v12 = vld [vmem:[%s9943_s2 + $0x1b8] sm:$0xff]  ;;  %v5627_v10 = vld [vmem:[%s9945_s4 + $0x110] sm:$0xff] }
 0x264   : > { %v2682_v5 = vadd.f32 %v2616_v15, %v2208_v24  ;;  %3452 = vmatprep.subr.mxu0 %v3209_v3  ;;  %v3207_v24 = vld [vmem:[%s9945_s4 + $0xd8] sm:$0xff]  ;;  %v3205_v15 = vld [vmem:[%s9945_s4 + $0xc8] sm:$0xff] }
 0x265   : > { %3453 = vmatpush1.msra.mxu0 %v3208_v4  ;;  %v5626_v3 = vld [vmem:[%s9945_s4 + $0x108] sm:$0xff]  ;;  %v5720_v4 = vld [vmem:[%s9945_s4 + $0x3f8] sm:$0xff] }
 0x266   : > { %v2714_v56 = vmax.f32 %v2681_v32, %v2682_v5  ;;  %3454 = vmatprep.subr.mxu0 %v3207_v24  ;;  %v5607_v32 = vld [vmem:[%s9943_s2 + $0x1b0] sm:$0xff]  ;;  %v5656_v5 = vld [vmem:[%s9945_s4 + $0x1f8] sm:$0xff] }
 0x268   : > { %5840 = vmatprep.subr.msk.mxu1 %vm2786_vm2, %v2714_v56 }
 0x269   : > { %5841 = vmatpush3.msra.mxu1 %v7941_v17 }
 0x26a   : > { %5842 = vmatprep.subr.mxu1 %v2713_v49 }
 0x26b   : > { %5843 = vmatpush3.msra.mxu1 %v7932_v13 }
 0x26c   : > { %5844 = vmatprep.subr.mxu1 %v2712_v55 }
 0x26d   : > { %5845 = vmatpush3.msra.mxu1 %v7923_v53 }
 0x26e   : > { %5846 = vmatprep.subr.mxu1 %v8043_v45 }
 0x26f   : > { %5847 = vmatpush3.msra.mxu1 %v7914_v37 }
 0x270   : > { %5848 = vmatprep.subr.mxu1 %v8037_v2 }
 0x271   : > { %5849 = vmatpush3.msra.mxu1 %v7905_v61 }
 0x272   : > { %5850 = vmatprep.subr.mxu1 %v8031_v52 }
 0x273   : > { %5851 = vmatpush3.msra.mxu1 %v7896_v46 }
 0x274   : > { %5852 = vmatprep.subr.mxu1 %v8025_v39 }
 0x275   : > { %5853 = vmatpush3.msra.mxu1 %v7887_v19 }
 0x276   : > { %5854 = vmatprep.subr.mxu1 %v8018_v29 }
 0x277   : > { %5855 = vmatpush3.msra.mxu1 %v7878_v11 }
 0x278   : > { %5856 = vmatprep.subr.mxu1 %v8010_v9 }
 0x279   : > { %5857 = vmatpush3.msra.mxu1 %v7865_v62 }
 0x27a   : > { %5858 = vmatprep.subr.mxu1 %v8002_v30 }
 0x27b   : > { %5859 = vmatpush3.msra.mxu1 %v7858_v43 }
 0x27c   : > { %5860 = vmatprep.subr.mxu1 %v7994_v18 }
 0x27d   : > { %5861 = vmatpush3.msra.mxu1 %v7850_v28 }
 0x27e   : > { %5862 = vmatprep.subr.mxu1 %v7986_v58 }
 0x27f   : > { %5863 = vmatpush3.msra.mxu1 %v7845_v59 }
 0x280   : > { %5864 = vmatprep.subr.mxu1 %v7977_v16 }
 0x281   : > { %5865 = vmatpush3.msra.mxu1 %v7840_v14 }
 0x282   : > { %5866 = vmatprep.subr.mxu1 %v7968_v8 }
 0x283   : > { %5867 = vmatpush3.msra.mxu1 %v7835_v22 }
 0x284   : > { %5868 = vmatprep.subr.mxu1 %v7959_v26 }
 0x285   : > { %5869 = vmatpush3.msra.mxu1 %v7830_v25 }
 0x286   : > { %5870 = vmatprep.subr.mxu1 %v7950_v20 }
 0x287   : > { %5871 = vmatpush3.msra.mxu1 %v7825_v34 }
 0x288   : > { %2855 = vmatmul.mubr.f32.vlgmr.msra.gmra.mxu1 %v2715_v42  ;;  %5914 = vmatprep.subr.msk.mxu1 %vm2786_vm2, %v2714_v56  ;;  %v3204_v56 = vld [vmem:[%s9945_s4 + $0xc0] sm:$0xff]  ;;  %v5655_v42 = vld [vmem:[%s9945_s4 + $0x1f0] sm:$0xff] }
 0x289   : > { %5915 = vmatpush3.msra.mxu1 %v7941_v17  ;;  %5568 = vmatprep.mubr.msk.f32.mxu1 %vm2743_vm1, %v2718_v48  ;;  %v2719_v17 = vld [vmem:[%s9943_s2 + $0x20] sm:$0xff]  ;;  %v3203_v48 = vld [vmem:[%s9945_s4 + $0xb8] sm:$0xff] }
 0x28a   : > { %5916 = vmatprep.subr.mxu1 %v2713_v49  ;;  %v3206_v49 = vld [vmem:[%s9945_s4 + $0xd0] sm:$0xff] }
 0x28b   : > { %5917 = vmatpush3.msra.mxu1 %v7932_v13  ;;  %v2724_v13 = vld [vmem:[%s9943_s2 + $0x48] sm:$0xff]  ;;  %3455 = vmatpush1.msra.mxu0 %v3206_v49 }
 0x28c   : > { %2860 = vmatmul.mubr.f32.gmra.mxu1 %v2717_v36  ;;  %5918 = vmatprep.subr.mxu1 %v2712_v55  ;;  %v5603_v55 = vld [vmem:[%s9943_s2 + $0x190] sm:$0xff]  ;;  %v5654_v36 = vld [vmem:[%s9945_s4 + $0x1e8] sm:$0xff] }
 0x28d   : > { %5919 = vmatpush3.msra.mxu1 %v7923_v53  ;;  %5569 = vmatprep.mubr.msk.f32.mxu1 %vm2743_vm1, %v2720_v35  ;;  %v2721_v53 = vld [vmem:[%s9943_s2 + $0x30] sm:$0xff] }
 0x28e   : > { %5920 = vmatprep.subr.mxu1 %v8043_v45  ;;  %v5589_v45 = vld [vmem:[%s9943_s2 + $0x120] sm:$0xff]  ;;  %3456 = vmatprep.subr.mxu0 %v3205_v15  ;;  %v3202_v35 = vld [vmem:[%s9945_s4 + $0xb0] sm:$0xff] }
 0x28f   : > { %5921 = vmatpush3.msra.mxu1 %v7914_v37  ;;  %v2726_v37 = vld [vmem:[%s9943_s2 + $0x58] sm:$0xff]  ;;  %3457 = vmatpush1.msra.mxu0 %v3204_v56 }
 0x290   : > { %2865 = vmatmul.mubr.f32.gmra.mxu1 %v2719_v17  ;;  %5922 = vmatprep.subr.mxu1 %v8037_v2  ;;  %v5585_v2 = vld [vmem:[%s9943_s2 + $0x100] sm:$0xff] }
 0x291   : > { %5923 = vmatpush3.msra.mxu1 %v7905_v61  ;;  %5570 = vmatprep.mubr.msk.f32.mxu1 %vm2743_vm1, %v2722_v31  ;;  %v2723_v61 = vld [vmem:[%s9943_s2 + $0x40] sm:$0xff]  ;;  %v3201_v31 = vld [vmem:[%s9945_s4 + $0xa8] sm:$0xff] }
 0x292   : > { %5924 = vmatprep.subr.mxu1 %v8031_v52  ;;  %v5586_v52 = vld [vmem:[%s9943_s2 + $0x108] sm:$0xff]  ;;  %3458 = vmatprep.subr.mxu0 %v3203_v48  ;;  %v5653_v17 = vld [vmem:[%s9945_s4 + $0x1e0] sm:$0xff] }
 0x293   : > { %5925 = vmatpush3.msra.mxu1 %v7896_v46  ;;  %v2728_v46 = vld [vmem:[%s9943_s2 + $0x68] sm:$0xff]  ;;  %3459 = vmatpush1.msra.mxu0 %v3202_v35 }
 0x294   : > { %2870 = vmatmul.mubr.f32.gmra.mxu1 %v2721_v53  ;;  %5926 = vmatprep.subr.mxu1 %v8025_v39  ;;  %v5583_v39 = vld [vmem:[%s9943_s2 + $0xf0] sm:$0xff]  ;;  %v5652_v53 = vld [vmem:[%s9945_s4 + $0x1d8] sm:$0xff] }
 0x295   : > { %5927 = vmatpush3.msra.mxu1 %v7887_v19  ;;  %5571 = vmatprep.mubr.msk.f32.mxu1 %vm2743_vm1, %v2724_v13  ;;  %v2725_v19 = vld [vmem:[%s9943_s2 + $0x50] sm:$0xff]  ;;  %v3200_v13 = vld [vmem:[%s9945_s4 + $0xa0] sm:$0xff] }
 0x296   : > { %5928 = vmatprep.subr.mxu1 %v8018_v29  ;;  %v5584_v29 = vld [vmem:[%s9943_s2 + $0xf8] sm:$0xff]  ;;  %3460 = vmatprep.subr.mxu0 %v3201_v31 }
 0x297   : > { %5929 = vmatpush3.msra.mxu1 %v7878_v11  ;;  %v2730_v11 = vld [vmem:[%s9943_s2 + $0x78] sm:$0xff]  ;;  %3461 = vmatpush1.msra.mxu0 %v3200_v13 }
 0x298   : > { %2875 = vmatmul.mubr.f32.gmra.mxu1 %v2723_v61  ;;  %5930 = vmatprep.subr.mxu1 %v8010_v9  ;;  %v5581_v9 = vld [vmem:[%s9943_s2 + $0xe0] sm:$0xff]  ;;  %v5651_v61 = vld [vmem:[%s9945_s4 + $0x1d0] sm:$0xff] }
 0x299   : > { %5931 = vmatpush3.msra.mxu1 %v7865_v62  ;;  %5572 = vmatprep.mubr.msk.f32.mxu1 %vm2743_vm1, %v2726_v37  ;;  %v2727_v62 = vld [vmem:[%s9943_s2 + $0x60] sm:$0xff]  ;;  %v3199_v37 = vld [vmem:[%s9945_s4 + $0x98] sm:$0xff] }
 0x29a   : > { %5932 = vmatprep.subr.mxu1 %v8002_v30  ;;  %v5582_v30 = vld [vmem:[%s9943_s2 + $0xe8] sm:$0xff]  ;;  %3462 = vmatprep.subr.mxu0 %v3199_v37 }
 0x29b   : > { %5933 = vmatpush3.msra.mxu1 %v7858_v43  ;;  %v2732_v43 = vld [vmem:[%s9943_s2 + $0x88] sm:$0xff] }
 0x29c   : > { %2880 = vmatmul.mubr.f32.gmra.mxu1 %v2725_v19  ;;  %5934 = vmatprep.subr.mxu1 %v7994_v18  ;;  %v2741_v18 = vld [vmem:[%s9943_s2 + $0xd0] sm:$0xff]  ;;  %v5650_v19 = vld [vmem:[%s9945_s4 + $0x1c8] sm:$0xff] }
 0x29d   : > { %5935 = vmatpush3.msra.mxu1 %v7850_v28  ;;  %5573 = vmatprep.mubr.msk.f32.mxu1 %vm2743_vm1, %v2728_v46  ;;  %v2729_v28 = vld [vmem:[%s9943_s2 + $0x70] sm:$0xff] }
 0x29e   : > { %5936 = vmatprep.subr.mxu1 %v7986_v58  ;;  %v2742_v58 = vld [vmem:[%s9943_s2 + $0xd8] sm:$0xff]  ;;  %v3198_v46 = vld [vmem:[%s9945_s4 + $0x90] sm:$0xff] }
 0x29f   : > { %5937 = vmatpush3.msra.mxu1 %v7845_v59  ;;  %v2734_v59 = vld [vmem:[%s9943_s2 + $0x98] sm:$0xff]  ;;  %3463 = vmatpush1.msra.mxu0 %v3198_v46 }
 0x2a0   : > { %2885 = vmatmul.mubr.f32.gmra.mxu1 %v2727_v62  ;;  %5938 = vmatprep.subr.mxu1 %v7977_v16  ;;  %v2739_v16 = vld [vmem:[%s9943_s2 + $0xc0] sm:$0xff] }
 0x2a1   : > { %5939 = vmatpush3.msra.mxu1 %v7840_v14  ;;  %5574 = vmatprep.mubr.msk.f32.mxu1 %vm2743_vm1, %v2730_v11  ;;  %v2731_v14 = vld [vmem:[%s9943_s2 + $0x80] sm:$0xff]  ;;  %v3197_v11 = vld [vmem:[%s9945_s4 + $0x88] sm:$0xff] }
 0x2a2   : > { %5940 = vmatprep.subr.mxu1 %v7968_v8  ;;  %v2740_v8 = vld [vmem:[%s9943_s2 + $0xc8] sm:$0xff]  ;;  %v5649_v62 = vld [vmem:[%s9945_s4 + $0x1c0] sm:$0xff]  ;;  %3464 = vmatprep.subr.mxu0 %v3197_v11 }
 0x2a3   : > { %5941 = vmatpush3.msra.mxu1 %v7835_v22  ;;  %v2736_v22 = vld [vmem:[%s9943_s2 + $0xa8] sm:$0xff] }
 0x2a4   : > { %2890 = vmatmul.mubr.f32.gmra.mxu1 %v2729_v28  ;;  %5942 = vmatprep.subr.mxu1 %v7959_v26  ;;  %v2737_v26 = vld [vmem:[%s9943_s2 + $0xb0] sm:$0xff]  ;;  %v5648_v28 = vld [vmem:[%s9945_s4 + $0x1b8] sm:$0xff] }
 0x2a5   : > { %5943 = vmatpush3.msra.mxu1 %v7830_v25  ;;  %5575 = vmatprep.mubr.msk.f32.mxu1 %vm2743_vm1, %v2732_v43  ;;  %v2733_v25 = vld [vmem:[%s9943_s2 + $0x90] sm:$0xff]  ;;  %v3196_v43 = vld [vmem:[%s9945_s4 + $0x80] sm:$0xff] }
 0x2a6   : > { %5944 = vmatprep.subr.mxu1 %v7950_v20  ;;  %v2735_v20 = vld [vmem:[%s9943_s2 + $0xa0] sm:$0xff]  ;;  %3465 = vmatpush1.msra.mxu0 %v3196_v43 }
 0x2a7   : > { %5945 = vmatpush3.msra.mxu1 %v7825_v34  ;;  %v2738_v34 = vld [vmem:[%s9943_s2 + $0xb8] sm:$0xff] }
 0x2a8   : > { %2895 = vmatmul.mubr.f32.gmra.mxu1 %v2731_v14  ;;  %3301 = vmatprep.subr.mxu1 %v5656_v5  ;;  %v5647_v14 = vld [vmem:[%s9945_s4 + $0x1b0] sm:$0xff] }
 0x2a9   : > { %5576 = vmatprep.mubr.msk.f32.mxu1 %vm2743_vm1, %v2734_v59  ;;  %v3195_v59 = vld [vmem:[%s9945_s4 + $0x78] sm:$0xff] }
 0x2aa   : > { %3466 = vmatprep.subr.mxu0 %v3195_v59 }
 0x2ac   : > { %2900 = vmatmul.mubr.f32.gmra.mxu1 %v2733_v25  ;;  %v5646_v25 = vld [vmem:[%s9945_s4 + $0x1a8] sm:$0xff] }
 0x2ad   : > { %5577 = vmatprep.mubr.msk.f32.mxu1 %vm2743_vm1, %v2736_v22  ;;  %v3194_v22 = vld [vmem:[%s9945_s4 + $0x70] sm:$0xff] }
 0x2ae   : > { %3467 = vmatpush1.msra.mxu0 %v3194_v22 }
 0x2b0   : > { %2905 = vmatmul.mubr.f32.gmra.mxu1 %v2735_v20  ;;  %v5645_v20 = vld [vmem:[%s9945_s4 + $0x1a0] sm:$0xff] }
 0x2b1   : > { %5578 = vmatprep.mubr.msk.f32.mxu1 %vm2743_vm1, %v2738_v34  ;;  %v3193_v34 = vld [vmem:[%s9945_s4 + $0x68] sm:$0xff] }
 0x2b2   : > { %3468 = vmatprep.subr.mxu0 %v3193_v34 }
 0x2b4   : > { %2910 = vmatmul.mubr.f32.gmra.mxu1 %v2737_v26  ;;  %v5644_v26 = vld [vmem:[%s9945_s4 + $0x198] sm:$0xff] }
 0x2b5   : > { %5579 = vmatprep.mubr.msk.f32.mxu1 %vm2743_vm1, %v2740_v8  ;;  %v3192_v8 = vld [vmem:[%s9945_s4 + $0x60] sm:$0xff] }
 0x2b6   : > { %3469 = vmatpush1.msra.mxu0 %v3192_v8 }
 0x2b8   : > { %2915 = vmatmul.mubr.f32.gmra.mxu1 %v2739_v16  ;;  %v5643_v16 = vld [vmem:[%s9945_s4 + $0x190] sm:$0xff] }
 0x2b9   : > { %5580 = vmatprep.mubr.msk.f32.mxu1 %vm2743_vm1, %v2742_v58  ;;  %v3191_v58 = vld [vmem:[%s9945_s4 + $0x58] sm:$0xff] }
 0x2ba   : > { %3470 = vmatprep.subr.mxu0 %v3191_v58 }
 0x2bc   : > { %2920 = vmatmul.mubr.f32.gmra.mxu1 %v2741_v18  ;;  %v5642_v18 = vld [vmem:[%s9945_s4 + $0x188] sm:$0xff] }
 0x2bd   : > { %5610 = vmatprep.mubr.msk.f32.mxu1 %vm2743_vm1, %v5582_v30  ;;  %v3190_v30 = vld [vmem:[%s9945_s4 + $0x50] sm:$0xff] }
 0x2be   : > { %3471 = vmatpush1.msra.mxu0 %v3190_v30 }
 0x2c0   : > { %3061 = vmatmul.mubr.f32.vlgmr.msra.gmra.mxu1 %v5581_v9  ;;  %v5641_v9 = vld [vmem:[%s9945_s4 + $0x180] sm:$0xff] }
 0x2c1   : > { %5611 = vmatprep.mubr.msk.f32.mxu1 %vm2743_vm1, %v5584_v29  ;;  %3302 = vmatpush1.msra.mxu1 %v5655_v42  ;;  %v3189_v29 = vld [vmem:[%s9945_s4 + $0x48] sm:$0xff] }
 0x2c2   : > { %3303 = vmatprep.subr.mxu1 %v5654_v36  ;;  %3472 = vmatprep.subr.mxu0 %v3189_v29 }
 0x2c3   : > { %3304 = vmatpush1.msra.mxu1 %v5653_v17 }
 0x2c4   : > { %3066 = vmatmul.mubr.f32.gmra.mxu1 %v5583_v39  ;;  %3305 = vmatprep.subr.mxu1 %v5652_v53  ;;  %v5640_v39 = vld [vmem:[%s9945_s4 + $0x178] sm:$0xff] }
 0x2c5   : > { %5612 = vmatprep.mubr.msk.f32.mxu1 %vm2743_vm1, %v5586_v52  ;;  %3306 = vmatpush1.msra.mxu1 %v5651_v61  ;;  %v3188_v52 = vld [vmem:[%s9945_s4 + $0x40] sm:$0xff] }
 0x2c6   : > { %3307 = vmatprep.subr.mxu1 %v5650_v19  ;;  %3473 = vmatpush1.msra.mxu0 %v3188_v52 }
 0x2c7   : > { %3308 = vmatpush1.msra.mxu1 %v5649_v62 }
 0x2c8   : > { %3071 = vmatmul.mubr.f32.gmra.mxu1 %v5585_v2  ;;  %3309 = vmatprep.subr.mxu1 %v5648_v28  ;;  %v5639_v2 = vld [vmem:[%s9945_s4 + $0x170] sm:$0xff] }
 0x2c9   : > { %5613 = vmatprep.mubr.msk.f32.mxu1 %vm2743_vm1, %v5588_v7  ;;  %3310 = vmatpush1.msra.mxu1 %v5647_v14  ;;  %v3187_v7 = vld [vmem:[%s9945_s4 + $0x38] sm:$0xff] }
 0x2ca   : > { %3311 = vmatprep.subr.mxu1 %v5646_v25  ;;  %3474 = vmatprep.subr.mxu0 %v3187_v7 }
 0x2cb   : > { %3312 = vmatpush1.msra.mxu1 %v5645_v20 }
 0x2cc   : > { %3076 = vmatmul.mubr.f32.gmra.mxu1 %v5587_v38  ;;  %3313 = vmatprep.subr.mxu1 %v5644_v26  ;;  %v5638_v38 = vld [vmem:[%s9945_s4 + $0x168] sm:$0xff] }
 0x2cd   : > { %5614 = vmatprep.mubr.msk.f32.mxu1 %vm2743_vm1, %v5590_v41  ;;  %3314 = vmatpush1.msra.mxu1 %v5643_v16  ;;  %v3186_v41 = vld [vmem:[%s9945_s4 + $0x30] sm:$0xff] }
 0x2ce   : > { %3315 = vmatprep.subr.mxu1 %v5642_v18  ;;  %3475 = vmatpush1.msra.mxu0 %v3186_v41  ;;  %v8544_v18 = vld [vmem:[%s9944_s3] ss:$0 sm:$0xff] }
 0x2cf   : > { %3316 = vmatpush1.msra.mxu1 %v5641_v9 }
 0x2d0   : > { %3081 = vmatmul.mubr.f32.gmra.mxu1 %v5589_v45  ;;  %3317 = vmatprep.subr.mxu1 %v5640_v39  ;;  %v5637_v45 = vld [vmem:[%s9945_s4 + $0x160] sm:$0xff] }
 0x2d1   : > { %5615 = vmatprep.mubr.msk.f32.mxu1 %vm2743_vm1, %v5592_v63  ;;  %3318 = vmatpush1.msra.mxu1 %v5639_v2  ;;  %v3185_v63 = vld [vmem:[%s9945_s4 + $0x28] sm:$0xff] }
 0x2d2   : > { %3319 = vmatprep.subr.mxu1 %v5638_v38  ;;  %3476 = vmatprep.subr.mxu0 %v3185_v63 }
 0x2d3   : > { %3320 = vmatpush1.msra.mxu1 %v5637_v45  ;;  %v5719_v45 = vld [vmem:[%s9945_s4 + $0x3f0] sm:$0xff] }
 0x2d4   : > { %3086 = vmatmul.mubr.f32.gmra.mxu1 %v5591_v27  ;;  %v5636_v27 = vld [vmem:[%s9945_s4 + $0x158] sm:$0xff] }
 0x2d5   : > { %5616 = vmatprep.mubr.msk.f32.mxu1 %vm2743_vm1, %v5594_v57  ;;  %v3184_v57 = vld [vmem:[%s9945_s4 + $0x20] sm:$0xff]  ;;  %3321 = vmatprep.subr.mxu1 %v5636_v27  ;;  %v5718_v27 = vld [vmem:[%s9945_s4 + $0x3e8] sm:$0xff] }
 0x2d6   : > { %3477 = vmatpush1.msra.mxu0 %v3184_v57 }
 0x2d8   : > { %3091 = vmatmul.mubr.f32.gmra.mxu1 %v5593_v21  ;;  %v5635_v21 = vld [vmem:[%s9945_s4 + $0x150] sm:$0xff] }
 0x2d9   : > { %5617 = vmatprep.mubr.msk.f32.mxu1 %vm2743_vm1, %v5596_v47  ;;  %v3183_v47 = vld [vmem:[%s9945_s4 + $0x18] sm:$0xff]  ;;  %3322 = vmatpush1.msra.mxu1 %v5635_v21 }
 0x2da   : > { %3478 = vmatprep.subr.mxu0 %v3183_v47 }
 0x2dc   : > { %3096 = vmatmul.mubr.f32.gmra.mxu1 %v5595_v54  ;;  %v5634_v54 = vld [vmem:[%s9945_s4 + $0x148] sm:$0xff] }
 0x2dd   : > { %5618 = vmatprep.mubr.msk.f32.mxu1 %vm2743_vm1, %v5598_v51  ;;  %v3182_v51 = vld [vmem:[%s9945_s4 + $0x10] sm:$0xff]  ;;  %3323 = vmatprep.subr.mxu1 %v5634_v54  ;;  %v5717_v54 = vld [vmem:[%s9945_s4 + $0x3e0] sm:$0xff] }
 0x2de   : > { %3479 = vmatpush1.msra.mxu0 %v3182_v51 }
 0x2e0   : > { %3101 = vmatmul.mubr.f32.gmra.mxu1 %v5597_v0  ;;  %v5633_v0 = vld [vmem:[%s9945_s4 + $0x140] sm:$0xff] }
 0x2e1   : > { %5619 = vmatprep.mubr.msk.f32.mxu1 %vm2743_vm1, %v5600_v1  ;;  %v3181_v1 = vld [vmem:[%s9945_s4 + $0x8] sm:$0xff]  ;;  %3324 = vmatpush1.msra.mxu1 %v5633_v0  ;;  %v5716_v0 = vld [vmem:[%s9945_s4 + $0x3d8] sm:$0xff] }
 0x2e2   : > { %3480 = vmatprep.subr.mxu0 %v3181_v1 }
 0x2e4   : > { %3106 = vmatmul.mubr.f32.gmra.mxu1 %v5599_v40  ;;  %v5632_v40 = vld [vmem:[%s9945_s4 + $0x138] sm:$0xff] }
 0x2e5   : > { %5620 = vmatprep.mubr.msk.f32.mxu1 %vm2743_vm1, %v5602_v50  ;;  %v3180_v50 = vld [vmem:[%s9945_s4] sm:$0xff]  ;;  %3325 = vmatprep.subr.mxu1 %v5632_v40 }
 0x2e6   : > { %3481 = vmatpush1.msra.mxu0 %v3180_v50  ;;  %v5715_v50 = vld [vmem:[%s9945_s4 + $0x3d0] sm:$0xff] }
 0x2e7   : > { %3926 = vmatprep.subr.mxu0 %v5720_v4  ;;  %v5713_v4 = vld [vmem:[%s9945_s4 + $0x3c0] sm:$0xff] }
 0x2e8   : > { %3111 = vmatmul.mubr.f32.gmra.mxu1 %v5601_v44  ;;  %v5631_v44 = vld [vmem:[%s9945_s4 + $0x130] sm:$0xff] }
 0x2e9   : > { %5621 = vmatprep.mubr.msk.f32.mxu1 %vm2743_vm1, %v5604_v33  ;;  %3326 = vmatpush1.msra.mxu1 %v5631_v44  ;;  %v5630_v33 = vld [vmem:[%s9945_s4 + $0x128] sm:$0xff] }
 0x2ea   : > { %3327 = vmatprep.subr.mxu1 %v5630_v33 }
 0x2ec   : > { %3116 = vmatmul.mubr.f32.gmra.mxu1 %v5603_v55  ;;  %v5629_v55 = vld [vmem:[%s9945_s4 + $0x120] sm:$0xff] }
 0x2ed   : > { %5622 = vmatprep.mubr.msk.f32.mxu1 %vm2743_vm1, %v5606_v6  ;;  %v10122_v6 = vmov 0.0   ;;  %3328 = vmatpush1.msra.mxu1 %v5629_v55  ;;  %v5714_v55 = vld [vmem:[%s9945_s4 + $0x3c8] sm:$0xff] }
 0x2ee   : > { %3329 = vmatprep.subr.mxu1 %v5628_v23 }
 0x2ef   : > { %3330 = vmatpush1.msra.mxu1 %v5627_v10 }
 0x2f0   : > { %3121 = vmatmul.mubr.f32.gmra.mxu1 %v5605_v60  ;;  %3331 = vmatprep.subr.mxu1 %v5626_v3  ;;  %v5625_v60 = vld [vmem:[%s9945_s4 + $0x100] sm:$0xff] }
 0x2f1   : > { %5623 = vmatprep.mubr.msk.f32.mxu1 %vm2743_vm1, %v5608_v12  ;;  %3332 = vmatpush1.msra.mxu1 %v5625_v60  ;;  %v5688_v12 = vld [vmem:[%s9945_s4 + $0x2f8] sm:$0xff] }
 0x2f2   : > { %3674 = vmatprep.subr.mxu1 %v5688_v12 }
 0x2f4   : > { %3126 = vmatmul.mubr.f32.gmra.mxu1 %v5607_v32 }
 0x2f5   : > { %3365 = vmatprep.mubr.f32.mxu1 %v10122_v6 }
 0x348   : > { %v5872_v24 = vpop.f32.mrf.mxu1 }
 0x34a   : > { %v5873_v49 = vpop.f32.mrf.mxu1 }
 0x34b   : > { %v5874_v16 = vadd.f32 %v5873_v49, %v5872_v24 }
 0x34c   : > { %v5875_v15 = vpop.f32.mrf.mxu1 }
 0x34e   : > { %v5876_v32 = vpop.f32.mrf.mxu1 }
 0x34f   : > { %v5877_v39 = vadd.f32 %v5876_v32, %v5875_v15 }
 0x350   : > { %v5878_v5 = vpop.f32.mrf.mxu1 }
 0x352   : > { %v5879_v56 = vpop.f32.mrf.mxu1 }
 0x353   : > { %v5880_v57 = vadd.f32 %v5879_v56, %v5878_v5  ;;  %v5687_v56 = vld [vmem:[%s9945_s4 + $0x2f0] sm:$0xff] }
 0x354   : > { %v5881_v42 = vpop.f32.mrf.mxu1 }
 0x356   : > { %v5882_v48 = vpop.f32.mrf.mxu1 }
 0x357   : > { %v5883_v44 = vadd.f32 %v5882_v48, %v5881_v42  ;;  %v5712_v48 = vld [vmem:[%s9945_s4 + $0x3b8] sm:$0xff] }
 0x358   : > { %v8501_v36 = vpop.f32.mrf.mxu1 }
 0x35a   : > { %v8503_v35 = vpop.f32.mrf.mxu1 }
 0x35c   : > { %v8505_v17 = vpop.f32.mrf.mxu1 }
 0x35e   : > { %v8507_v31 = vpop.f32.mrf.mxu1 }
 0x360   : > { %v8509_v53 = vpop.f32.mrf.mxu1 }
 0x362   : > { %v8511_v13 = vpop.f32.mrf.mxu1 }
 0x364   : > { %v8513_v61 = vpop.f32.mrf.mxu1 }
 0x366   : > { %v8515_v37 = vpop.f32.mrf.mxu1 }
 0x368   : > { %v8517_v19 = vpop.f32.mrf.mxu1 }
 0x36a   : > { %v8519_v46 = vpop.f32.mrf.mxu1 }
 0x36c   : > { %v8521_v62 = vpop.f32.mrf.mxu1 }
 0x36e   : > { %v8523_v11 = vpop.f32.mrf.mxu1 }
 0x370   : > { %v8525_v28 = vpop.f32.mrf.mxu1 }
 0x372   : > { %v8527_v43 = vpop.f32.mrf.mxu1 }
 0x374   : > { %v8529_v14 = vpop.f32.mrf.mxu1 }
 0x376   : > { %v8531_v59 = vpop.f32.mrf.mxu1 }
 0x378   : > { %v8533_v25 = vpop.f32.mrf.mxu1 }
 0x37a   : > { %v8535_v22 = vpop.f32.mrf.mxu1 }
 0x37c   : > { %v8537_v20 = vpop.f32.mrf.mxu1 }
 0x37e   : > { %v8539_v34 = vpop.f32.mrf.mxu1 }
 0x380   : > { %v5946_v26 = vpop.f32.mrf.mxu1 }
 0x382   : > { %v5947_v8 = vpop.f32.mrf.mxu1 }
 0x383   : > { %v5948_v58 = vadd.f32 %v5947_v8, %v5946_v26  ;;  %v5686_v26 = vld [vmem:[%s9945_s4 + $0x2e8] sm:$0xff] }
 0x384   : > { %v5949_v30 = vpop.f32.mrf.mxu1 }
 0x385   : > { %v3131_v9 = vmax.f32 %v5874_v16, %v5948_v58  ;;  %v5886_v16 = vadd.f32 %v8503_v35, %v8501_v36 }
 0x386   : > { %v5950_v29 = vpop.f32.mrf.mxu1 }
 0x387   : > { %v3152_v52 = vadd.f32 %v8544_v18, %v3131_v9  ;;  %v5951_v2 = vadd.f32 %v5950_v29, %v5949_v30  ;;  %v5711_v29 = vld [vmem:[%s9945_s4 + $0x3b0] sm:$0xff] }
 0x388   : > { %v5952_v7 = vpop.f32.mrf.mxu1 }
 0x389   : > { %v8547_v38 = vmax.f32 %v3152_v52, 0.0  ;;  %v3132_v41 = vmax.f32 %v5877_v39, %v5951_v2 }
 0x38a   : > { %v5953_v63 = vpop.f32.mrf.mxu1 }
 0x38b   : > { %v3153_v21 = vadd.f32 %v8544_v18, %v3132_v41  ;;  %v5954_v47 = vadd.f32 %v5953_v63, %v5952_v7  ;;  %3515 = vmatmul.mubr.f32.vlgmr.msra.gmra.mxu0 %v8547_v38  ;;  %v3260_v3 = vrot.slane %v8547_v38, 1  ;;  %v4136_v24 = vrot.slane %v8547_v38, 4  ;;  %v5685_v7 = vld [vmem:[%s9945_s4 + $0x2e0] sm:$0xff]  ;;  %v5684_v63 = vld [vmem:[%s9945_s4 + $0x2d8] sm:$0xff] }
 0x38c   : > { %v5955_v51 = vpop.f32.mrf.mxu1  ;;  %3520 = vmatprep.mubr.f32.mxu0 %v10122_v6  ;;  %3927 = vmatpush1.msra.mxu0 %v5719_v45  ;;  %v5710_v45 = vld [vmem:[%s9945_s4 + $0x3a8] sm:$0xff] }
 0x38d   : > { %v8564_v1 = vmax.f32 %v3153_v21, 0.0  ;;  %v3133_v40 = vmax.f32 %v5880_v57, %v5954_v47  ;;  %3928 = vmatprep.subr.mxu0 %v5718_v27  ;;  %v5889_v57 = vadd.f32 %v8507_v31, %v8505_v17 }
 0x38e   : > { %v5956_v33 = vpop.f32.mrf.mxu1  ;;  %3929 = vmatpush1.msra.mxu0 %v5717_v54 }
 0x38f   : > { %v3154_v23 = vadd.f32 %v8544_v18, %v3133_v40  ;;  %v5957_v10 = vadd.f32 %v5956_v33, %v5955_v51  ;;  %3521 = vmatmul.mubr.f32.gmra.mxu0 %v8564_v1  ;;  %v3261_v60 = vrot.slane %v8564_v1, 1  ;;  %3930 = vmatprep.subr.mxu0 %v5716_v0  ;;  %v4137_v49 = vrot.slane %v8564_v1, 4  ;;  %v5709_v51 = vld [vmem:[%s9945_s4 + $0x3a0] sm:$0xff] }
 0x390   : > { %v5958_v12 = vpop.f32.mrf.mxu1  ;;  %3526 = vmatprep.mubr.f32.mxu0 %v10122_v6  ;;  %3931 = vmatpush1.msra.mxu0 %v5715_v50 }
 0x391   : > { %v8582_v15 = vmax.f32 %v3154_v23, 0.0  ;;  %v3134_v32 = vmax.f32 %v5883_v44, %v5957_v10  ;;  %v3262_v5 = vsel %vm3259_vm3, %v3260_v3, %v3261_v60  ;;  %3932 = vmatprep.subr.mxu0 %v5714_v55  ;;  %v8595_v8 = vsel %vm2786_vm2, %v4136_v24, %v4137_v49  ;;  %v5683_v44 = vld [vmem:[%s9945_s4 + $0x2d0] sm:$0xff]  ;;  %v5708_v55 = vld [vmem:[%s9945_s4 + $0x398] sm:$0xff]  ;;  %v5682_v23 = vld [vmem:[%s9945_s4 + $0x2c8] sm:$0xff] }
 0x392   : > { %v5959_v42 = vpop.f32.mrf.mxu1  ;;  %3366 = vmatmul.mubr.f32.vlgmr.msra.gmra.mxu1 %v3262_v5  ;;  %3933 = vmatpush1.msra.mxu0 %v5713_v4  ;;  %v5892_v3 = vadd.f32 %v8511_v13, %v8509_v53  ;;  %v5707_v24 = vld [vmem:[%s9945_s4 + $0x390] sm:$0xff] }
 0x393   : > { %v3155_v58 = vadd.f32 %v8544_v18, %v3134_v32  ;;  %v5960_v30 = vadd.f32 %v5959_v42, %v5958_v12  ;;  %3527 = vmatmul.mubr.f32.gmra.mxu0 %v8582_v15  ;;  %3371 = vmatprep.mubr.f32.mxu1 %v10122_v6  ;;  %v3263_v9 = vrot.slane %v8582_v15, 1  ;;  %v4139_v52 = vrot.slane %v8582_v15, 4 }
 0x394   : > { %v5961_v39 = vpop.f32.mrf.mxu1  ;;  %3532 = vmatprep.mubr.f32.mxu0 %v10122_v6  ;;  %3675 = vmatpush1.msra.mxu1 %v5687_v56  ;;  %v5681_v56 = vld [vmem:[%s9945_s4 + $0x2c0] sm:$0xff] }
 0x395   : > { %v8608_v36 = vmax.f32 %v3155_v58, 0.0  ;;  %v3135_v35 = vmax.f32 %v5886_v16, %v5960_v30  ;;  %v3264_v2 = vsel %vm3259_vm3, %v3261_v60, %v3263_v9  ;;  %3934 = vmatprep.subr.mxu0 %v5712_v48  ;;  %3676 = vmatprep.subr.mxu1 %v5686_v26  ;;  %v8621_v27 = vsel %vm2786_vm2, %v4137_v49, %v4139_v52  ;;  %v5706_v48 = vld [vmem:[%s9945_s4 + $0x388] sm:$0xff]  ;;  %v5680_v26 = vld [vmem:[%s9945_s4 + $0x2b8] sm:$0xff] }
 0x396   : > { %v5962_v41 = vpop.f32.mrf.mxu1  ;;  %3372 = vmatmul.mubr.f32.gmra.mxu1 %v3264_v2  ;;  %3935 = vmatpush1.msra.mxu0 %v5711_v29  ;;  %v5895_v58 = vadd.f32 %v8515_v37, %v8513_v61 }
 0x397   : > { %v3156_v21 = vadd.f32 %v8544_v18, %v3135_v35  ;;  %v5963_v47 = vadd.f32 %v5962_v41, %v5961_v39  ;;  %3533 = vmatmul.mubr.f32.gmra.mxu0 %v8608_v36  ;;  %3377 = vmatprep.mubr.f32.mxu1 %v10122_v6  ;;  %v3265_v54 = vrot.slane %v8608_v36, 1  ;;  %v4141_v40 = vrot.slane %v8608_v36, 4  ;;  %v5705_v39 = vld [vmem:[%s9945_s4 + $0x380] sm:$0xff] }
 0x398   : > { %v5964_v0 = vpop.f32.mrf.mxu1  ;;  %3538 = vmatprep.mubr.f32.mxu0 %v10122_v6  ;;  %3677 = vmatpush1.msra.mxu1 %v5685_v7  ;;  %v5679_v7 = vld [vmem:[%s9945_s4 + $0x2b0] sm:$0xff] }
 0x399   : > { %v8634_v17 = vmax.f32 %v3156_v21, 0.0  ;;  %v3136_v31 = vmax.f32 %v5889_v57, %v5963_v47  ;;  %v3266_v50 = vsel %vm3259_vm3, %v3263_v9, %v3265_v54  ;;  %3936 = vmatprep.subr.mxu0 %v5710_v45  ;;  %3678 = vmatprep.subr.mxu1 %v5684_v63  ;;  %v8647_v10 = vsel %vm2786_vm2, %v4139_v52, %v4141_v40  ;;  %v5704_v45 = vld [vmem:[%s9945_s4 + $0x378] sm:$0xff]  ;;  %v5678_v63 = vld [vmem:[%s9945_s4 + $0x2a8] sm:$0xff] }
 0x39a   : > { %v5965_v33 = vpop.f32.mrf.mxu1  ;;  %3378 = vmatmul.mubr.f32.gmra.mxu1 %v3266_v50  ;;  %3937 = vmatpush1.msra.mxu0 %v5709_v51  ;;  %v5898_v21 = vadd.f32 %v8519_v46, %v8517_v19 }
 0x39b   : > { %v3157_v60 = vadd.f32 %v8544_v18, %v3136_v31  ;;  %v5966_v4 = vadd.f32 %v5965_v33, %v5964_v0  ;;  %3539 = vmatmul.mubr.f32.gmra.mxu0 %v8634_v17  ;;  %3383 = vmatprep.mubr.f32.mxu1 %v10122_v6  ;;  %v3267_v12 = vrot.slane %v8634_v17, 1  ;;  %v4143_v32 = vrot.slane %v8634_v17, 4  ;;  %v5703_v0 = vld [vmem:[%s9945_s4 + $0x370] sm:$0xff] }
 0x39c   : > { %v5967_v49 = vpop.f32.mrf.mxu1  ;;  %3544 = vmatprep.mubr.f32.mxu0 %v10122_v6  ;;  %3679 = vmatpush1.msra.mxu1 %v5683_v44  ;;  %v5677_v44 = vld [vmem:[%s9945_s4 + $0x2a0] sm:$0xff] }
 0x39d   : > { %v8660_v53 = vmax.f32 %v3157_v60, 0.0  ;;  %v3137_v13 = vmax.f32 %v5892_v3, %v5966_v4  ;;  %v3268_v5 = vsel %vm3259_vm3, %v3265_v54, %v3267_v12  ;;  %3938 = vmatprep.subr.mxu0 %v5708_v55  ;;  %3680 = vmatprep.subr.mxu1 %v5682_v23  ;;  %v8673_v16 = vsel %vm2786_vm2, %v4141_v40, %v4143_v32  ;;  %v5702_v55 = vld [vmem:[%s9945_s4 + $0x368] sm:$0xff]  ;;  %v5676_v23 = vld [vmem:[%s9945_s4 + $0x298] sm:$0xff] }
 0x39e   : > { %v5968_v42 = vpop.f32.mrf.mxu1  ;;  %3384 = vmatmul.mubr.f32.gmra.mxu1 %v3268_v5  ;;  %3939 = vmatpush1.msra.mxu0 %v5707_v24  ;;  %v5901_v60 = vadd.f32 %v8523_v11, %v8521_v62 }
 0x39f   : > { %v3158_v30 = vadd.f32 %v8544_v18, %v3137_v13  ;;  %v5969_v9 = vadd.f32 %v5968_v42, %v5967_v49  ;;  %3545 = vmatmul.mubr.f32.gmra.mxu0 %v8660_v53  ;;  %3389 = vmatprep.mubr.f32.mxu1 %v10122_v6  ;;  %v3269_v29 = vrot.slane %v8660_v53, 1  ;;  %v4145_v35 = vrot.slane %v8660_v53, 4  ;;  %v5701_v49 = vld [vmem:[%s9945_s4 + $0x360] sm:$0xff] }
 0x3a0   : > { %v5970_v52 = vpop.f32.mrf.mxu1  ;;  %3550 = vmatprep.mubr.f32.mxu0 %v10122_v6  ;;  %3681 = vmatpush1.msra.mxu1 %v5681_v56  ;;  %v5675_v56 = vld [vmem:[%s9945_s4 + $0x290] sm:$0xff] }
 0x3a1   : > { %v8686_v61 = vmax.f32 %v3158_v30, 0.0  ;;  %v3138_v37 = vmax.f32 %v5895_v58, %v5969_v9  ;;  %v3270_v2 = vsel %vm3259_vm3, %v3267_v12, %v3269_v29  ;;  %3940 = vmatprep.subr.mxu0 %v5706_v48  ;;  %3682 = vmatprep.subr.mxu1 %v5680_v26  ;;  %v8699_v57 = vsel %vm2786_vm2, %v4143_v32, %v4145_v35  ;;  %v5700_v48 = vld [vmem:[%s9945_s4 + $0x358] sm:$0xff]  ;;  %v5674_v26 = vld [vmem:[%s9945_s4 + $0x288] sm:$0xff] }
 0x3a2   : > { %v5971_v41 = vpop.f32.mrf.mxu1  ;;  %3390 = vmatmul.mubr.f32.gmra.mxu1 %v3270_v2  ;;  %3941 = vmatpush1.msra.mxu0 %v5705_v39  ;;  %v5904_v30 = vadd.f32 %v8527_v43, %v8525_v28 }
 0x3a3   : > { %v3159_v47 = vadd.f32 %v8544_v18, %v3138_v37  ;;  %v5972_v54 = vadd.f32 %v5971_v41, %v5970_v52  ;;  %3551 = vmatmul.mubr.f32.gmra.mxu0 %v8686_v61  ;;  %3395 = vmatprep.mubr.f32.mxu1 %v10122_v6  ;;  %v3271_v51 = vrot.slane %v8686_v61, 1  ;;  %v4147_v31 = vrot.slane %v8686_v61, 4  ;;  %v5699_v52 = vld [vmem:[%s9945_s4 + $0x350] sm:$0xff] }
 0x3a4   : > { %v5973_v40 = vpop.f32.mrf.mxu1  ;;  %3556 = vmatprep.mubr.f32.mxu0 %v10122_v6  ;;  %3683 = vmatpush1.msra.mxu1 %v5679_v7  ;;  %v5673_v7 = vld [vmem:[%s9945_s4 + $0x280] sm:$0xff] }
 0x3a5   : > { %v8712_v19 = vmax.f32 %v3159_v47, 0.0  ;;  %v3139_v46 = vmax.f32 %v5898_v21, %v5972_v54  ;;  %v3272_v50 = vsel %vm3259_vm3, %v3269_v29, %v3271_v51  ;;  %3942 = vmatprep.subr.mxu0 %v5704_v45  ;;  %3684 = vmatprep.subr.mxu1 %v5678_v63  ;;  %v8725_v3 = vsel %vm2786_vm2, %v4145_v35, %v4147_v31  ;;  %v5698_v45 = vld [vmem:[%s9945_s4 + $0x348] sm:$0xff]  ;;  %v5672_v63 = vld [vmem:[%s9945_s4 + $0x278] sm:$0xff] }
 0x3a6   : > { %v5974_v33 = vpop.f32.mrf.mxu1  ;;  %3396 = vmatmul.mubr.f32.gmra.mxu1 %v3272_v50  ;;  %3943 = vmatpush1.msra.mxu0 %v5703_v0  ;;  %v5907_v47 = vadd.f32 %v8531_v59, %v8529_v14 }
 0x3a7   : > { %v3160_v4 = vadd.f32 %v8544_v18, %v3139_v46  ;;  %v5975_v12 = vadd.f32 %v5974_v33, %v5973_v40  ;;  %3557 = vmatmul.mubr.f32.gmra.mxu0 %v8712_v19  ;;  %3401 = vmatprep.mubr.f32.mxu1 %v10122_v6  ;;  %v3273_v24 = vrot.slane %v8712_v19, 1  ;;  %v4149_v13 = vrot.slane %v8712_v19, 4  ;;  %v5697_v40 = vld [vmem:[%s9945_s4 + $0x340] sm:$0xff] }
 0x3a8   : > { %v5976_v32 = vpop.f32.mrf.mxu1  ;;  %3562 = vmatprep.mubr.f32.mxu0 %v10122_v6  ;;  %3685 = vmatpush1.msra.mxu1 %v5677_v44  ;;  %v5671_v44 = vld [vmem:[%s9945_s4 + $0x270] sm:$0xff] }
 0x3a9   : > { %v8738_v62 = vmax.f32 %v3160_v4, 0.0  ;;  %v3140_v11 = vmax.f32 %v5901_v60, %v5975_v12  ;;  %v3274_v5 = vsel %vm3259_vm3, %v3271_v51, %v3273_v24  ;;  %3944 = vmatprep.subr.mxu0 %v5702_v55  ;;  %3686 = vmatprep.subr.mxu1 %v5676_v23  ;;  %v8751_v58 = vsel %vm2786_vm2, %v4147_v31, %v4149_v13  ;;  %v5696_v55 = vld [vmem:[%s9945_s4 + $0x338] sm:$0xff]  ;;  %v5670_v23 = vld [vmem:[%s9945_s4 + $0x268] sm:$0xff] }
 0x3aa   : > { %v5977_v42 = vpop.f32.mrf.mxu1  ;;  %3402 = vmatmul.mubr.f32.gmra.mxu1 %v3274_v5  ;;  %3945 = vmatpush1.msra.mxu0 %v5701_v49  ;;  %v5910_v4 = vadd.f32 %v8535_v22, %v8533_v25 }
 0x3ab   : > { %v3161_v9 = vadd.f32 %v8544_v18, %v3140_v11  ;;  %v5978_v29 = vadd.f32 %v5977_v42, %v5976_v32  ;;  %3563 = vmatmul.mubr.f32.gmra.mxu0 %v8738_v62  ;;  %3407 = vmatprep.mubr.f32.mxu1 %v10122_v6  ;;  %v3275_v39 = vrot.slane %v8738_v62, 1  ;;  %v4151_v37 = vrot.slane %v8738_v62, 4  ;;  %v5695_v32 = vld [vmem:[%s9945_s4 + $0x330] sm:$0xff] }
 0x3ac   : > { %v5979_v35 = vpop.f32.mrf.mxu1  ;;  %3568 = vmatprep.mubr.f32.mxu0 %v10122_v6  ;;  %3687 = vmatpush1.msra.mxu1 %v5675_v56  ;;  %v5669_v56 = vld [vmem:[%s9945_s4 + $0x260] sm:$0xff] }
 0x3ad   : > { %v8764_v28 = vmax.f32 %v3161_v9, 0.0  ;;  %v3141_v43 = vmax.f32 %v5904_v30, %v5978_v29  ;;  %v3276_v2 = vsel %vm3259_vm3, %v3273_v24, %v3275_v39  ;;  %3946 = vmatprep.subr.mxu0 %v5700_v48  ;;  %3688 = vmatprep.subr.mxu1 %v5674_v26  ;;  %v8777_v21 = vsel %vm2786_vm2, %v4149_v13, %v4151_v37  ;;  %v5694_v48 = vld [vmem:[%s9945_s4 + $0x328] sm:$0xff]  ;;  %v5668_v26 = vld [vmem:[%s9945_s4 + $0x258] sm:$0xff] }
 0x3ae   : > { %v5980_v41 = vpop.f32.mrf.mxu1  ;;  %3408 = vmatmul.mubr.f32.gmra.mxu1 %v3276_v2  ;;  %3947 = vmatpush1.msra.mxu0 %v5699_v52  ;;  %v5913_v9 = vadd.f32 %v8539_v34, %v8537_v20  ;;  %v5667_v2 = vld [vmem:[%s9945_s4 + $0x250] sm:$0xff] }
 0x3af   : > { %v3162_v54 = vadd.f32 %v8544_v18, %v3141_v43  ;;  %v5981_v51 = vadd.f32 %v5980_v41, %v5979_v35  ;;  %3569 = vmatmul.mubr.f32.gmra.mxu0 %v8764_v28  ;;  %3413 = vmatprep.mubr.f32.mxu1 %v10122_v6  ;;  %v3277_v0 = vrot.slane %v8764_v28, 1  ;;  %v4153_v46 = vrot.slane %v8764_v28, 4  ;;  %v5693_v35 = vld [vmem:[%s9945_s4 + $0x320] sm:$0xff]  ;;  %v5666_v41 = vld [vmem:[%s9945_s4 + $0x248] sm:$0xff] }
 0x3b0   : > { %v5982_v31 = vpop.f32.mrf.mxu1  ;;  %3574 = vmatprep.mubr.f32.mxu0 %v10122_v6  ;;  %3689 = vmatpush1.msra.mxu1 %v5673_v7  ;;  %v5692_v7 = vld [vmem:[%s9945_s4 + $0x318] sm:$0xff] }
 0x3b1   : > { %v8790_v14 = vmax.f32 %v3162_v54, 0.0  ;;  %v3142_v59 = vmax.f32 %v5907_v47, %v5981_v51  ;;  %v3278_v50 = vsel %vm3259_vm3, %v3275_v39, %v3277_v0  ;;  %3948 = vmatprep.subr.mxu0 %v5698_v45  ;;  %3690 = vmatprep.subr.mxu1 %v5672_v63  ;;  %v8803_v60 = vsel %vm2786_vm2, %v4151_v37, %v4153_v46  ;;  %v5691_v54 = vld [vmem:[%s9945_s4 + $0x310] sm:$0xff] }
 0x3b2   : > { %v5983_v33 = vpop.f32.mrf.mxu1  ;;  %3414 = vmatmul.mubr.f32.gmra.mxu1 %v3278_v50  ;;  %3949 = vmatpush1.msra.mxu0 %v5697_v40  ;;  %v3886_v50 = vrot.slane %v8564_v1, 3 }
 0x3b3   : > { %v3163_v12 = vadd.f32 %v8544_v18, %v3142_v59  ;;  %v5984_v24 = vadd.f32 %v5983_v33, %v5982_v31  ;;  %3575 = vmatmul.mubr.f32.gmra.mxu0 %v8790_v14  ;;  %3419 = vmatprep.mubr.f32.mxu1 %v10122_v6  ;;  %v3279_v49 = vrot.slane %v8790_v14, 1  ;;  %v4155_v11 = vrot.slane %v8790_v14, 4  ;;  %v5690_v31 = vld [vmem:[%s9945_s4 + $0x308] sm:$0xff]  ;;  %v5689_v59 = vld [vmem:[%s9945_s4 + $0x300] sm:$0xff] }
 0x3b4   : > { %v5985_v13 = vpop.f32.mrf.mxu1  ;;  %3580 = vmatprep.mubr.f32.mxu0 %v10122_v6  ;;  %3691 = vmatpush1.msra.mxu1 %v5671_v44 }
 0x3b5   : > { %v8816_v25 = vmax.f32 %v3163_v12, 0.0  ;;  %v3143_v22 = vmax.f32 %v5910_v4, %v5984_v24  ;;  %v3280_v5 = vsel %vm3259_vm3, %v3277_v0, %v3279_v49  ;;  %3950 = vmatprep.subr.mxu0 %v5696_v55  ;;  %3692 = vmatprep.subr.mxu1 %v5670_v23  ;;  %v8829_v30 = vsel %vm2786_vm2, %v4153_v46, %v4155_v11  ;;  %v5664_v46 = vld [vmem:[%s9945_s4 + $0x238] sm:$0xff]  ;;  %v5663_v23 = vld [vmem:[%s9945_s4 + $0x230] sm:$0xff]  ;;  %v5662_v24 = vld [vmem:[%s9945_s4 + $0x228] sm:$0xff] }
 0x3b6   : > { %v5986_v42 = vpop.f32.mrf.mxu1  ;;  %3420 = vmatmul.mubr.f32.gmra.mxu1 %v3280_v5  ;;  %3951 = vmatpush1.msra.mxu0 %v5695_v32  ;;  %v3885_v4 = vrot.slane %v8547_v38, 3  ;;  %v5661_v32 = vld [vmem:[%s9945_s4 + $0x220] sm:$0xff]  ;;  %v5659_v5 = vld [vmem:[%s9945_s4 + $0x210] sm:$0xff] }
 0x3b7   : > { %v3164_v29 = vadd.f32 %v8544_v18, %v3143_v22  ;;  %v5987_v39 = vadd.f32 %v5986_v42, %v5985_v13  ;;  %3581 = vmatmul.mubr.f32.gmra.mxu0 %v8816_v25  ;;  %3425 = vmatprep.mubr.f32.mxu1 %v10122_v6  ;;  %v3281_v52 = vrot.slane %v8816_v25, 1  ;;  %v4157_v37 = vrot.slane %v8816_v25, 4  ;;  %v5660_v22 = vld [vmem:[%s9945_s4 + $0x218] sm:$0xff] }
 0x3b8   : > { %3586 = vmatprep.mubr.f32.mxu0 %v10122_v6  ;;  %3693 = vmatpush1.msra.mxu1 %v5669_v56  ;;  %v3888_v13 = vrot.slane %v8582_v15, 3  ;;  %v5658_v56 = vld [vmem:[%s9945_s4 + $0x208] sm:$0xff]  ;;  %v3634_v42 = vrot.slane %v8564_v1, 2 }
 0x3b9   : > { %v8842_v43 = vmax.f32 %v3164_v29, 0.0  ;;  %v3144_v20 = vmax.f32 %v5913_v9, %v5987_v39  ;;  %v3282_v34 = vsel %vm3259_vm3, %v3279_v49, %v3281_v52  ;;  %3952 = vmatprep.subr.mxu0 %v5694_v48  ;;  %3694 = vmatprep.subr.mxu1 %v5668_v26  ;;  %v8855_v45 = vsel %vm2786_vm2, %v4155_v11, %v4157_v37  ;;  %v5657_v26 = vld [vmem:[%s9945_s4 + $0x200] sm:$0xff]  ;;  %v5752_v39 = vld [vmem:[%s9945_s4 + $0x4f8] sm:$0xff] }
 0x3ba   : > { %3426 = vmatmul.mubr.f32.gmra.mxu1 %v3282_v34  ;;  %3953 = vmatpush1.msra.mxu0 %v5693_v35  ;;  %v3887_v49 = vsel %vm3884_vm4, %v3885_v4, %v3886_v50  ;;  %v3889_v48 = vsel %vm3884_vm4, %v3886_v50, %v3888_v13  ;;  %v3890_v9 = vrot.slane %v8608_v36, 3  ;;  %v3633_v29 = vrot.slane %v8547_v38, 2  ;;  %v5751_v35 = vld [vmem:[%s9945_s4 + $0x4f0] sm:$0xff] }
 0x3bb   : > { %v3165_v63 = vadd.f32 %v8544_v18, %v3144_v20  ;;  %3587 = vmatmul.mubr.f32.gmra.mxu0 %v8842_v43  ;;  %3431 = vmatprep.mubr.f32.mxu1 %v10122_v6  ;;  %v3283_v47 = vrot.slane %v8842_v43, 1  ;;  %v4159_v51 = vrot.slane %v8842_v43, 4  ;;  %v5665_v18 = vld [vmem:[%s9945_s4 + $0x240] sm:$0xff]  ;;  %v5750_v20 = vld [vmem:[%s9945_s4 + $0x4e8] sm:$0xff]  ;;  %v3638_v34 = vrot.slane %v8608_v36, 2  ;;  %v5743_v4 = vld [vmem:[%s9945_s4 + $0x4b0] sm:$0xff] }
 0x3bc   : > { %3592 = vmatprep.mubr.f32.mxu0 %v10122_v6  ;;  %3695 = vmatpush1.msra.mxu1 %v5667_v2  ;;  %v3635_v1 = vsel %vm3632_vm5, %v3633_v29, %v3634_v42  ;;  %v3891_v38 = vsel %vm3884_vm4, %v3888_v13, %v3890_v9  ;;  %v5749_v2 = vld [vmem:[%s9945_s4 + $0x4e0] sm:$0xff]  ;;  %v3898_v50 = vrot.slane %v8712_v19, 3  ;;  %v5738_v29 = vld [vmem:[%s9945_s4 + $0x488] sm:$0xff] }
 0x3bd   : > { %v8866_v0 = vmax.f32 %v3165_v63, 0.0  ;;  %v3284_v40 = vsel %vm3259_vm3, %v3281_v52, %v3283_v47  ;;  %3954 = vmatprep.subr.mxu0 %v5692_v7  ;;  %3696 = vmatprep.subr.mxu1 %v5666_v41  ;;  %v8883_v44 = vsel %vm2786_vm2, %v4157_v37, %v4159_v51  ;;  %v3636_v52 = vrot.slane %v8582_v15, 2  ;;  %v5748_v63 = vld [vmem:[%s9945_s4 + $0x4d8] sm:$0xff]  ;;  %v5741_v13 = vld [vmem:[%s9945_s4 + $0x4a0] sm:$0xff] }
 0x3be   : > { %3432 = vmatmul.mubr.f32.gmra.mxu1 %v3284_v40  ;;  %3955 = vmatpush1.msra.mxu0 %v5691_v54  ;;  %v3892_v37 = vrot.slane %v8634_v17, 3  ;;  %v3894_v41 = vrot.slane %v8660_v53, 3  ;;  %v5747_v54 = vld [vmem:[%s9945_s4 + $0x4d0] sm:$0xff]  ;;  %v3896_v40 = vrot.slane %v8686_v61, 3 }
 0x3bf   : > { %3593 = vmatmul.mubr.f32.gmra.mxu0 %v8866_v0  ;;  %3437 = vmatprep.mubr.f32.mxu1 %v10122_v6  ;;  %v3285_v33 = vrot.slane %v8866_v0, 1  ;;  %v4161_v55 = vrot.slane %v8866_v0, 4  ;;  %v3637_v15 = vsel %vm3632_vm5, %v3634_v42, %v3636_v52  ;;  %v3639_v36 = vsel %vm3632_vm5, %v3636_v52, %v3638_v34 }
 0x3c0   : > { %3697 = vmatpush1.msra.mxu1 %v5665_v18  ;;  %3956 = vmatprep.subr.mxu0 %v5690_v31  ;;  %v3893_v7 = vsel %vm3884_vm4, %v3890_v9, %v3892_v37  ;;  %v5746_v18 = vld [vmem:[%s9945_s4 + $0x4c8] sm:$0xff]  ;;  %v3642_v31 = vrot.slane %v8660_v53, 2  ;;  %v3648_v42 = vrot.slane %v8738_v62, 2  ;;  %v3904_v9 = vrot.slane %v8790_v14, 3 }
 0x3c1   : > { %v3286_v12 = vsel %vm3259_vm3, %v3283_v47, %v3285_v33  ;;  %3698 = vmatprep.subr.mxu1 %v5664_v46  ;;  %3957 = vmatpush1.msra.mxu0 %v5689_v59  ;;  %v8906_v11 = vsel %vm2786_vm2, %v4159_v51, %v4161_v55  ;;  %v3640_v47 = vrot.slane %v8634_v17, 2  ;;  %v3895_v51 = vsel %vm3884_vm4, %v3892_v37, %v3894_v41  ;;  %v5745_v46 = vld [vmem:[%s9945_s4 + $0x4c0] sm:$0xff] }
 0x3c2   : > { %3438 = vmatmul.mubr.f32.gmra.mxu1 %v3286_v12  ;;  %3990 = vmatprep.mubr.f32.mxu0 %v10122_v6  ;;  %v3897_v59 = vsel %vm3884_vm4, %v3894_v41, %v3896_v40  ;;  %v3899_v12 = vsel %vm3884_vm4, %v3896_v40, %v3898_v50  ;;  %v3652_v37 = vrot.slane %v8790_v14, 2  ;;  %v5733_v41 = vld [vmem:[%s9945_s4 + $0x460] sm:$0xff] }
 0x3c3   : > { %3699 = vmatpush1.msra.mxu1 %v5663_v23  ;;  %3991 = vmatmul.mubr.f32.vlgmr.msra.gmra.mxu0 %v3887_v49  ;;  %v3641_v17 = vsel %vm3632_vm5, %v3638_v34, %v3640_v47  ;;  %v3643_v53 = vsel %vm3632_vm5, %v3640_v47, %v3642_v31  ;;  %v3644_v23 = vrot.slane %v8686_v61, 2  ;;  %v5742_v49 = vld [vmem:[%s9945_s4 + $0x4a8] sm:$0xff]  ;;  %v3908_v34 = vrot.slane %v8842_v43, 3  ;;  %v5732_v47 = vld [vmem:[%s9945_s4 + $0x458] sm:$0xff] }
 0x3c4   : > { %3700 = vmatprep.subr.mxu1 %v5662_v24  ;;  %3443 = vmatprep.mubr.f32.mxu1 %v10122_v6  ;;  %v3900_v24 = vrot.slane %v8738_v62, 3 }
 0x3c5   : > { %3701 = vmatpush1.msra.mxu1 %v5661_v32  ;;  %3996 = vmatprep.mubr.f32.mxu0 %v10122_v6  ;;  %v3645_v61 = vsel %vm3632_vm5, %v3642_v31, %v3644_v23  ;;  %v3646_v32 = vrot.slane %v8712_v19, 2  ;;  %v3658_v31 = vrot.slane %v8866_v0, 2 }
 0x3c6   : > { %3444 = vmatmul.mubr.f32.gmra.mxu1 %v3285_v33  ;;  %3702 = vmatprep.subr.mxu1 %v5660_v22  ;;  %v5744_v33 = vld [vmem:[%s9945_s4 + $0x4b8] sm:$0xff]  ;;  %v3901_v22 = vsel %vm3884_vm4, %v3898_v50, %v3900_v24 }
 0x3c7   : > { %3703 = vmatpush1.msra.mxu1 %v5659_v5  ;;  %3997 = vmatmul.mubr.f32.gmra.mxu0 %v3889_v48  ;;  %v3902_v5 = vrot.slane %v8764_v28, 3  ;;  %v3647_v19 = vsel %vm3632_vm5, %v3644_v23, %v3646_v32  ;;  %v5739_v48 = vld [vmem:[%s9945_s4 + $0x490] sm:$0xff]  ;;  %v3649_v62 = vsel %vm3632_vm5, %v3646_v32, %v3648_v42  ;;  %v5724_v23 = vld [vmem:[%s9945_s4 + $0x418] sm:$0xff] }
 0x3c8   : > { %3704 = vmatprep.subr.mxu1 %v5658_v56  ;;  %3738 = vmatprep.mubr.f32.mxu1 %v10122_v6  ;;  %v5740_v56 = vld [vmem:[%s9945_s4 + $0x498] sm:$0xff] }
 0x3c9   : > { %3705 = vmatpush1.msra.mxu1 %v5657_v26  ;;  %4002 = vmatprep.mubr.f32.mxu0 %v10122_v6  ;;  %v3903_v26 = vsel %vm3884_vm4, %v3900_v24, %v3902_v5  ;;  %v3905_v52 = vsel %vm3884_vm4, %v3902_v5, %v3904_v9  ;;  %v5721_v24 = vld [vmem:[%s9945_s4 + $0x400] sm:$0xff] }
 0x3ca   : > { %3739 = vmatmul.mubr.f32.vlgmr.msra.gmra.mxu1 %v3635_v1  ;;  %4177 = vmatprep.subr.mxu1 %v5752_v39  ;;  %v3650_v39 = vrot.slane %v8764_v28, 2  ;;  %v5737_v1 = vld [vmem:[%s9945_s4 + $0x480] sm:$0xff] }
 0x3cb   : > { %4003 = vmatmul.mubr.f32.gmra.mxu0 %v3891_v38  ;;  %3744 = vmatprep.mubr.f32.mxu1 %v10122_v6  ;;  %v5736_v38 = vld [vmem:[%s9945_s4 + $0x478] sm:$0xff] }
 0x3cc   : > { %4008 = vmatprep.mubr.f32.mxu0 %v10122_v6  ;;  %4178 = vmatpush1.msra.mxu1 %v5751_v35  ;;  %v3906_v35 = vrot.slane %v8816_v25, 3  ;;  %v3651_v28 = vsel %vm3632_vm5, %v3648_v42, %v3650_v39  ;;  %v3653_v14 = vsel %vm3632_vm5, %v3650_v39, %v3652_v37 }
 0x3cd   : > { %4179 = vmatprep.subr.mxu1 %v5750_v20  ;;  %6145 = vmatprep.subr.mxu0 %v10122_v6  ;;  %v5735_v20 = vld [vmem:[%s9945_s4 + $0x470] sm:$0xff] }
 0x3ce   : > { %3745 = vmatmul.mubr.f32.gmra.mxu1 %v3637_v15  ;;  %v3907_v15 = vsel %vm3884_vm4, %v3904_v9, %v3906_v35 }
 0x3cf   : > { %4009 = vmatmul.mubr.f32.gmra.mxu0 %v3893_v7  ;;  %3750 = vmatprep.mubr.f32.mxu1 %v10122_v6  ;;  %v3654_v7 = vrot.slane %v8816_v25, 2 }
 0x3d0   : > { %4014 = vmatprep.mubr.f32.mxu0 %v10122_v6  ;;  %4180 = vmatpush1.msra.mxu1 %v5749_v2  ;;  %v5734_v2 = vld [vmem:[%s9945_s4 + $0x468] sm:$0xff] }
 0x3d1   : > { %4181 = vmatprep.subr.mxu1 %v5748_v63  ;;  %v3909_v63 = vsel %vm3884_vm4, %v3906_v35, %v3908_v34  ;;  %v3655_v25 = vsel %vm3632_vm5, %v3652_v37, %v3654_v7 }
 0x3d2   : > { %3751 = vmatmul.mubr.f32.gmra.mxu1 %v3639_v36  ;;  %v3910_v36 = vrot.slane %v8866_v0, 3 }
 0x3d3   : > { %4015 = vmatmul.mubr.f32.gmra.mxu0 %v3895_v51  ;;  %3756 = vmatprep.mubr.f32.mxu1 %v10122_v6  ;;  %v5731_v51 = vld [vmem:[%s9945_s4 + $0x450] sm:$0xff] }
 0x3d4   : > { %4020 = vmatprep.mubr.f32.mxu0 %v10122_v6  ;;  %4182 = vmatpush1.msra.mxu1 %v5747_v54  ;;  %v3656_v54 = vrot.slane %v8842_v43, 2  ;;  %v3911_v40 = vsel %vm3884_vm4, %v3908_v34, %v3910_v36 }
 0x3d5   : > { %4183 = vmatprep.subr.mxu1 %v5746_v18  ;;  %v5730_v18 = vld [vmem:[%s9945_s4 + $0x448] sm:$0xff] }
 0x3d6   : > { %3757 = vmatmul.mubr.f32.gmra.mxu1 %v3641_v17  ;;  %v3657_v43 = vsel %vm3632_vm5, %v3654_v7, %v3656_v54  ;;  %v5729_v17 = vld [vmem:[%s9945_s4 + $0x440] sm:$0xff]  ;;  %v3659_v50 = vsel %vm3632_vm5, %v3656_v54, %v3658_v31 }
 0x3d7   : > { %4021 = vmatmul.mubr.f32.gmra.mxu0 %v3897_v59  ;;  %3762 = vmatprep.mubr.f32.mxu1 %v10122_v6  ;;  %v5727_v59 = vld [vmem:[%s9945_s4 + $0x430] sm:$0xff] }
 0x3d8   : > { %4026 = vmatprep.mubr.f32.mxu0 %v10122_v6  ;;  %4184 = vmatpush1.msra.mxu1 %v5745_v46  ;;  %v5728_v46 = vld [vmem:[%s9945_s4 + $0x438] sm:$0xff] }
 0x3d9   : > { %4185 = vmatprep.subr.mxu1 %v5744_v33  ;;  %v5726_v33 = vld [vmem:[%s9945_s4 + $0x428] sm:$0xff] }
 0x3da   : > { %3763 = vmatmul.mubr.f32.gmra.mxu1 %v3643_v53  ;;  %v5725_v53 = vld [vmem:[%s9945_s4 + $0x420] sm:$0xff] }
 0x3db   : > { %4027 = vmatmul.mubr.f32.gmra.mxu0 %v3899_v12  ;;  %3768 = vmatprep.mubr.f32.mxu1 %v10122_v6  ;;  %v5722_v12 = vld [vmem:[%s9945_s4 + $0x408] sm:$0xff] }
 0x3dc   : > { %4032 = vmatprep.mubr.f32.mxu0 %v10122_v6  ;;  %4186 = vmatpush1.msra.mxu1 %v5743_v4  ;;  %v5723_v4 = vld [vmem:[%s9945_s4 + $0x410] sm:$0xff] }
 0x3dd   : > { %4187 = vmatprep.subr.mxu1 %v5742_v49 }
 0x3de   : > { %3769 = vmatmul.mubr.f32.gmra.mxu1 %v3645_v61 }
 0x3df   : > { %4033 = vmatmul.mubr.f32.gmra.mxu0 %v3901_v22  ;;  %3774 = vmatprep.mubr.f32.mxu1 %v10122_v6 }
 0x3e0   : > { %4038 = vmatprep.mubr.f32.mxu0 %v10122_v6  ;;  %4188 = vmatpush1.msra.mxu1 %v5741_v13 }
 0x3e1   : > { %4189 = vmatprep.subr.mxu1 %v5740_v56 }
 0x3e2   : > { %3775 = vmatmul.mubr.f32.gmra.mxu1 %v3647_v19 }
 0x3e3   : > { %4039 = vmatmul.mubr.f32.gmra.mxu0 %v3903_v26  ;;  %3780 = vmatprep.mubr.f32.mxu1 %v10122_v6 }
 0x3e4   : > { %4044 = vmatprep.mubr.f32.mxu0 %v10122_v6  ;;  %4190 = vmatpush1.msra.mxu1 %v5739_v48 }
 0x3e5   : > { %4191 = vmatprep.subr.mxu1 %v5738_v29 }
 0x3e6   : > { %3781 = vmatmul.mubr.f32.gmra.mxu1 %v3649_v62 }
 0x3e7   : > { %4045 = vmatmul.mubr.f32.gmra.mxu0 %v3905_v52  ;;  %3786 = vmatprep.mubr.f32.mxu1 %v10122_v6 }
 0x3e8   : > { %4050 = vmatprep.mubr.f32.mxu0 %v10122_v6  ;;  %4192 = vmatpush1.msra.mxu1 %v5737_v1 }
 0x3e9   : > { %4193 = vmatprep.subr.mxu1 %v5736_v38 }
 0x3ea   : > { %3787 = vmatmul.mubr.f32.gmra.mxu1 %v3651_v28 }
 0x3eb   : > { %4051 = vmatmul.mubr.f32.gmra.mxu0 %v3907_v15  ;;  %3792 = vmatprep.mubr.f32.mxu1 %v10122_v6 }
 0x3ec   : > { %4056 = vmatprep.mubr.f32.mxu0 %v10122_v6  ;;  %4194 = vmatpush1.msra.mxu1 %v5735_v20 }
 0x3ed   : > { %4195 = vmatprep.subr.mxu1 %v5734_v2 }
 0x3ee   : > { %3793 = vmatmul.mubr.f32.gmra.mxu1 %v3653_v14 }
 0x3ef   : > { %4057 = vmatmul.mubr.f32.gmra.mxu0 %v3909_v63  ;;  %3798 = vmatprep.mubr.f32.mxu1 %v10122_v6 }
 0x3f0   : > { %4062 = vmatprep.mubr.f32.mxu0 %v10122_v6  ;;  %4196 = vmatpush1.msra.mxu1 %v5733_v41 }
 0x3f1   : > { %4197 = vmatprep.subr.mxu1 %v5732_v47 }
 0x3f2   : > { %3799 = vmatmul.mubr.f32.gmra.mxu1 %v3655_v25 }
 0x3f3   : > { %4063 = vmatmul.mubr.f32.gmra.mxu0 %v3911_v40  ;;  %3804 = vmatprep.mubr.f32.mxu1 %v10122_v6 }
 0x3f4   : > { %4068 = vmatprep.mubr.f32.mxu0 %v10122_v6  ;;  %4198 = vmatpush1.msra.mxu1 %v5731_v51 }
 0x3f5   : > { %4199 = vmatprep.subr.mxu1 %v5730_v18 }
 0x3f6   : > { %3805 = vmatmul.mubr.f32.gmra.mxu1 %v3657_v43 }
 0x3f7   : > { %4069 = vmatmul.mubr.f32.gmra.mxu0 %v3910_v36  ;;  %3810 = vmatprep.mubr.f32.mxu1 %v10122_v6 }
 0x3f8   : > { %4200 = vmatpush1.msra.mxu1 %v5729_v17  ;;  %6173 = vmatprep.mubr.msk.f32.mxu0 %vm6495_vm6, %v10122_v6 }
 0x3f9   : > { %4201 = vmatprep.subr.mxu1 %v5728_v46 }
 0x3fa   : > { %3811 = vmatmul.mubr.f32.gmra.mxu1 %v3659_v50 }
 0x3fb   : > { %4202 = vmatpush1.msra.mxu1 %v5727_v59  ;;  %3816 = vmatprep.mubr.f32.mxu1 %v10122_v6 }
 0x3fc   : > { %4203 = vmatprep.subr.mxu1 %v5726_v33 }
 0x3fd   : > { %4204 = vmatpush1.msra.mxu1 %v5725_v53 }
 0x3fe   : > { %3817 = vmatmul.mubr.f32.gmra.mxu1 %v3658_v31  ;;  %4205 = vmatprep.subr.mxu1 %v5724_v23 }
 0x3ff   : > { %4206 = vmatpush1.msra.mxu1 %v5723_v4  ;;  %4241 = vmatprep.mubr.f32.mxu1 %v10122_v6 }
 0x400   : > { %4207 = vmatprep.subr.mxu1 %v5722_v12 }
 0x401   : > { %4208 = vmatpush1.msra.mxu1 %v5721_v24 }
 0x402   : > { %4242 = vmatmul.mubr.f32.vlgmr.msra.gmra.mxu1 %v8595_v8  ;;  %6231 = vmatprep.subr.mxu1 %v10122_v6 }
 0x403   : > { %4247 = vmatprep.mubr.f32.mxu1 %v10122_v6 }
 0x406   : > { %4248 = vmatmul.mubr.f32.gmra.mxu1 %v8621_v27 }
 0x407   : > { %4253 = vmatprep.mubr.f32.mxu1 %v10122_v6 }
 0x40a   : > { %4254 = vmatmul.mubr.f32.gmra.mxu1 %v8647_v10 }
 0x40b   : > { %4259 = vmatprep.mubr.f32.mxu1 %v10122_v6 }
 0x40e   : > { %4260 = vmatmul.mubr.f32.gmra.mxu1 %v8673_v16 }
 0x40f   : > { %4265 = vmatprep.mubr.f32.mxu1 %v10122_v6 }
 0x412   : > { %4266 = vmatmul.mubr.f32.gmra.mxu1 %v8699_v57 }
 0x413   : > { %4271 = vmatprep.mubr.f32.mxu1 %v10122_v6 }
 0x416   : > { %4272 = vmatmul.mubr.f32.gmra.mxu1 %v8725_v3 }
 0x417   : > { %4277 = vmatprep.mubr.f32.mxu1 %v10122_v6 }
 0x41a   : > { %4278 = vmatmul.mubr.f32.gmra.mxu1 %v8751_v58 }
 0x41b   : > { %4283 = vmatprep.mubr.f32.mxu1 %v10122_v6 }
 0x41e   : > { %4284 = vmatmul.mubr.f32.gmra.mxu1 %v8777_v21 }
 0x41f   : > { %4289 = vmatprep.mubr.f32.mxu1 %v10122_v6 }
 0x422   : > { %4290 = vmatmul.mubr.f32.gmra.mxu1 %v8803_v60 }
 0x423   : > { %4295 = vmatprep.mubr.f32.mxu1 %v10122_v6 }
 0x426   : > { %4296 = vmatmul.mubr.f32.gmra.mxu1 %v8829_v30 }
 0x427   : > { %4301 = vmatprep.mubr.f32.mxu1 %v10122_v6 }
 0x42a   : > { %4302 = vmatmul.mubr.f32.gmra.mxu1 %v8855_v45 }
 0x42b   : > { %4307 = vmatprep.mubr.f32.mxu1 %v10122_v6 }
 0x42e   : > { %4308 = vmatmul.mubr.f32.gmra.mxu1 %v8883_v44 }
 0x42f   : > { %4313 = vmatprep.mubr.f32.mxu1 %v10122_v6 }
 0x432   : > { %4314 = vmatmul.mubr.f32.gmra.mxu1 %v8906_v11 }
 0x433   : > { %4319 = vmatprep.mubr.f32.mxu1 %v10122_v6 }
 0x436   : > { %4320 = vmatmul.mubr.f32.gmra.mxu1 %v4161_v55 }
 0x437   : > { %6263 = vmatprep.mubr.msk.f32.mxu1 %vm6495_vm6, %v10122_v6 }
 0x44b   : > { %v3516_v8 = vpop.f32.mrf.mxu0 }
 0x44d   : > { %v3518_v27 = vpop.f32.mrf.mxu0 }
 0x44f   : > { %v3522_v10 = vpop.f32.mrf.mxu0 }
 0x451   : > { %v3524_v16 = vpop.f32.mrf.mxu0 }
 0x452   : > { %v3367_v57 = vpop.f32.mrf.mxu1 }
 0x453   : > { %v9125_v3 = vadd.f32 %v3516_v8, %v3367_v57  ;;  %v3528_v58 = vpop.f32.mrf.mxu0 }
 0x454   : > { %v3369_v21 = vpop.f32.mrf.mxu1 }
 0x455   : > { %v9127_v60 = vadd.f32 %v3518_v27, %v3369_v21  ;;  %v3530_v30 = vpop.f32.mrf.mxu0 }
 0x456   : > { %v3373_v45 = vpop.f32.mrf.mxu1 }
 0x457   : > { %v9129_v44 = vadd.f32 %v3522_v10, %v3373_v45  ;;  %v3534_v11 = vpop.f32.mrf.mxu0 }
 0x458   : > { %v3375_v49 = vpop.f32.mrf.mxu1 }
 0x459   : > { %v9131_v61 = vadd.f32 %v3524_v16, %v3375_v49  ;;  %v3536_v0 = vpop.f32.mrf.mxu0 }
 0x45a   : > { %v3379_v55 = vpop.f32.mrf.mxu1 }
 0x45b   : > { %v9133_v32 = vadd.f32 %v3528_v58, %v3379_v55  ;;  %v3540_v13 = vpop.f32.mrf.mxu0 }
 0x45c   : > { %v3381_v22 = vpop.f32.mrf.mxu1 }
 0x45d   : > { %v9135_v5 = vadd.f32 %v3530_v30, %v3381_v22  ;;  %v3542_v56 = vpop.f32.mrf.mxu0 }
 0x45e   : > { %v3385_v19 = vpop.f32.mrf.mxu1 }
 0x45f   : > { %v9137_v42 = vadd.f32 %v3534_v11, %v3385_v19  ;;  %v3546_v48 = vpop.f32.mrf.mxu0 }
 0x460   : > { %v3387_v26 = vpop.f32.mrf.mxu1 }
 0x461   : > { %v9139_v9 = vadd.f32 %v3536_v0, %v3387_v26  ;;  %v3548_v29 = vpop.f32.mrf.mxu0 }
 0x462   : > { %v3391_v62 = vpop.f32.mrf.mxu1 }
 0x463   : > { %v9141_v39 = vadd.f32 %v3540_v13, %v3391_v62  ;;  %v3552_v1 = vpop.f32.mrf.mxu0 }
 0x464   : > { %v3393_v52 = vpop.f32.mrf.mxu1 }
 0x465   : > { %v9143_v35 = vadd.f32 %v3542_v56, %v3393_v52  ;;  %v3554_v38 = vpop.f32.mrf.mxu0 }
 0x466   : > { %v3397_v28 = vpop.f32.mrf.mxu1 }
 0x467   : > { %v9145_v37 = vadd.f32 %v3546_v48, %v3397_v28  ;;  %v3558_v20 = vpop.f32.mrf.mxu0 }
 0x468   : > { %v3399_v15 = vpop.f32.mrf.mxu1 }
 0x469   : > { %v9147_v34 = vadd.f32 %v3548_v29, %v3399_v15  ;;  %v3560_v2 = vpop.f32.mrf.mxu0 }
 0x46a   : > { %v3403_v14 = vpop.f32.mrf.mxu1 }
 0x46b   : > { %v9149_v7 = vadd.f32 %v3552_v1, %v3403_v14  ;;  %v3564_v41 = vpop.f32.mrf.mxu0 }
 0x46c   : > { %v3405_v63 = vpop.f32.mrf.mxu1 }
 0x46d   : > { %v9151_v36 = vadd.f32 %v3554_v38, %v3405_v63  ;;  %v3566_v47 = vpop.f32.mrf.mxu0 }
 0x46e   : > { %v3409_v25 = vpop.f32.mrf.mxu1 }
 0x46f   : > { %v9153_v54 = vadd.f32 %v3558_v20, %v3409_v25  ;;  %v3570_v51 = vpop.f32.mrf.mxu0 }
 0x470   : > { %v3411_v40 = vpop.f32.mrf.mxu1 }
 0x471   : > { %v9155_v18 = vadd.f32 %v3560_v2, %v3411_v40  ;;  %v3572_v43 = vpop.f32.mrf.mxu0 }
 0x472   : > { %v3415_v17 = vpop.f32.mrf.mxu1 }
 0x473   : > { %v9157_v31 = vadd.f32 %v3564_v41, %v3415_v17  ;;  %v3576_v46 = vpop.f32.mrf.mxu0 }
 0x474   : > { %v3417_v59 = vpop.f32.mrf.mxu1 }
 0x475   : > { %v9159_v50 = vadd.f32 %v3566_v47, %v3417_v59  ;;  %v3578_v33 = vpop.f32.mrf.mxu0 }
 0x476   : > { %v3421_v53 = vpop.f32.mrf.mxu1 }
 0x477   : > { %v9161_v23 = vadd.f32 %v3570_v51, %v3421_v53  ;;  %v3582_v4 = vpop.f32.mrf.mxu0 }
 0x478   : > { %v3423_v12 = vpop.f32.mrf.mxu1 }
 0x479   : > { %v9163_v24 = vadd.f32 %v3572_v43, %v3423_v12  ;;  %v3584_v8 = vpop.f32.mrf.mxu0 }
 0x47a   : > { %v3427_v27 = vpop.f32.mrf.mxu1 }
 0x47b   : > { %v9165_v10 = vadd.f32 %v3576_v46, %v3427_v27  ;;  %v9167_v16 = vpop.f32.mrf.mxu0 }
 0x47c   : > { %v3429_v57 = vpop.f32.mrf.mxu1 }
 0x47d   : > { %v9169_v58 = vadd.f32 %v3578_v33, %v3429_v57  ;;  %v9171_v21 = vpop.f32.mrf.mxu0 }
 0x47e   : > { %v3433_v30 = vpop.f32.mrf.mxu1 }
 0x47f   : > { %v9173_v45 = vadd.f32 %v3582_v4, %v3433_v30  ;;  %v9175_v11 = vpop.f32.mrf.mxu0 }
 0x480   : > { %v3435_v49 = vpop.f32.mrf.mxu1 }
 0x481   : > { %v9177_v0 = vadd.f32 %v3584_v8, %v3435_v49  ;;  %v9179_v55 = vpop.f32.mrf.mxu0 }
 0x482   : > { %v9181_v13 = vpop.f32.mrf.mxu1 }
 0x483   : > { %v3992_v22 = vpop.f32.mrf.mxu0 }
 0x484   : > { %v9183_v56 = vpop.f32.mrf.mxu1 }
 0x485   : > { %v3994_v19 = vpop.f32.mrf.mxu0 }
 0x486   : > { %v9185_v48 = vpop.f32.mrf.mxu1 }
 0x487   : > { %v3998_v29 = vpop.f32.mrf.mxu0 }
 0x488   : > { %v9187_v26 = vpop.f32.mrf.mxu1 }
 0x489   : > { %v4000_v20 = vpop.f32.mrf.mxu0 }
 0x48a   : > { %v3740_v62 = vpop.f32.mrf.mxu1 }
 0x48b   : > { %v3823_v1 = vadd.f32 %v3740_v62, %v9125_v3  ;;  %v4004_v25 = vpop.f32.mrf.mxu0 }
 0x48c   : > { %v3742_v52 = vpop.f32.mrf.mxu1 }
 0x48d   : > { %v3824_v38 = vadd.f32 %v3742_v52, %v9127_v60  ;;  %v9191_v28 = vadd.f32 %v3992_v22, %v3823_v1  ;;  %v4006_v46 = vpop.f32.mrf.mxu0 }
 0x48e   : > { %v3746_v15 = vpop.f32.mrf.mxu1 }
 0x48f   : > { %v3825_v2 = vadd.f32 %v3746_v15, %v9129_v44  ;;  %v9194_v14 = vadd.f32 %v3994_v19, %v3824_v38  ;;  %v4010_v30 = vpop.f32.mrf.mxu0 }
 0x490   : > { %v3748_v41 = vpop.f32.mrf.mxu1 }
 0x491   : > { %v3826_v63 = vadd.f32 %v3748_v41, %v9131_v61  ;;  %v9197_v47 = vadd.f32 %v3998_v29, %v3825_v2  ;;  %v4012_v19 = vpop.f32.mrf.mxu0 }
 0x492   : > { %v3752_v51 = vpop.f32.mrf.mxu1 }
 0x493   : > { %v3827_v3 = vadd.f32 %v3752_v51, %v9133_v32  ;;  %v9200_v40 = vadd.f32 %v4000_v20, %v3826_v63 }
 0x494   : > { %v3754_v60 = vpop.f32.mrf.mxu1 }
 0x495   : > { %v3828_v43 = vadd.f32 %v3754_v60, %v9135_v5  ;;  %v9203_v17 = vadd.f32 %v4004_v25, %v3827_v3 }
 0x496   : > { %v3758_v44 = vpop.f32.mrf.mxu1 }
 0x497   : > { %v9206_v59 = vadd.f32 %v3758_v44, %v9137_v42  ;;  %v9208_v33 = vadd.f32 %v4006_v46, %v3828_v43 }
 0x498   : > { %v3760_v61 = vpop.f32.mrf.mxu1 }
 0x499   : > { %v9215_v32 = vadd.f32 %v3760_v61, %v9139_v9 }
 0x49a   : > { %v3764_v5 = vpop.f32.mrf.mxu1 }
 0x49b   : > { %v9218_v53 = vadd.f32 %v3764_v5, %v9141_v39 }
 0x49c   : > { %v3766_v4 = vpop.f32.mrf.mxu1 }
 0x49d   : > { %v9221_v42 = vadd.f32 %v3766_v4, %v9143_v35 }
 0x49e   : > { %v3770_v12 = vpop.f32.mrf.mxu1 }
 0x49f   : > { %v9224_v8 = vadd.f32 %v3770_v12, %v9145_v37 }
 0x4a0   : > { %v3772_v27 = vpop.f32.mrf.mxu1 }
 0x4a1   : > { %v9227_v57 = vadd.f32 %v3772_v27, %v9147_v34  ;;  %v4016_v34 = vpop.f32.mrf.mxu0 }
 0x4a2   : > { %v3776_v49 = vpop.f32.mrf.mxu1 }
 0x4a3   : > { %v9230_v9 = vadd.f32 %v3776_v49, %v9149_v7 }
 0x4a4   : > { %v3778_v22 = vpop.f32.mrf.mxu1 }
 0x4a5   : > { %v9233_v39 = vadd.f32 %v3778_v22, %v9151_v36  ;;  %v4018_v36 = vpop.f32.mrf.mxu0 }
 0x4a6   : > { %v3782_v35 = vpop.f32.mrf.mxu1 }
 0x4a7   : > { %v9236_v29 = vadd.f32 %v3782_v35, %v9153_v54 }
 0x4a8   : > { %v3784_v37 = vpop.f32.mrf.mxu1 }
 0x4a9   : > { %v9239_v62 = vadd.f32 %v3784_v37, %v9155_v18  ;;  %v4022_v18 = vpop.f32.mrf.mxu0 }
 0x4aa   : > { %v3788_v1 = vpop.f32.mrf.mxu1 }
 0x4ab   : > { %v9242_v52 = vadd.f32 %v3788_v1, %v9157_v31 }
 0x4ac   : > { %v3790_v7 = vpop.f32.mrf.mxu1 }
 0x4ad   : > { %v9245_v38 = vadd.f32 %v3790_v7, %v9159_v50  ;;  %v4024_v50 = vpop.f32.mrf.mxu0 }
 0x4ae   : > { %v3794_v20 = vpop.f32.mrf.mxu1 }
 0x4af   : > { %v9248_v15 = vadd.f32 %v3794_v20, %v9161_v23 }
 0x4b0   : > { %v3796_v54 = vpop.f32.mrf.mxu1 }
 0x4b1   : > { %v9251_v2 = vadd.f32 %v3796_v54, %v9163_v24  ;;  %v4028_v24 = vpop.f32.mrf.mxu0 }
 0x4b2   : > { %v3800_v41 = vpop.f32.mrf.mxu1 }
 0x4b3   : > { %v9254_v63 = vadd.f32 %v3800_v41, %v9165_v10  ;;  %v4030_v10 = vpop.f32.mrf.mxu0 }
 0x4b4   : > { %v3802_v31 = vpop.f32.mrf.mxu1 }
 0x4b5   : > { %v9257_v25 = vadd.f32 %v3802_v31, %v9169_v58  ;;  %v4034_v58 = vpop.f32.mrf.mxu0 }
 0x4b6   : > { %v3806_v51 = vpop.f32.mrf.mxu1 }
 0x4b7   : > { %v9260_v3 = vadd.f32 %v3806_v51, %v9173_v45  ;;  %v4036_v27 = vpop.f32.mrf.mxu0 }
 0x4b8   : > { %v3808_v23 = vpop.f32.mrf.mxu1 }
 0x4b9   : > { %v9263_v60 = vadd.f32 %v3808_v23, %v9177_v0  ;;  %v5786_v0 = vld [vmem:[%s9948_s7 + $0xf8] sm:$0xff] }
 0x4ba   : > { %v9265_v43 = vpop.f32.mrf.mxu1  ;;  %6232 = vmatpush3.msra.mxu1 %v5786_v0 }
 0x4bb   : > { %6233 = vmatprep.subr.mxu1 %v10122_v6 }
 0x4bc   : > { %v9267_v46 = vpop.f32.mrf.mxu1 }
 0x4be   : > { %v9269_v44 = vpop.f32.mrf.mxu1 }
 0x4c0   : > { %v9271_v61 = vpop.f32.mrf.mxu1 }
 0x4c2   : > { %v4243_v5 = vpop.f32.mrf.mxu1 }
 0x4c3   : > { %v4326_v4 = vadd.f32 %v4243_v5, %v9191_v28  ;;  %v4040_v28 = vpop.f32.mrf.mxu0  ;;  %v4081_v5 = vadd.f32 %v4010_v30, %v9206_v59  ;;  %v4085_v59 = vadd.f32 %v4022_v18, %v9224_v8  ;;  %v4089_v8 = vadd.f32 %v4034_v58, %v9236_v29 }
 0x4c4   : > { %v4245_v45 = vpop.f32.mrf.mxu1 }
 0x4c5   : > { %v4327_v12 = vadd.f32 %v4245_v45, %v9194_v14  ;;  %v4042_v31 = vpop.f32.mrf.mxu0 }
 0x4c6   : > { %v4249_v49 = vpop.f32.mrf.mxu1 }
 0x4c7   : > { %v9279_v22 = vmax.f32 %v4326_v4, %v4327_v12  ;;  %v4328_v35 = vadd.f32 %v4249_v49, %v9197_v47  ;;  %v4082_v47 = vadd.f32 %v4012_v19, %v9215_v32  ;;  %v4046_v0 = vpop.f32.mrf.mxu0  ;;  %v4086_v32 = vadd.f32 %v4024_v50, %v9227_v57 }
 0x4c8   : > { %v4251_v37 = vpop.f32.mrf.mxu1  ;;  %v4090_v57 = vadd.f32 %v4036_v27, %v9239_v62  ;;  %v4093_v29 = vadd.f32 %v4046_v0, %v9248_v15  ;;  %v3591_v15 = vadd.f32 %v9171_v21, %v9183_v56  ;;  %v3597_v21 = vadd.f32 %v9179_v55, %v9187_v26 }
 0x4c9   : > { %v4329_v1 = vadd.f32 %v4251_v37, %v9200_v40 }
 0x4ca   : > { %v4255_v7 = vpop.f32.mrf.mxu1 }
 0x4cb   : > { %v9283_v20 = vmax.f32 %v4328_v35, %v4329_v1  ;;  %v4330_v54 = vadd.f32 %v4255_v7, %v9203_v17  ;;  %v4083_v17 = vadd.f32 %v4016_v34, %v9218_v53  ;;  %v4084_v35 = vadd.f32 %v4018_v36, %v9221_v42  ;;  %v4048_v7 = vpop.f32.mrf.mxu0 }
 0x4cc   : > { %v4257_v41 = vpop.f32.mrf.mxu1  ;;  %v4087_v53 = vadd.f32 %v4028_v24, %v9230_v9  ;;  %v4088_v42 = vadd.f32 %v4030_v10, %v9233_v39  ;;  %v4091_v9 = vadd.f32 %v4040_v28, %v9242_v52  ;;  %v4092_v39 = vadd.f32 %v4042_v31, %v9245_v38 }
 0x4cd   : > { %v4331_v14 = vadd.f32 %v4257_v41, %v9208_v33  ;;  %v4094_v62 = vadd.f32 %v4048_v7, %v9251_v2  ;;  %v3589_v28 = vadd.f32 %v9167_v16, %v9181_v13  ;;  %v3595_v16 = vadd.f32 %v9175_v11, %v9185_v48 }
 0x4ce   : > { %v4261_v51 = vpop.f32.mrf.mxu1 }
 0x4cf   : > { %v9287_v23 = vmax.f32 %v4330_v54, %v4331_v14  ;;  %v4332_v45 = vadd.f32 %v4261_v51, %v4081_v5  ;;  %v4052_v51 = vpop.f32.mrf.mxu0 }
 0x4d0   : > { %v4263_v4 = vpop.f32.mrf.mxu1  ;;  %v4095_v52 = vadd.f32 %v4052_v51, %v9254_v63 }
 0x4d1   : > { %v4333_v40 = vadd.f32 %v4263_v4, %v4082_v47 }
 0x4d2   : > { %v4267_v12 = vpop.f32.mrf.mxu1 }
 0x4d3   : > { %v9291_v49 = vmax.f32 %v4332_v45, %v4333_v40  ;;  %v4334_v37 = vadd.f32 %v4267_v12, %v4083_v17  ;;  %v4054_v45 = vpop.f32.mrf.mxu0 }
 0x4d4   : > { %v4269_v33 = vpop.f32.mrf.mxu1  ;;  %v4096_v38 = vadd.f32 %v4054_v45, %v9257_v25 }
 0x4d5   : > { %v4335_v1 = vadd.f32 %v4269_v33, %v4084_v35  ;;  %v4058_v35 = vpop.f32.mrf.mxu0 }
 0x4d6   : > { %v4273_v54 = vpop.f32.mrf.mxu1  ;;  %v4097_v63 = vadd.f32 %v4058_v35, %v9260_v3 }
 0x4d7   : > { %v9295_v41 = vmax.f32 %v4334_v37, %v4335_v1  ;;  %v4336_v19 = vadd.f32 %v4273_v54, %v4085_v59  ;;  %v4060_v54 = vpop.f32.mrf.mxu0 }
 0x4d8   : > { %v4275_v30 = vpop.f32.mrf.mxu1  ;;  %v4098_v25 = vadd.f32 %v4060_v54, %v9263_v60  ;;  %v4629_v54 = vld [vmem:[%s9948_s7 + $0x70] sm:$0xff] }
 0x4d9   : > { %v4337_v14 = vadd.f32 %v4275_v30, %v4086_v32 }
 0x4da   : > { %v4279_v5 = vpop.f32.mrf.mxu1 }
 0x4db   : > { %v9299_v47 = vmax.f32 %v4336_v19, %v4337_v14  ;;  %v4338_v36 = vadd.f32 %v4279_v5, %v4087_v53  ;;  %v4064_v19 = vpop.f32.mrf.mxu0  ;;  %v3847_v53 = vadd.f32 %v9265_v43, %v3589_v28  ;;  %v5776_v28 = vld [vmem:[%s9948_s7 + $0xa8] sm:$0xff] }
 0x4dc   : > { %v4281_v34 = vpop.f32.mrf.mxu1 }
 0x4dd   : > { %v4339_v4 = vadd.f32 %v4281_v34, %v4088_v42  ;;  %v4066_v7 = vpop.f32.mrf.mxu0  ;;  %v3848_v34 = vadd.f32 %v9267_v46, %v3591_v15  ;;  %v4099_v43 = vadd.f32 %v4064_v19, %v3847_v53  ;;  %v3849_v46 = vadd.f32 %v9269_v44, %v3595_v16  ;;  %v4368_v44 = vld [vmem:[%s9946_s5] sm:$0xff]  ;;  %v4625_v19 = vld [vmem:[%s9948_s7 + $0x50] sm:$0xff] }
 0x4de   : > { %v4285_v40 = vpop.f32.mrf.mxu1  ;;  %v4621_v15 = vld [vmem:[%s9948_s7 + $0x30] sm:$0xff]  ;;  %v5775_v53 = vld [vmem:[%s9948_s7 + $0xa0] sm:$0xff] }
 0x4df   : > { %v9303_v12 = vmax.f32 %v4338_v36, %v4339_v4  ;;  %v4340_v50 = vadd.f32 %v4285_v40, %v4089_v8  ;;  %v4070_v4 = vpop.f32.mrf.mxu0  ;;  %v3850_v40 = vadd.f32 %v9271_v61, %v3597_v21  ;;  %v4100_v3 = vadd.f32 %v4066_v7, %v3848_v34  ;;  %v4369_v61 = vld [vmem:[%s9946_s5 + $0x8] sm:$0xff]  ;;  %v4618_v7 = vld [vmem:[%s9948_s7 + $0x18] sm:$0xff]  ;;  %v5771_v16 = vld [vmem:[%s9948_s7 + $0x80] sm:$0xff] }
 0x4e0   : > { %v4287_v18 = vpop.f32.mrf.mxu1  ;;  %v4101_v48 = vadd.f32 %v4070_v4, %v3849_v46  ;;  %v5774_v34 = vld [vmem:[%s9948_s7 + $0x98] sm:$0xff] }
 0x4e1   : > { %v4341_v17 = vadd.f32 %v4287_v18, %v4090_v57 }
 0x4e2   : > { %v4291_v33 = vpop.f32.mrf.mxu1 }
 0x4e3   : > { %v9307_v37 = vmax.f32 %v4340_v50, %v4341_v17  ;;  %v4342_v10 = vadd.f32 %v4291_v33, %v4091_v9  ;;  %v4072_v50 = vpop.f32.mrf.mxu0 }
 0x4e4   : > { %v4293_v24 = vpop.f32.mrf.mxu1  ;;  %v4102_v35 = vadd.f32 %v4072_v50, %v3850_v40 }
 0x4e5   : > { %v4343_v1 = vadd.f32 %v4293_v24, %v4092_v39  ;;  %v4370_v39 = vld [vmem:[%s9946_s5 + $0x10] sm:$0xff]  ;;  %v4371_v24 = vld [vmem:[%s9946_s5 + $0x18] sm:$0xff] }
 0x4e6   : > { %v4297_v59 = vpop.f32.mrf.mxu1 }
 0x4e7   : > { %v9311_v32 = vmax.f32 %v4342_v10, %v4343_v1  ;;  %v4344_v27 = vadd.f32 %v4297_v59, %v4093_v29  ;;  %v4372_v10 = vld [vmem:[%s9946_s5 + $0x20] sm:$0xff]  ;;  %v5782_v59 = vld [vmem:[%s9948_s7 + $0xd8] sm:$0xff]  ;;  %v5781_v29 = vld [vmem:[%s9948_s7 + $0xd0] sm:$0xff] }
 0x4e8   : > { %v4299_v58 = vpop.f32.mrf.mxu1  ;;  %v5783_v1 = vld [vmem:[%s9948_s7 + $0xe0] sm:$0xff] }
 0x4e9   : > { %v4345_v30 = vadd.f32 %v4299_v58, %v4094_v62  ;;  %v4627_v62 = vld [vmem:[%s9948_s7 + $0x60] sm:$0xff]  ;;  %v5780_v58 = vld [vmem:[%s9948_s7 + $0xc8] sm:$0xff] }
 0x4ea   : > { %v4303_v14 = vpop.f32.mrf.mxu1 }
 0x4eb   : > { %v9315_v5 = vmax.f32 %v4344_v27, %v4345_v30  ;;  %v4346_v0 = vadd.f32 %v4303_v14, %v4095_v52  ;;  %v4626_v27 = vld [vmem:[%s9948_s7 + $0x58] sm:$0xff]  ;;  %v5779_v30 = vld [vmem:[%s9948_s7 + $0xc0] sm:$0xff]  ;;  %v5777_v52 = vld [vmem:[%s9948_s7 + $0xb0] sm:$0xff] }
 0x4ec   : > { %v4305_v31 = vpop.f32.mrf.mxu1  ;;  %v5778_v14 = vld [vmem:[%s9948_s7 + $0xb8] sm:$0xff] }
 0x4ed   : > { %v4347_v2 = vadd.f32 %v4305_v31, %v4096_v38  ;;  %v4623_v38 = vld [vmem:[%s9948_s7 + $0x40] sm:$0xff]  ;;  %v4622_v31 = vld [vmem:[%s9948_s7 + $0x38] sm:$0xff] }
 0x4ee   : > { %v4309_v42 = vpop.f32.mrf.mxu1 }
 0x4ef   : > { %v9325_v36 = vmax.f32 %v4346_v0, %v4347_v2  ;;  %v4348_v13 = vadd.f32 %v4309_v42, %v4097_v63  ;;  %v4620_v0 = vld [vmem:[%s9948_s7 + $0x28] sm:$0xff]  ;;  %v4619_v2 = vld [vmem:[%s9948_s7 + $0x20] sm:$0xff]  ;;  %v4617_v42 = vld [vmem:[%s9948_s7 + $0x10] sm:$0xff] }
 0x4f0   : > { %v4311_v51 = vpop.f32.mrf.mxu1  ;;  %v5773_v63 = vld [vmem:[%s9948_s7 + $0x90] sm:$0xff] }
 0x4f1   : > { %v4349_v56 = vadd.f32 %v4311_v51, %v4098_v25  ;;  %v4615_v25 = vld [vmem:[%s9948_s7] sm:$0xff]  ;;  %v5772_v51 = vld [vmem:[%s9948_s7 + $0x88] sm:$0xff] }
 0x4f2   : > { %v4315_v45 = vpop.f32.mrf.mxu1 }
 0x4f3   : > { %v4365_v8 = vmax.f32 %v4348_v13, %v4349_v56  ;;  %v4350_v60 = vadd.f32 %v4315_v45, %v4099_v43 }
 0x4f4   : > { %v4317_v57 = vpop.f32.mrf.mxu1 }
 0x4f5   : > { %v4351_v18 = vadd.f32 %v4317_v57, %v4100_v3 }
 0x4f6   : > { %v4321_v17 = vpop.f32.mrf.mxu1 }
 0x4f7   : > { %v4366_v11 = vmax.f32 %v4350_v60, %v4351_v18  ;;  %v4352_v26 = vadd.f32 %v4321_v17, %v4101_v48  ;;  %v9578_v60 = vld [vmem:[%s9947_s6] ss:$0 sm:$0xff] }
 0x4f8   : > { %v4323_v55 = vpop.f32.mrf.mxu1 }
 0x4f9   : > { %v4353_v33 = vadd.f32 %v4323_v55, %v4102_v35  ;;  %v5818_v55 = vld [vmem:[%s9948_s7 + $0x1f8] sm:$0xff] }
 0x4fb   : > { %v4367_v9 = vmax.f32 %v4352_v26, %v4353_v33 }
 0x4fd   : > { %6146 = vmatpush3.msk.msra.mxu0 %vm2786_vm2, %v4367_v9 }
 0x4fe   : > { %6147 = vmatprep.subr.mxu0 %v10122_v6 }
 0x4ff   : > { %6148 = vmatpush3.msra.mxu0 %v4366_v11 }
 0x500   : > { %6149 = vmatprep.subr.mxu0 %v10122_v6 }
 0x501   : > { %6150 = vmatpush3.msra.mxu0 %v4365_v8 }
 0x502   : > { %6151 = vmatprep.subr.mxu0 %v10122_v6 }
 0x503   : > { %6152 = vmatpush3.msra.mxu0 %v9325_v36 }
 0x504   : > { %6153 = vmatprep.subr.mxu0 %v10122_v6 }
 0x505   : > { %6154 = vmatpush3.msra.mxu0 %v9315_v5 }
 0x506   : > { %6155 = vmatprep.subr.mxu0 %v10122_v6 }
 0x507   : > { %6156 = vmatpush3.msra.mxu0 %v9311_v32 }
 0x508   : > { %6157 = vmatprep.subr.mxu0 %v10122_v6 }
 0x509   : > { %6158 = vmatpush3.msra.mxu0 %v9307_v37 }
 0x50a   : > { %6159 = vmatprep.subr.mxu0 %v10122_v6 }
 0x50b   : > { %6160 = vmatpush3.msra.mxu0 %v9303_v12 }
 0x50c   : > { %6161 = vmatprep.subr.mxu0 %v10122_v6 }
 0x50d   : > { %6162 = vmatpush3.msra.mxu0 %v9299_v47 }
 0x50e   : > { %6163 = vmatprep.subr.mxu0 %v10122_v6 }
 0x50f   : > { %6164 = vmatpush3.msra.mxu0 %v9295_v41 }
 0x510   : > { %6165 = vmatprep.subr.mxu0 %v10122_v6 }
 0x511   : > { %6166 = vmatpush3.msra.mxu0 %v9291_v49 }
 0x512   : > { %6167 = vmatprep.subr.mxu0 %v10122_v6 }
 0x513   : > { %6168 = vmatpush3.msra.mxu0 %v9287_v23 }
 0x514   : > { %6169 = vmatprep.subr.mxu0 %v10122_v6 }
 0x515   : > { %6170 = vmatpush3.msra.mxu0 %v9283_v20 }
 0x516   : > { %6171 = vmatprep.subr.mxu0 %v10122_v6 }
 0x517   : > { %6172 = vmatpush3.msra.mxu0 %v9279_v22 }
 0x518   : > { %6188 = vmatprep.subr.mxu0 %v10122_v6  ;;  %6174 = vmatmul.mubr.msk.f32.vlgmr.msra.gmra.mxu0 %vm4373_vm7, %v4368_v44 }
 0x519   : > { %6189 = vmatpush3.msk.msra.mxu0 %vm2786_vm2, %v4367_v9  ;;  %6176 = vmatprep.mubr.msk.f32.mxu0 %vm6495_vm6, %v10122_v6  ;;  %v5817_v9 = vld [vmem:[%s9948_s7 + $0x1f0] sm:$0xff] }
 0x51a   : > { %6190 = vmatprep.subr.mxu0 %v10122_v6 }
 0x51b   : > { %6191 = vmatpush3.msra.mxu0 %v4366_v11 }
 0x51c   : > { %6192 = vmatprep.subr.mxu0 %v10122_v6  ;;  %6177 = vmatmul.mubr.msk.f32.gmra.mxu0 %vm4373_vm7, %v4369_v61 }
 0x51d   : > { %6193 = vmatpush3.msra.mxu0 %v4365_v8  ;;  %6179 = vmatprep.mubr.msk.f32.mxu0 %vm6495_vm6, %v10122_v6 }
 0x51e   : > { %6194 = vmatprep.subr.mxu0 %v10122_v6 }
 0x51f   : > { %6195 = vmatpush3.msra.mxu0 %v9325_v36  ;;  %v4616_v36 = vld [vmem:[%s9948_s7 + $0x8] sm:$0xff] }
 0x520   : > { %6196 = vmatprep.subr.mxu0 %v10122_v6  ;;  %6180 = vmatmul.mubr.msk.f32.gmra.mxu0 %vm4373_vm7, %v4370_v39  ;;  %v5802_v39 = vld [vmem:[%s9948_s7 + $0x178] sm:$0xff] }
 0x521   : > { %6197 = vmatpush3.msra.mxu0 %v9315_v5  ;;  %6182 = vmatprep.mubr.msk.f32.mxu0 %vm6495_vm6, %v10122_v6  ;;  %v4624_v5 = vld [vmem:[%s9948_s7 + $0x48] sm:$0xff] }
 0x522   : > { %6198 = vmatprep.subr.mxu0 %v10122_v6 }
 0x523   : > { %6199 = vmatpush3.msra.mxu0 %v9311_v32  ;;  %v4628_v32 = vld [vmem:[%s9948_s7 + $0x68] sm:$0xff] }
 0x524   : > { %6200 = vmatprep.subr.mxu0 %v10122_v6  ;;  %6183 = vmatmul.mubr.msk.f32.gmra.mxu0 %vm4373_vm7, %v4371_v24  ;;  %v5816_v24 = vld [vmem:[%s9948_s7 + $0x1e8] sm:$0xff] }
 0x525   : > { %6201 = vmatpush3.msra.mxu0 %v9307_v37  ;;  %6185 = vmatprep.mubr.msk.f32.mxu0 %vm6495_vm6, %v10122_v6  ;;  %v4630_v37 = vld [vmem:[%s9948_s7 + $0x78] sm:$0xff] }
 0x526   : > { %6202 = vmatprep.subr.mxu0 %v10122_v6 }
 0x527   : > { %6203 = vmatpush3.msra.mxu0 %v9303_v12  ;;  %v5784_v12 = vld [vmem:[%s9948_s7 + $0xe8] sm:$0xff] }
 0x528   : > { %6204 = vmatprep.subr.mxu0 %v10122_v6  ;;  %6186 = vmatmul.mubr.msk.f32.gmra.mxu0 %vm4373_vm7, %v4372_v10 }
 0x529   : > { %6205 = vmatpush3.msra.mxu0 %v9299_v47  ;;  %6216 = vmatprep.mubr.msk.f32.mxu0 %vm6495_vm6, %v10122_v6  ;;  %v5759_v47 = vld [vmem:[%s9946_s5 + $0x28] sm:$0xff] }
 0x52a   : > { %6206 = vmatprep.subr.mxu0 %v10122_v6 }
 0x52b   : > { %6207 = vmatpush3.msra.mxu0 %v9295_v41  ;;  %v5785_v41 = vld [vmem:[%s9948_s7 + $0xf0] sm:$0xff] }
 0x52c   : > { %6208 = vmatprep.subr.mxu0 %v10122_v6  ;;  %6234 = vmatpush3.msra.mxu1 %v5785_v41 }
 0x52d   : > { %6209 = vmatpush3.msra.mxu0 %v9291_v49  ;;  %v5763_v49 = vld [vmem:[%s9946_s5 + $0x48] sm:$0xff]  ;;  %6235 = vmatprep.subr.mxu1 %v10122_v6 }
 0x52e   : > { %6210 = vmatprep.subr.mxu0 %v10122_v6  ;;  %6236 = vmatpush3.msra.mxu1 %v5784_v12  ;;  %v5799_v12 = vld [vmem:[%s9948_s7 + $0x160] sm:$0xff] }
 0x52f   : > { %6211 = vmatpush3.msra.mxu0 %v9287_v23  ;;  %v5760_v23 = vld [vmem:[%s9946_s5 + $0x30] sm:$0xff]  ;;  %6237 = vmatprep.subr.mxu1 %v10122_v6 }
 0x530   : > { %6212 = vmatprep.subr.mxu0 %v10122_v6  ;;  %6238 = vmatpush3.msra.mxu1 %v5783_v1 }
 0x531   : > { %6213 = vmatpush3.msra.mxu0 %v9283_v20  ;;  %v5762_v20 = vld [vmem:[%s9946_s5 + $0x40] sm:$0xff]  ;;  %6239 = vmatprep.subr.mxu1 %v10122_v6 }
 0x532   : > { %6214 = vmatprep.subr.mxu0 %v10122_v6  ;;  %6240 = vmatpush3.msra.mxu1 %v5782_v59 }
 0x533   : > { %6215 = vmatpush3.msra.mxu0 %v9279_v22  ;;  %v5761_v22 = vld [vmem:[%s9946_s5 + $0x38] sm:$0xff]  ;;  %6241 = vmatprep.subr.mxu1 %v10122_v6 }
 0x534   : > { %6217 = vmatmul.mubr.msk.f32.vlgmr.msra.gmra.mxu0 %vm4373_vm7, %v5759_v47  ;;  %6266 = vmatprep.subr.mxu0 %v10122_v6  ;;  %v5801_v47 = vld [vmem:[%s9948_s7 + $0x170] sm:$0xff] }
 0x535   : > { %6219 = vmatprep.mubr.msk.f32.mxu0 %vm6495_vm6, %v10122_v6  ;;  %6267 = vmatpush3.msra.mxu0 %v4630_v37  ;;  %v5813_v37 = vld [vmem:[%s9948_s7 + $0x1d0] sm:$0xff] }
 0x536   : > { %6268 = vmatprep.subr.mxu0 %v10122_v6  ;;  %6242 = vmatpush3.msra.mxu1 %v5781_v29 }
 0x537   : > { %6269 = vmatpush3.msra.mxu0 %v4629_v54  ;;  %6243 = vmatprep.subr.mxu1 %v10122_v6  ;;  %v5798_v54 = vld [vmem:[%s9948_s7 + $0x158] sm:$0xff] }
 0x538   : > { %6220 = vmatmul.mubr.msk.f32.gmra.mxu0 %vm4373_vm7, %v5760_v23  ;;  %6270 = vmatprep.subr.mxu0 %v10122_v6  ;;  %v5815_v23 = vld [vmem:[%s9948_s7 + $0x1e0] sm:$0xff] }
 0x539   : > { %6222 = vmatprep.mubr.msk.f32.mxu0 %vm6495_vm6, %v10122_v6  ;;  %6271 = vmatpush3.msra.mxu0 %v4628_v32  ;;  %v5812_v32 = vld [vmem:[%s9948_s7 + $0x1c8] sm:$0xff] }
 0x53a   : > { %6272 = vmatprep.subr.mxu0 %v10122_v6  ;;  %6244 = vmatpush3.msra.mxu1 %v5780_v58 }
 0x53b   : > { %6273 = vmatpush3.msra.mxu0 %v4627_v62  ;;  %6245 = vmatprep.subr.mxu1 %v10122_v6  ;;  %v5797_v62 = vld [vmem:[%s9948_s7 + $0x150] sm:$0xff] }
 0x53c   : > { %6223 = vmatmul.mubr.msk.f32.gmra.mxu0 %vm4373_vm7, %v5761_v22  ;;  %6274 = vmatprep.subr.mxu0 %v10122_v6 }
 0x53d   : > { %6225 = vmatprep.mubr.msk.f32.mxu0 %vm6495_vm6, %v10122_v6  ;;  %6275 = vmatpush3.msra.mxu0 %v4626_v27  ;;  %v5811_v27 = vld [vmem:[%s9948_s7 + $0x1c0] sm:$0xff] }
 0x53e   : > { %6246 = vmatpush3.msra.mxu1 %v5779_v30  ;;  %6276 = vmatprep.subr.mxu0 %v10122_v6  ;;  %v5796_v30 = vld [vmem:[%s9948_s7 + $0x148] sm:$0xff] }
 0x53f   : > { %6247 = vmatprep.subr.mxu1 %v10122_v6  ;;  %6277 = vmatpush3.msra.mxu0 %v4625_v19  ;;  %v5810_v19 = vld [vmem:[%s9948_s7 + $0x1b8] sm:$0xff] }
 0x540   : > { %6226 = vmatmul.mubr.msk.f32.gmra.mxu0 %vm4373_vm7, %v5762_v20  ;;  %6248 = vmatpush3.msra.mxu1 %v5778_v14  ;;  %v5800_v20 = vld [vmem:[%s9948_s7 + $0x168] sm:$0xff]  ;;  %v5795_v14 = vld [vmem:[%s9948_s7 + $0x140] sm:$0xff] }
 0x541   : > { %6228 = vmatprep.mubr.msk.f32.mxu0 %vm6495_vm6, %v10122_v6  ;;  %6278 = vmatprep.subr.mxu0 %v10122_v6 }
 0x542   : > { %6249 = vmatprep.subr.mxu1 %v10122_v6  ;;  %6279 = vmatpush3.msra.mxu0 %v4624_v5  ;;  %v5809_v5 = vld [vmem:[%s9948_s7 + $0x1b0] sm:$0xff] }
 0x543   : > { %6250 = vmatpush3.msra.mxu1 %v5777_v52  ;;  %6280 = vmatprep.subr.mxu0 %v10122_v6  ;;  %v5794_v52 = vld [vmem:[%s9948_s7 + $0x138] sm:$0xff] }
 0x544   : > { %6229 = vmatmul.mubr.msk.f32.gmra.mxu0 %vm4373_vm7, %v5763_v49  ;;  %6251 = vmatprep.subr.mxu1 %v10122_v6  ;;  %v5814_v49 = vld [vmem:[%s9948_s7 + $0x1d8] sm:$0xff] }
 0x545   : > { %6298 = vmatprep.mubr.msk.f32.mxu0 %vm6495_vm6, %v10122_v6  ;;  %6281 = vmatpush3.msra.mxu0 %v4623_v38  ;;  %v5808_v38 = vld [vmem:[%s9948_s7 + $0x1a8] sm:$0xff] }
 0x546   : > { %6252 = vmatpush3.msra.mxu1 %v5776_v28  ;;  %6282 = vmatprep.subr.mxu0 %v10122_v6  ;;  %v5793_v28 = vld [vmem:[%s9948_s7 + $0x130] sm:$0xff] }
 0x547   : > { %6253 = vmatprep.subr.mxu1 %v10122_v6  ;;  %6283 = vmatpush3.msra.mxu0 %v4622_v31  ;;  %v5807_v31 = vld [vmem:[%s9948_s7 + $0x1a0] sm:$0xff] }
 0x548   : > { %6284 = vmatprep.subr.mxu0 %v10122_v6  ;;  %6254 = vmatpush3.msra.mxu1 %v5775_v53  ;;  %v5805_v53 = vld [vmem:[%s9948_s7 + $0x190] sm:$0xff] }
 0x549   : > { %6285 = vmatpush3.msra.mxu0 %v4621_v15  ;;  %6255 = vmatprep.subr.mxu1 %v10122_v6  ;;  %v5792_v15 = vld [vmem:[%s9948_s7 + $0x128] sm:$0xff] }
 0x54a   : > { %6286 = vmatprep.subr.mxu0 %v10122_v6  ;;  %6256 = vmatpush3.msra.mxu1 %v5774_v34 }
 0x54b   : > { %6287 = vmatpush3.msra.mxu0 %v4620_v0  ;;  %6257 = vmatprep.subr.mxu1 %v10122_v6 }
 0x54c   : > { %6288 = vmatprep.subr.mxu0 %v10122_v6  ;;  %6258 = vmatpush3.msra.mxu1 %v5773_v63  ;;  %v5804_v63 = vld [vmem:[%s9948_s7 + $0x188] sm:$0xff] }
 0x54d   : > { %6289 = vmatpush3.msra.mxu0 %v4619_v2  ;;  %6259 = vmatprep.subr.mxu1 %v10122_v6  ;;  %v5806_v2 = vld [vmem:[%s9948_s7 + $0x198] sm:$0xff] }
 0x54e   : > { %6290 = vmatprep.subr.mxu0 %v10122_v6  ;;  %6260 = vmatpush3.msra.mxu1 %v5772_v51  ;;  %v5803_v51 = vld [vmem:[%s9948_s7 + $0x180] sm:$0xff] }
 0x54f   : > { %6291 = vmatpush3.msra.mxu0 %v4618_v7  ;;  %6261 = vmatprep.subr.mxu1 %v10122_v6  ;;  %v5791_v7 = vld [vmem:[%s9948_s7 + $0x120] sm:$0xff] }
 0x550   : > { %6292 = vmatprep.subr.mxu0 %v10122_v6  ;;  %6262 = vmatpush3.msra.mxu1 %v5771_v16 }
 0x551   : > { %6293 = vmatpush3.msra.mxu0 %v4617_v42  ;;  %6301 = vmatprep.subr.mxu1 %v10122_v6  ;;  %v5790_v42 = vld [vmem:[%s9948_s7 + $0x118] sm:$0xff] }
 0x552   : > { %6294 = vmatprep.subr.mxu0 %v10122_v6 }
 0x553   : > { %6295 = vmatpush3.msra.mxu0 %v4616_v36 }
 0x554   : > { %6296 = vmatprep.subr.mxu0 %v10122_v6 }
 0x555   : > { %6297 = vmatpush3.msra.mxu0 %v4615_v25  ;;  %v5789_v25 = vld [vmem:[%s9948_s7 + $0x110] sm:$0xff] }
 0x556   : > { %6336 = vmatprep.subr.mxu0 %v10122_v6 }
 0x5d8   : > { %v4458_v21 = vpop.f32.mrf.mxu0 }
 0x5da   : > { %v6175_v13 = vpop.f32.mrf.mxu0 }
 0x5dc   : > { %v4463_v56 = vpop.f32.mrf.mxu0 }
 0x5de   : > { %v6178_v4 = vpop.f32.mrf.mxu0 }
 0x5df   : > { %v5076_v4 = vld [vmem:[%s9950_s9 + $0x78] sm:$0xff] }
 0x5e0   : > { %v9571_v43 = vpop.f32.mrf.mxu0 }
 0x5e2   : > { %v6181_v45 = vpop.f32.mrf.mxu0 }
 0x5e3   : > { %v5834_v45 = vld [vmem:[%s9948_s7 + $0x278] sm:$0xff] }
 0x5e4   : > { %v9573_v46 = vpop.f32.mrf.mxu0 }
 0x5e6   : > { %v6184_v40 = vpop.f32.mrf.mxu0 }
 0x5e7   : > { %v5075_v40 = vld [vmem:[%s9950_s9 + $0x70] sm:$0xff] }
 0x5e8   : > { %v4478_v8 = vpop.f32.mrf.mxu0 }
 0x5ea   : > { %v6187_v3 = vpop.f32.mrf.mxu0 }
 0x5eb   : > { %v5074_v3 = vld [vmem:[%s9950_s9 + $0x68] sm:$0xff] }
 0x5f4   : > { %v4569_v57 = vpop.f32.mrf.mxu0 }
 0x5f5   : > { %v4593_v18 = vmax.f32 %v4458_v21, %v4569_v57  ;;  %v5788_v21 = vld [vmem:[%s9948_s7 + $0x108] sm:$0xff]  ;;  %v5831_v57 = vld [vmem:[%s9948_s7 + $0x260] sm:$0xff] }
 0x5f6   : > { %v6218_v50 = vpop.f32.mrf.mxu0 }
 0x5f7   : > { %v4605_v17 = vadd.f32 %v9578_v60, %v4593_v18  ;;  %v5830_v18 = vld [vmem:[%s9948_s7 + $0x258] sm:$0xff] }
 0x5f8   : > { %v4574_v11 = vpop.f32.mrf.mxu0  ;;  %v5072_v50 = vld [vmem:[%s9950_s9 + $0x58] sm:$0xff] }
 0x5f9   : > { %v4610_v48 = vmax.f32 %v4605_v17, 0.0  ;;  %v4594_v35 = vmax.f32 %v4463_v56, %v4574_v11  ;;  %v5787_v56 = vld [vmem:[%s9948_s7 + $0x100] sm:$0xff]  ;;  %v5829_v17 = vld [vmem:[%s9948_s7 + $0x250] sm:$0xff] }
 0x5fa   : > { %v6221_v26 = vpop.f32.mrf.mxu0  ;;  %v5071_v11 = vld [vmem:[%s9950_s9 + $0x50] sm:$0xff] }
 0x5fb   : > { %v4606_v33 = vadd.f32 %v9578_v60, %v4594_v35  ;;  %6299 = vmatmul.mubr.f32.vlgmr.msra.gmra.mxu0 %v4610_v48  ;;  %v5828_v48 = vld [vmem:[%s9948_s7 + $0x248] sm:$0xff]  ;;  %v5069_v26 = vld [vmem:[%s9950_s9 + $0x40] sm:$0xff] }
 0x5fc   : > { %v9588_v44 = vpop.f32.mrf.mxu0  ;;  %6337 = vmatpush3.msra.mxu0 %v5818_v55  ;;  %6368 = vmatprep.mubr.msk.f32.mxu0 %vm6495_vm6, %v10122_v6  ;;  %v5070_v35 = vld [vmem:[%s9950_s9 + $0x48] sm:$0xff]  ;;  %v5827_v55 = vld [vmem:[%s9948_s7 + $0x240] sm:$0xff] }
 0x5fd   : > { %v4611_v61 = vmax.f32 %v4606_v33, 0.0  ;;  %6338 = vmatprep.subr.mxu0 %v10122_v6  ;;  %v4595_v34 = vmax.f32 %v9571_v43, %v9588_v44  ;;  %v5826_v33 = vld [vmem:[%s9948_s7 + $0x238] sm:$0xff]  ;;  %v5824_v44 = vld [vmem:[%s9948_s7 + $0x228] sm:$0xff] }
 0x5fe   : > { %6339 = vmatpush3.msra.mxu0 %v5817_v9  ;;  %v6224_v10 = vpop.f32.mrf.mxu0  ;;  %v5825_v9 = vld [vmem:[%s9948_s7 + $0x230] sm:$0xff] }
 0x5ff   : > { %6264 = vmatmul.mubr.f32.vlgmr.msra.gmra.mxu1 %v4611_v61  ;;  %6340 = vmatprep.subr.mxu0 %v10122_v6  ;;  %v4607_v16 = vadd.f32 %v9578_v60, %v4595_v34  ;;  %v5823_v61 = vld [vmem:[%s9948_s7 + $0x220] sm:$0xff]  ;;  %v5820_v10 = vld [vmem:[%s9948_s7 + $0x208] sm:$0xff] }
 0x600   : > { %6302 = vmatpush3.msra.mxu1 %v5802_v39  ;;  %6333 = vmatprep.mubr.msk.f32.mxu1 %vm6495_vm6, %v10122_v6  ;;  %v9608_v22 = vpop.f32.mrf.mxu0  ;;  %v5822_v39 = vld [vmem:[%s9948_s7 + $0x218] sm:$0xff] }
 0x601   : > { %6303 = vmatprep.subr.mxu1 %v10122_v6  ;;  %6341 = vmatpush3.msra.mxu0 %v5816_v24  ;;  %v4596_v0 = vmax.f32 %v9573_v46, %v9608_v22  ;;  %v4612_v43 = vmax.f32 %v4607_v16, 0.0  ;;  %v5833_v46 = vld [vmem:[%s9948_s7 + $0x270] sm:$0xff]  ;;  %v5068_v22 = vld [vmem:[%s9950_s9 + $0x38] sm:$0xff]  ;;  %v5835_v16 = vld [vmem:[%s9949_s8] ss:$0 sm:$0xff] }
 0x602   : > { %6304 = vmatpush3.msra.mxu1 %v5801_v47  ;;  %6342 = vmatprep.subr.mxu0 %v10122_v6  ;;  %v6227_v41 = vpop.f32.mrf.mxu0  ;;  %v5821_v24 = vld [vmem:[%s9948_s7 + $0x210] sm:$0xff]  ;;  %v5819_v47 = vld [vmem:[%s9948_s7 + $0x200] sm:$0xff] }
 0x603   : > { %6305 = vmatprep.subr.mxu1 %v10122_v6  ;;  %6343 = vmatpush3.msra.mxu0 %v5815_v23  ;;  %v4608_v36 = vadd.f32 %v9578_v60, %v4596_v0  ;;  %v5065_v41 = vld [vmem:[%s9950_s9 + $0x20] sm:$0xff] }
 0x604   : > { %6306 = vmatpush3.msra.mxu1 %v5800_v20  ;;  %6344 = vmatprep.subr.mxu0 %v10122_v6  ;;  %v4589_v1 = vpop.f32.mrf.mxu0  ;;  %v5067_v20 = vld [vmem:[%s9950_s9 + $0x30] sm:$0xff] }
 0x605   : > { %6307 = vmatprep.subr.mxu1 %v10122_v6  ;;  %6345 = vmatpush3.msra.mxu0 %v5814_v49  ;;  %v4597_v59 = vmax.f32 %v4478_v8, %v4589_v1  ;;  %v4613_v13 = vmax.f32 %v4608_v36, 0.0  ;;  %v5832_v8 = vld [vmem:[%s9948_s7 + $0x268] sm:$0xff] }
 0x606   : > { %6308 = vmatpush3.msra.mxu1 %v5799_v12  ;;  %6346 = vmatprep.subr.mxu0 %v10122_v6  ;;  %v6230_v29 = vpop.f32.mrf.mxu0  ;;  %v5066_v49 = vld [vmem:[%s9950_s9 + $0x28] sm:$0xff]  ;;  %v5064_v12 = vld [vmem:[%s9950_s9 + $0x18] sm:$0xff] }
 0x607   : > { %6309 = vmatprep.subr.mxu1 %v10122_v6  ;;  %6347 = vmatpush3.msra.mxu0 %v5813_v37  ;;  %v9639_v58 = vadd.f32 %v9578_v60, %v4597_v59  ;;  %v5073_v60 = vld [vmem:[%s9950_s9 + $0x60] sm:$0xff]  ;;  %v5063_v37 = vld [vmem:[%s9950_s9 + $0x10] sm:$0xff]  ;;  %v5062_v1 = vld [vmem:[%s9950_s9 + $0x8] sm:$0xff] }
 0x608   : > { %6310 = vmatpush3.msra.mxu1 %v5798_v54  ;;  %6348 = vmatprep.subr.mxu0 %v10122_v6  ;;  %v5061_v54 = vld [vmem:[%s9950_s9] sm:$0xff]  ;;  %v5170_v59 = vld [vmem:[%s9952_s11 + $0x78] sm:$0xff]  ;;  %v5168_v29 = vld [vmem:[%s9952_s11 + $0x68] sm:$0xff] }
 0x609   : > { %6311 = vmatprep.subr.mxu1 %v10122_v6  ;;  %6349 = vmatpush3.msra.mxu0 %v5812_v32  ;;  %v4614_v23 = vmax.f32 %v9639_v58, 0.0  ;;  %v5169_v32 = vld [vmem:[%s9952_s11 + $0x70] sm:$0xff]  ;;  %v5166_v58 = vld [vmem:[%s9952_s11 + $0x58] sm:$0xff] }
 0x60a   : > { %6312 = vmatpush3.msra.mxu1 %v5797_v62  ;;  %6350 = vmatprep.subr.mxu0 %v10122_v6  ;;  %v5167_v62 = vld [vmem:[%s9952_s11 + $0x60] sm:$0xff] }
 0x60b   : > { %6313 = vmatprep.subr.mxu1 %v10122_v6  ;;  %6351 = vmatpush3.msra.mxu0 %v5811_v27  ;;  %v5165_v27 = vld [vmem:[%s9952_s11 + $0x50] sm:$0xff] }
 0x60c   : > { %6314 = vmatpush3.msra.mxu1 %v5796_v30  ;;  %6352 = vmatprep.subr.mxu0 %v10122_v6  ;;  %v5164_v30 = vld [vmem:[%s9952_s11 + $0x48] sm:$0xff] }
 0x60d   : > { %6315 = vmatprep.subr.mxu1 %v10122_v6  ;;  %6353 = vmatpush3.msra.mxu0 %v5810_v19  ;;  %v5163_v19 = vld [vmem:[%s9952_s11 + $0x40] sm:$0xff] }
 0x60e   : > { %6316 = vmatpush3.msra.mxu1 %v5795_v14  ;;  %6354 = vmatprep.subr.mxu0 %v10122_v6  ;;  %v5162_v14 = vld [vmem:[%s9952_s11 + $0x38] sm:$0xff] }
 0x60f   : > { %6317 = vmatprep.subr.mxu1 %v10122_v6  ;;  %6355 = vmatpush3.msra.mxu0 %v5809_v5  ;;  %v5161_v5 = vld [vmem:[%s9952_s11 + $0x30] sm:$0xff] }
 0x610   : > { %6318 = vmatpush3.msra.mxu1 %v5794_v52  ;;  %6356 = vmatprep.subr.mxu0 %v10122_v6  ;;  %v5160_v52 = vld [vmem:[%s9952_s11 + $0x28] sm:$0xff] }
 0x611   : > { %6319 = vmatprep.subr.mxu1 %v10122_v6  ;;  %6357 = vmatpush3.msra.mxu0 %v5808_v38  ;;  %v5159_v38 = vld [vmem:[%s9952_s11 + $0x20] sm:$0xff] }
 0x612   : > { %6320 = vmatpush3.msra.mxu1 %v5793_v28  ;;  %6358 = vmatprep.subr.mxu0 %v10122_v6  ;;  %v5158_v28 = vld [vmem:[%s9952_s11 + $0x18] sm:$0xff] }
 0x613   : > { %6321 = vmatprep.subr.mxu1 %v10122_v6  ;;  %6359 = vmatpush3.msra.mxu0 %v5807_v31 }
 0x614   : > { %6322 = vmatpush3.msra.mxu1 %v5792_v15  ;;  %6360 = vmatprep.subr.mxu0 %v10122_v6 }
 0x615   : > { %6323 = vmatprep.subr.mxu1 %v10122_v6  ;;  %6361 = vmatpush3.msra.mxu0 %v5806_v2 }
 0x616   : > { %6324 = vmatpush3.msra.mxu1 %v5791_v7  ;;  %6362 = vmatprep.subr.mxu0 %v10122_v6 }
 0x617   : > { %6325 = vmatprep.subr.mxu1 %v10122_v6  ;;  %6363 = vmatpush3.msra.mxu0 %v5805_v53 }
 0x618   : > { %6326 = vmatpush3.msra.mxu1 %v5790_v42  ;;  %6364 = vmatprep.subr.mxu0 %v10122_v6 }
 0x619   : > { %6327 = vmatprep.subr.mxu1 %v10122_v6  ;;  %6365 = vmatpush3.msra.mxu0 %v5804_v63 }
 0x61a   : > { %6328 = vmatpush3.msra.mxu1 %v5789_v25  ;;  %6366 = vmatprep.subr.mxu0 %v10122_v6 }
 0x61b   : > { %6329 = vmatprep.subr.mxu1 %v10122_v6  ;;  %6367 = vmatpush3.msra.mxu0 %v5803_v51 }
 0x61c   : > { %6330 = vmatpush3.msra.mxu1 %v5788_v21  ;;  %6369 = vmatmul.mubr.f32.vlgmr.msra.gmra.mxu0 %v4613_v13 }
 0x61d   : > { %6331 = vmatprep.subr.mxu1 %v10122_v6  ;;  %6406 = vmatprep.subr.mxu0 %v10122_v6 }
 0x61e   : > { %6332 = vmatpush3.msra.mxu1 %v5787_v56  ;;  %6407 = vmatpush3.msra.mxu0 %v5076_v4 }
 0x61f   : > { %6371 = vmatprep.subr.mxu1 %v10122_v6  ;;  %6334 = vmatmul.mubr.f32.vlgmr.msra.gmra.mxu1 %v4612_v43  ;;  %v5157_v43 = vld [vmem:[%s9952_s11 + $0x10] sm:$0xff] }
 0x620   : > { %6372 = vmatpush3.msra.mxu1 %v5834_v45  ;;  %6403 = vmatprep.mubr.msk.f32.mxu1 %vm6495_vm6, %v10122_v6  ;;  %v5156_v45 = vld [vmem:[%s9952_s11 + $0x8] sm:$0xff] }
 0x621   : > { %6373 = vmatprep.subr.mxu1 %v10122_v6  ;;  %6408 = vmatprep.subr.mxu0 %v10122_v6 }
 0x622   : > { %6374 = vmatpush3.msra.mxu1 %v5833_v46  ;;  %6409 = vmatpush3.msra.mxu0 %v5075_v40  ;;  %v5155_v46 = vld [vmem:[%s9952_s11] sm:$0xff] }
 0x623   : > { %6375 = vmatprep.subr.mxu1 %v10122_v6  ;;  %6410 = vmatprep.subr.mxu0 %v10122_v6  ;;  %v5836_v40 = vld [vmem:[%s9951_s10] ss:$0 sm:$0xff] }
 0x624   : > { %6376 = vmatpush3.msra.mxu1 %v5832_v8  ;;  %6411 = vmatpush3.msra.mxu0 %v5074_v3 }
 0x625   : > { %6377 = vmatprep.subr.mxu1 %v10122_v6  ;;  %6412 = vmatprep.subr.mxu0 %v10122_v6 }
 0x626   : > { %6378 = vmatpush3.msra.mxu1 %v5831_v57  ;;  %6413 = vmatpush3.msra.mxu0 %v5073_v60 }
 0x627   : > { %6379 = vmatprep.subr.mxu1 %v10122_v6  ;;  %6414 = vmatprep.subr.mxu0 %v10122_v6 }
 0x628   : > { %6380 = vmatpush3.msra.mxu1 %v5830_v18  ;;  %6415 = vmatpush3.msra.mxu0 %v5072_v50  ;;  %v5837_v18 = vld [vmem:[%s9953_s12] ss:$0 sm:$0xff] }
 0x629   : > { %6381 = vmatprep.subr.mxu1 %v10122_v6  ;;  %6416 = vmatprep.subr.mxu0 %v10122_v6 }
 0x62a   : > { %6382 = vmatpush3.msra.mxu1 %v5829_v17  ;;  %6417 = vmatpush3.msra.mxu0 %v5071_v11 }
 0x62b   : > { %6383 = vmatprep.subr.mxu1 %v10122_v6  ;;  %6418 = vmatprep.subr.mxu0 %v10122_v6 }
 0x62c   : > { %6384 = vmatpush3.msra.mxu1 %v5828_v48  ;;  %6419 = vmatpush3.msra.mxu0 %v5070_v35 }
 0x62d   : > { %6385 = vmatprep.subr.mxu1 %v10122_v6  ;;  %6420 = vmatprep.subr.mxu0 %v10122_v6 }
 0x62e   : > { %6386 = vmatpush3.msra.mxu1 %v5827_v55  ;;  %6421 = vmatpush3.msra.mxu0 %v5069_v26 }
 0x62f   : > { %6387 = vmatprep.subr.mxu1 %v10122_v6  ;;  %6422 = vmatprep.subr.mxu0 %v10122_v6 }
 0x630   : > { %6388 = vmatpush3.msra.mxu1 %v5826_v33  ;;  %6438 = vmatprep.mubr.msk.f32.mxu0 %vm6495_vm6, %v10122_v6 }
 0x631   : > { %6389 = vmatprep.subr.mxu1 %v10122_v6  ;;  %6423 = vmatpush3.msra.mxu0 %v5068_v22 }
 0x632   : > { %6390 = vmatpush3.msra.mxu1 %v5825_v9  ;;  %6424 = vmatprep.subr.mxu0 %v10122_v6 }
 0x633   : > { %6391 = vmatprep.subr.mxu1 %v10122_v6  ;;  %6425 = vmatpush3.msra.mxu0 %v5067_v20 }
 0x634   : > { %6392 = vmatpush3.msra.mxu1 %v5824_v44  ;;  %6426 = vmatprep.subr.mxu0 %v10122_v6 }
 0x635   : > { %6393 = vmatprep.subr.mxu1 %v10122_v6  ;;  %6427 = vmatpush3.msra.mxu0 %v5066_v49 }
 0x636   : > { %6394 = vmatpush3.msra.mxu1 %v5823_v61  ;;  %6428 = vmatprep.subr.mxu0 %v10122_v6 }
 0x637   : > { %6395 = vmatprep.subr.mxu1 %v10122_v6  ;;  %6429 = vmatpush3.msra.mxu0 %v5065_v41 }
 0x638   : > { %6396 = vmatpush3.msra.mxu1 %v5822_v39  ;;  %6430 = vmatprep.subr.mxu0 %v10122_v6 }
 0x639   : > { %6397 = vmatprep.subr.mxu1 %v10122_v6  ;;  %6431 = vmatpush3.msra.mxu0 %v5064_v12 }
 0x63a   : > { %6398 = vmatpush3.msra.mxu1 %v5821_v24  ;;  %6432 = vmatprep.subr.mxu0 %v10122_v6 }
 0x63b   : > { %6399 = vmatprep.subr.mxu1 %v10122_v6  ;;  %6433 = vmatpush3.msra.mxu0 %v5063_v37 }
 0x63c   : > { %6400 = vmatpush3.msra.mxu1 %v5820_v10  ;;  %6434 = vmatprep.subr.mxu0 %v10122_v6 }
 0x63d   : > { %6401 = vmatprep.subr.mxu1 %v10122_v6  ;;  %6435 = vmatpush3.msra.mxu0 %v5062_v1 }
 0x63e   : > { %6402 = vmatpush3.msra.mxu1 %v5819_v47  ;;  %6436 = vmatprep.subr.mxu0 %v10122_v6 }
 0x63f   : > { %6404 = vmatmul.mubr.f32.vlgmr.msra.gmra.mxu1 %v4614_v23  ;;  %6441 = vmatprep.subr.mxu1 %v10122_v6 }
 0x640   : > { %6473 = vmatprep.mubr.msk.f32.mxu1 %vm6495_vm6, %v10122_v6  ;;  %6437 = vmatpush3.msra.mxu0 %v5061_v54 }
 0x641   : > { %6442 = vmatpush3.msra.mxu1 %v5170_v59 }
 0x642   : > { %6443 = vmatprep.subr.mxu1 %v10122_v6 }
 0x643   : > { %6444 = vmatpush3.msra.mxu1 %v5169_v32 }
 0x644   : > { %6445 = vmatprep.subr.mxu1 %v10122_v6 }
 0x645   : > { %6446 = vmatpush3.msra.mxu1 %v5168_v29 }
 0x646   : > { %6447 = vmatprep.subr.mxu1 %v10122_v6 }
 0x647   : > { %6448 = vmatpush3.msra.mxu1 %v5167_v62 }
 0x648   : > { %6449 = vmatprep.subr.mxu1 %v10122_v6 }
 0x649   : > { %6450 = vmatpush3.msra.mxu1 %v5166_v58 }
 0x64a   : > { %6451 = vmatprep.subr.mxu1 %v10122_v6 }
 0x64b   : > { %6452 = vmatpush3.msra.mxu1 %v5165_v27 }
 0x64c   : > { %6453 = vmatprep.subr.mxu1 %v10122_v6 }
 0x64d   : > { %6454 = vmatpush3.msra.mxu1 %v5164_v30 }
 0x64e   : > { %6455 = vmatprep.subr.mxu1 %v10122_v6 }
 0x64f   : > { %6456 = vmatpush3.msra.mxu1 %v5163_v19 }
 0x650   : > { %6457 = vmatprep.subr.mxu1 %v10122_v6 }
 0x651   : > { %6458 = vmatpush3.msra.mxu1 %v5162_v14 }
 0x652   : > { %6459 = vmatprep.subr.mxu1 %v10122_v6 }
 0x653   : > { %6460 = vmatpush3.msra.mxu1 %v5161_v5 }
 0x654   : > { %6461 = vmatprep.subr.mxu1 %v10122_v6 }
 0x655   : > { %6462 = vmatpush3.msra.mxu1 %v5160_v52 }
 0x656   : > { %6463 = vmatprep.subr.mxu1 %v10122_v6 }
 0x657   : > { %6464 = vmatpush3.msra.mxu1 %v5159_v38 }
 0x658   : > { %6465 = vmatprep.subr.mxu1 %v10122_v6 }
 0x659   : > { %6466 = vmatpush3.msra.mxu1 %v5158_v28 }
 0x65a   : > { %6467 = vmatprep.subr.mxu1 %v10122_v6 }
 0x65b   : > { %6468 = vmatpush3.msra.mxu1 %v5157_v43 }
 0x65c   : > { %6469 = vmatprep.subr.mxu1 %v10122_v6 }
 0x65d   : > { %6470 = vmatpush3.msra.mxu1 %v5156_v45 }
 0x65e   : > { %6471 = vmatprep.subr.mxu1 %v10122_v6 }
 0x65f   : > { %6472 = vmatpush3.msra.mxu1 %v5155_v46 }
 0x6bb   : > { %v4784_v31 = vpop.f32.mrf.mxu0 }
 0x6bd   : > { %v6300_v15 = vpop.f32.mrf.mxu0 }
 0x6bf   : > { %v4714_v0 = vpop.f32.mrf.mxu1 }
 0x6c0   : > { %v4785_v36 = vadd.f32 %v4784_v31, %v4714_v0 }
 0x6c1   : > { %v6265_v2 = vpop.f32.mrf.mxu1 }
 0x6dc   : > { %v4959_v7 = vpop.f32.mrf.mxu0 }
 0x6de   : > { %v6370_v53 = vpop.f32.mrf.mxu0 }
 0x6df   : > { %v4871_v42 = vpop.f32.mrf.mxu1 }
 0x6e0   : > { %v4875_v63 = vadd.f32 %v4871_v42, %v4785_v36 }
 0x6e1   : > { %v6335_v34 = vpop.f32.mrf.mxu1 }
 0x6e2   : > { %v4963_v25 = vadd.f32 %v4959_v7, %v4875_v63 }
 0x6ff   : > { %v5047_v51 = vpop.f32.mrf.mxu1 }
 0x700   : > { %v5051_v21 = vadd.f32 %v5047_v51, %v4963_v25 }
 0x701   : > { %v6405_v13 = vpop.f32.mrf.mxu1 }
 0x702   : > { %v5059_v56 = vadd.f32 %v5835_v16, %v5051_v21 }
 0x704   : > { %v5060_v4 = vmax.f32 %v5059_v56, 0.0 }
 0x706   : > { %6439 = vmatmul.mubr.f32.vlgmr.msra.gmra.mxu0 %v5060_v4 }
 0x7c6   : > { %v5150_v8 = vpop.f32.mrf.mxu0 }
 0x7c7   : > { %v5151_v3 = vadd.f32 %v5836_v40, %v5150_v8 }
 0x7c8   : > { %v6440_v57 = vpop.f32.mrf.mxu0 }
 0x7c9   : > { %v5154_v60 = vmax.f32 %v5151_v3, 0.0 }
 0x7cb   : > { %6474 = vmatmul.mubr.f32.vlgmr.msra.gmra.mxu1 %v5154_v60 }
 0x88b   : > { %v5244_v6 = vpop.f32.mrf.mxu1 }
 0x88c   : > { %v5245_v50 = vadd.f32 %v5837_v18, %v5244_v6 }
 0x88d   : > { %v6475_v17 = vpop.f32.mrf.mxu1 }
 0x88e   : > { %5248 = vst [vmem:[%s440_s30] sm:$0xff] %v5245_v50 }
 0x88f PF: > { %s23_s25 = sadd.s32 1, %s6492_s25  }
 0x890   : > { %p20_p5 = scmp.ge.s32.totalorder %s23_s25, 4  }
 0x892   :  { %22 = sbr.rel (!%p20_p5) target bundleno = 1 (0x1), region = 116 }

</bundles_post_ra>
